<compile_context>
chip_gen: v5e
topology: v5e:2x2
jax: 0.10.0
libtpu: 0.0.40
codegen_flags: <defaults>
</compile_context>

<pallas_src>
import math
import functools

import numpy as np
import jax
import jax.numpy as jnp
from jax import lax
from jax.experimental import pallas as pl
from jax.experimental.pallas import tpu as pltpu

BETA = 0.65
GAMMA = -0.1
ZETA = 1.1
EPS = 1e-10

B_BLK = 8  # images per grid step (== sublane count)
_OFFSETS = tuple((dy, dx) for dy in (-1, 0, 1) for dx in (-1, 0, 1))


def _tree_sum(vals):
    vals = list(vals)
    while len(vals) > 1:
        nxt = [vals[i] + vals[i + 1] for i in range(0, len(vals) - 1, 2)]
        if len(vals) % 2:
            nxt.append(vals[-1])
        vals = nxt
    return vals[0]


# ----------------------------------------------------------------------------
# Fused kernel: conv1(3x3) -> ReLU -> conv2(3x3) -> +x -> L0 gates & penalty
# ----------------------------------------------------------------------------
def _fused_parsenet_kernel(x_ref, mask_ref, w1_ref, b1_ref, w2_ref, b2_ref,
                           param_ref, gate_ref, pen_ref, *, H, W, hidden):
    """One block of B_BLK images per grid step; activations are (B_BLK, H*W)."""
    HW = H * W
    x = x_ref[...]                                   # (B_BLK, HW)  lane-dense
    masks = mask_ref[...]                            # (4, HW) y-1/y+1/x-1/x+1 valid

    # Per-tap border masks; the dy/dx factors combine once per tap on (1, HW).
    tap_masks = []
    for dy, dx in _OFFSETS:
        m = None
        if dy != 0:
            m = masks[0:1] if dy < 0 else masks[1:2]
        if dx != 0:
            mx = masks[2:3] if dx < 0 else masks[3:4]
            m = mx if m is None else m * mx
        tap_masks.append(m)

    def taps_of(a):
        """The 9 lane-rolled, border-masked shifts of a (rows, HW) tile."""
        out = []
        for t, (dy, dx) in enumerate(_OFFSETS):
            off = dy * W + dx
            r = a if off == 0 else pltpu.roll(a, shift=(-off) % HW, axis=1)
            m = tap_masks[t]
            out.append(r if m is None else r * m)
        return out

    # ---- conv1 (inChannel == 1): 9 shared masked taps of x, then one scalar
    #      multiply-accumulate chain per hidden channel (independent chains).
    x_taps = taps_of(x)                              # 9 x (B_BLK, HW)
    hs = []
    for c in range(hidden):
        acc = w1_ref[c] * x_taps[0]
        for t in range(1, 9):
            acc = acc + w1_ref[t * hidden + c] * x_taps[t]
        hs.append(jnp.maximum(acc + b1_ref[c], 0.0))

    # ---- conv2 (outChannel == 1): per tap a VPU tree-sum over hidden channels
    #      (no XLU reductions), one mask multiply per tap, then a tap tree-sum.
    y_parts = []
    for t, (dy, dx) in enumerate(_OFFSETS):
        off = dy * W + dx
        shift = (-off) % HW
        ch_terms = []
        for c in range(hidden):
            r = hs[c] if off == 0 else pltpu.roll(hs[c], shift=shift, axis=1)
            ch_terms.append(w2_ref[t * hidden + c] * r)
        tap_acc = _tree_sum(ch_terms)
        m = tap_masks[t]
        y_parts.append(tap_acc if m is None else tap_acc * m)
    y = _tree_sum(y_parts) + b2_ref[0]

    # ---- residual skip + L0 gate / penalty (eval-mode branch of the spec) ---
    param = y + x
    param_ref[...] = param
    loc = jnp.log(param * param + EPS)
    gate = jax.nn.sigmoid(loc) * (ZETA - GAMMA) + GAMMA
    gate_ref[...] = jnp.clip(gate, 0.0, 1.0)
    s = jax.nn.sigmoid(loc - BETA * math.log(-GAMMA / ZETA))   # (B_BLK, HW)
    # Lane-dense partial reduction of the per-image penalty: fold the HW axis
    # down to 128 lanes here (static 128-aligned slices); the final 128-wide
    # sum happens for free in the XLA wrapper.  One unmasked (B_BLK, 128) vst.
    part = s[:, 0:128]
    for k in range(1, HW // 128):
        part = part + s[:, k * 128:(k + 1) * 128]
    pen_ref[...] = part


# ----------------------------------------------------------------------------
# Wrapper
# ----------------------------------------------------------------------------
def _border_masks_factorized(H, W):
    """(4, H*W) validity rows for source y-1, y+1, x-1, x+1 (0/1 floats)."""
    p = np.arange(H * W)
    yy, xx = p // W, p % W
    rows = np.stack([yy >= 1, yy <= H - 2, xx >= 1, xx <= W - 2], axis=0)
    return jnp.asarray(rows.astype(np.float32))


def init_params(key, in_ch=1, hidden=8, out_ch=1):
    k1, k2 = jax.random.split(key)
    return {
        "w1": 0.1 * jax.random.normal(k1, (3, 3, in_ch, hidden), jnp.float32),
        "b1": 0.01 * jnp.ones((hidden,), jnp.float32),
        "w2": 0.1 * jax.random.normal(k2, (3, 3, hidden, out_ch), jnp.float32),
        "b2": 0.01 * jnp.ones((out_ch,), jnp.float32),
    }


def parsenet1_forward(params, x_nchw):
    N, c_in, H, W = x_nchw.shape
    HW = H * W
    w1, b1, w2, b2 = params["w1"], params["b1"], params["w2"], params["b2"]
    hidden, out_ch = w1.shape[3], w2.shape[3]
    assert w1.shape[:3] == (3, 3, c_in) and w2.shape[:3] == (3, 3, hidden)
    assert out_ch == c_in, "residual skip requires inChannel == outChannel"
    # TODO(synk): general inChannel/outChannel > 1 path not implemented;
    # ParseNet1's defaults are inChannel = outChannel = 1.
    assert c_in == 1 and out_ch == 1, "kernel specialised to the 1-channel default"
    assert HW % 128 == 0, "H*W must be a multiple of 128 for lane-dense tiles"

    n_blk = -(-N // B_BLK)                       # cdiv(N, B_BLK)
    N_pad = n_blk * B_BLK
    x_flat = x_nchw.reshape(N, HW).astype(jnp.float32)   # free, contiguous reshape
    if N_pad != N:
        x_flat = jnp.pad(x_flat, ((0, N_pad - N), (0, 0)))

    masks = _border_masks_factorized(H, W)                 # (4, HW), VMEM-resident
    w1_s = w1.reshape(-1).astype(jnp.float32)              # (9*hidden,)  [t*hidden+c]
    w2_s = w2.reshape(-1).astype(jnp.float32)              # (9*hidden,)  [t*hidden+c]
    b1_s = b1.reshape(-1).astype(jnp.float32)              # (hidden,)
    b2_s = b2.reshape(-1).astype(jnp.float32)              # (1,)

    kernel = functools.partial(_fused_parsenet_kernel, H=H, W=W, hidden=hidden)

    flops = N_pad * HW * (2 * 9 * 2 * hidden + 16)
    transcendentals = 3 * N_pad * HW
    bytes_accessed = 4 * (x_flat.size + masks.size + w1_s.size + w2_s.size
                          + b1_s.size + b2_s.size + 2 * N_pad * HW + N_pad * 128)

    param_flat, gate_flat, pen_part = pl.pallas_call(
        kernel,
        out_shape=(
            jax.ShapeDtypeStruct((N_pad, HW), jnp.float32),   # param maps (flat)
            jax.ShapeDtypeStruct((N_pad, HW), jnp.float32),   # gate maps (flat)
            jax.ShapeDtypeStruct((N_pad, 128), jnp.float32),  # penalty lane partials
        ),
        grid=(n_blk,),
        in_specs=[
            pl.BlockSpec((B_BLK, HW), lambda n: (n, 0)),
            pl.BlockSpec((4, HW), lambda n: (0, 0)),          # resident across steps
            pl.BlockSpec(memory_space=pltpu.MemorySpace.SMEM),
            pl.BlockSpec(memory_space=pltpu.MemorySpace.SMEM),
            pl.BlockSpec(memory_space=pltpu.MemorySpace.SMEM),
            pl.BlockSpec(memory_space=pltpu.MemorySpace.SMEM),
        ],
        out_specs=(
            pl.BlockSpec((B_BLK, HW), lambda n: (n, 0)),
            pl.BlockSpec((B_BLK, HW), lambda n: (n, 0)),
            pl.BlockSpec((B_BLK, 128), lambda n: (n, 0)),
        ),
        compiler_params=pltpu.CompilerParams(
            dimension_semantics=("parallel",),    # shards batch blocks on v7x's 2 TCs
            vmem_limit_bytes=32 * 1024 * 1024,
        ),
        cost_estimate=pl.CostEstimate(
            flops=int(flops),
            transcendentals=int(transcendentals),
            bytes_accessed=int(bytes_accessed),
        ),
    )(x_flat, masks, w1_s, b1_s, w2_s, b2_s)

    # Free, contiguous reshapes / slices back to PyTorch NCHW conventions.
    param_maps = param_flat[:N].reshape(N, 1, H, W)
    gate_maps = gate_flat[:N].reshape(N, 1, H, W)
    l0_loss = jnp.sum(pen_part[:N], axis=1).reshape(N, 1, 1, 1)
    return l0_loss, param_maps, gate_maps


# ----------------------------------------------------------------------------
# Pure-JAX references (for correctness checking only)
# ----------------------------------------------------------------------------
def _reference_parser(params, x_nchw):
    w1, b1, w2, b2 = params["w1"], params["b1"], params["w2"], params["b2"]
    dn = ("NCHW", "HWIO", "NCHW")
    h = lax.conv_general_dilated(x_nchw, w1, (1, 1), "SAME", dimension_numbers=dn,
                                 precision=lax.Precision.HIGHEST)
    h = jnp.maximum(h + b1.reshape(1, -1, 1, 1), 0.0)
    y = lax.conv_general_dilated(h, w2, (1, 1), "SAME", dimension_numbers=dn,
                                 precision=lax.Precision.HIGHEST)
    return y + b2.reshape(1, -1, 1, 1) + x_nchw


def _reference_l0(param_maps):
    loc = jnp.log(param_maps * param_maps + EPS)
    gates = jnp.clip(jax.nn.sigmoid(loc) * (ZETA - GAMMA) + GAMMA, 0.0, 1.0)
    pen = jnp.sum(jax.nn.sigmoid(loc - BETA * math.log(-GAMMA / ZETA)),
                  axis=(1, 2, 3), keepdims=True)
    return gates, pen


if __name__ == "__main__":
    key = jax.random.PRNGKey(0)
    kx, kp = jax.random.split(key)

    # PyTorch-style NCHW input; ParseNet1 defaults: inChannel = outChannel = 1.
    # N = 12 exercises both the ragged batch padding (12 -> 16) and a 2-step
    # grid (so v7x can shard the two blocks across its TensorCores).
    x = jax.random.normal(kx, (12, 1, 16, 16), dtype=jnp.float32)
    params = init_params(kp, in_ch=1, hidden=8, out_ch=1)

    fwd = jax.jit(parsenet1_forward)
    l0_loss, param_maps, gate_maps = fwd(params, x)
    jax.block_until_ready((l0_loss, param_maps, gate_maps))

    assert l0_loss.shape == (12, 1, 1, 1)
    assert param_maps.shape == (12, 1, 16, 16)
    assert gate_maps.shape == (12, 1, 16, 16)

    # Parser path vs. high-precision XLA conv reference.
    ref_pm = _reference_parser(params, x)
    np.testing.assert_allclose(np.asarray(param_maps), np.asarray(ref_pm),
                               rtol=5e-4, atol=5e-4)
    # L0 gate/penalty math recomputed from the kernel's own param maps
    # (avoids log-amplification of tiny conv rounding differences near zero).
    ref_gates, ref_pen = _reference_l0(param_maps)
    np.testing.assert_allclose(np.asarray(gate_maps), np.asarray(ref_gates),
                               rtol=1e-4, atol=1e-4)
    np.testing.assert_allclose(np.asarray(l0_loss), np.asarray(ref_pen),
                               rtol=1e-4, atol=1e-3)

    print("KERNEL_OK")
</pallas_src>

<mosaic_0001>
module attributes {stable_mosaic.version = 11 : i64} {
  func.func @_fused_parsenet_kernel(%arg0: i32, %arg1: memref<8x256xf32, #tpu.memory_space<vmem>>, %arg2: memref<4x256xf32, #tpu.memory_space<vmem>>, %arg3: memref<72xf32, #tpu.memory_space<smem>>, %arg4: memref<8xf32, #tpu.memory_space<smem>>, %arg5: memref<72xf32, #tpu.memory_space<smem>>, %arg6: memref<1xf32, #tpu.memory_space<smem>>, %arg7: memref<8x256xf32, #tpu.memory_space<vmem>>, %arg8: memref<8x256xf32, #tpu.memory_space<vmem>>, %arg9: memref<8x128xf32, #tpu.memory_space<vmem>>) attributes {dimension_semantics = [#tpu.dimension_semantics<parallel>], iteration_bounds = array<i64: 2>, scalar_prefetch = 0 : i64, scratch_operands = 0 : i64, tpu.core_type = #tpu.core_type<tc>, window_params = [{transform_indices = @transform_0, window_bounds = array<i64: 8, 256>}, {pipeline_mode = #tpu.pipeline_mode<synchronous>, transform_indices = @transform_1, window_bounds = array<i64: 4, 256>}, {transform_indices = @transform_2, window_bounds = array<i64: 72>}, {transform_indices = @transform_3, window_bounds = array<i64: 8>}, {transform_indices = @transform_4, window_bounds = array<i64: 72>}, {transform_indices = @transform_5, window_bounds = array<i64: 1>}, {transform_indices = @transform_6, window_bounds = array<i64: 8, 256>}, {transform_indices = @transform_7, window_bounds = array<i64: 8, 256>}, {transform_indices = @transform_8, window_bounds = array<i64: 8, 128>}]} {
    %c0 = arith.constant 0 : index
    %c0_0 = arith.constant 0 : index
    %0 = vector.load %arg1[%c0, %c0_0] : memref<8x256xf32, #tpu.memory_space<vmem>>, vector<8x256xf32>
    %c0_1 = arith.constant 0 : index
    %c0_2 = arith.constant 0 : index
    %1 = vector.load %arg2[%c0_1, %c0_2] : memref<4x256xf32, #tpu.memory_space<vmem>>, vector<4x256xf32>
    %2 = vector.extract_strided_slice %1 {offsets = [0, 0], sizes = [1, 256], strides = [1, 1]} : vector<4x256xf32> to vector<1x256xf32>
    %3 = vector.extract_strided_slice %1 {offsets = [2, 0], sizes = [1, 256], strides = [1, 1]} : vector<4x256xf32> to vector<1x256xf32>
    %4 = arith.mulf %2, %3 : vector<1x256xf32>
    %5 = vector.extract_strided_slice %1 {offsets = [0, 0], sizes = [1, 256], strides = [1, 1]} : vector<4x256xf32> to vector<1x256xf32>
    %6 = vector.extract_strided_slice %1 {offsets = [0, 0], sizes = [1, 256], strides = [1, 1]} : vector<4x256xf32> to vector<1x256xf32>
    %7 = vector.extract_strided_slice %1 {offsets = [3, 0], sizes = [1, 256], strides = [1, 1]} : vector<4x256xf32> to vector<1x256xf32>
    %8 = arith.mulf %6, %7 : vector<1x256xf32>
    %9 = vector.extract_strided_slice %1 {offsets = [2, 0], sizes = [1, 256], strides = [1, 1]} : vector<4x256xf32> to vector<1x256xf32>
    %10 = vector.extract_strided_slice %1 {offsets = [3, 0], sizes = [1, 256], strides = [1, 1]} : vector<4x256xf32> to vector<1x256xf32>
    %11 = vector.extract_strided_slice %1 {offsets = [1, 0], sizes = [1, 256], strides = [1, 1]} : vector<4x256xf32> to vector<1x256xf32>
    %12 = vector.extract_strided_slice %1 {offsets = [2, 0], sizes = [1, 256], strides = [1, 1]} : vector<4x256xf32> to vector<1x256xf32>
    %13 = arith.mulf %11, %12 : vector<1x256xf32>
    %14 = vector.extract_strided_slice %1 {offsets = [1, 0], sizes = [1, 256], strides = [1, 1]} : vector<4x256xf32> to vector<1x256xf32>
    %15 = vector.extract_strided_slice %1 {offsets = [1, 0], sizes = [1, 256], strides = [1, 1]} : vector<4x256xf32> to vector<1x256xf32>
    %16 = vector.extract_strided_slice %1 {offsets = [3, 0], sizes = [1, 256], strides = [1, 1]} : vector<4x256xf32> to vector<1x256xf32>
    %17 = arith.mulf %15, %16 : vector<1x256xf32>
    %c17_i32 = arith.constant 17 : i32
    %18 = tpu.dynamic_rotate %0 by %c17_i32 dim 1 : vector<8x256xf32>, i32 -> vector<8x256xf32>
    %19 = vector.broadcast %4 : vector<1x256xf32> to vector<8x256xf32>
    %20 = arith.mulf %18, %19 : vector<8x256xf32>
    %c16_i32 = arith.constant 16 : i32
    %21 = tpu.dynamic_rotate %0 by %c16_i32 dim 1 : vector<8x256xf32>, i32 -> vector<8x256xf32>
    %22 = vector.broadcast %5 : vector<1x256xf32> to vector<8x256xf32>
    %23 = arith.mulf %21, %22 : vector<8x256xf32>
    %c15_i32 = arith.constant 15 : i32
    %24 = tpu.dynamic_rotate %0 by %c15_i32 dim 1 : vector<8x256xf32>, i32 -> vector<8x256xf32>
    %25 = vector.broadcast %8 : vector<1x256xf32> to vector<8x256xf32>
    %26 = arith.mulf %24, %25 : vector<8x256xf32>
    %c1_i32 = arith.constant 1 : i32
    %27 = tpu.dynamic_rotate %0 by %c1_i32 dim 1 : vector<8x256xf32>, i32 -> vector<8x256xf32>
    %28 = vector.broadcast %9 : vector<1x256xf32> to vector<8x256xf32>
    %29 = arith.mulf %27, %28 : vector<8x256xf32>
    %c255_i32 = arith.constant 255 : i32
    %30 = tpu.dynamic_rotate %0 by %c255_i32 dim 1 : vector<8x256xf32>, i32 -> vector<8x256xf32>
    %31 = vector.broadcast %10 : vector<1x256xf32> to vector<8x256xf32>
    %32 = arith.mulf %30, %31 : vector<8x256xf32>
    %c241_i32 = arith.constant 241 : i32
    %33 = tpu.dynamic_rotate %0 by %c241_i32 dim 1 : vector<8x256xf32>, i32 -> vector<8x256xf32>
    %34 = vector.broadcast %13 : vector<1x256xf32> to vector<8x256xf32>
    %35 = arith.mulf %33, %34 : vector<8x256xf32>
    %c240_i32 = arith.constant 240 : i32
    %36 = tpu.dynamic_rotate %0 by %c240_i32 dim 1 : vector<8x256xf32>, i32 -> vector<8x256xf32>
    %37 = vector.broadcast %14 : vector<1x256xf32> to vector<8x256xf32>
    %38 = arith.mulf %36, %37 : vector<8x256xf32>
    %c239_i32 = arith.constant 239 : i32
    %39 = tpu.dynamic_rotate %0 by %c239_i32 dim 1 : vector<8x256xf32>, i32 -> vector<8x256xf32>
    %40 = vector.broadcast %17 : vector<1x256xf32> to vector<8x256xf32>
    %41 = arith.mulf %39, %40 : vector<8x256xf32>
    %c0_3 = arith.constant 0 : index
    %42 = memref.load %arg3[%c0_3] : memref<72xf32, #tpu.memory_space<smem>>
    %43 = vector.broadcast %42 : f32 to vector<8x256xf32>
    %44 = arith.mulf %43, %20 : vector<8x256xf32>
    %c8 = arith.constant 8 : index
    %45 = memref.load %arg3[%c8] : memref<72xf32, #tpu.memory_space<smem>>
    %46 = vector.broadcast %45 : f32 to vector<8x256xf32>
    %47 = arith.mulf %46, %23 : vector<8x256xf32>
    %48 = arith.addf %44, %47 : vector<8x256xf32>
    %c16 = arith.constant 16 : index
    %49 = memref.load %arg3[%c16] : memref<72xf32, #tpu.memory_space<smem>>
    %50 = vector.broadcast %49 : f32 to vector<8x256xf32>
    %51 = arith.mulf %50, %26 : vector<8x256xf32>
    %52 = arith.addf %48, %51 : vector<8x256xf32>
    %c24 = arith.constant 24 : index
    %53 = memref.load %arg3[%c24] : memref<72xf32, #tpu.memory_space<smem>>
    %54 = vector.broadcast %53 : f32 to vector<8x256xf32>
    %55 = arith.mulf %54, %29 : vector<8x256xf32>
    %56 = arith.addf %52, %55 : vector<8x256xf32>
    %c32 = arith.constant 32 : index
    %57 = memref.load %arg3[%c32] : memref<72xf32, #tpu.memory_space<smem>>
    %58 = vector.broadcast %57 : f32 to vector<8x256xf32>
    %59 = arith.mulf %58, %0 : vector<8x256xf32>
    %60 = arith.addf %56, %59 : vector<8x256xf32>
    %c40 = arith.constant 40 : index
    %61 = memref.load %arg3[%c40] : memref<72xf32, #tpu.memory_space<smem>>
    %62 = vector.broadcast %61 : f32 to vector<8x256xf32>
    %63 = arith.mulf %62, %32 : vector<8x256xf32>
    %64 = arith.addf %60, %63 : vector<8x256xf32>
    %c48 = arith.constant 48 : index
    %65 = memref.load %arg3[%c48] : memref<72xf32, #tpu.memory_space<smem>>
    %66 = vector.broadcast %65 : f32 to vector<8x256xf32>
    %67 = arith.mulf %66, %35 : vector<8x256xf32>
    %68 = arith.addf %64, %67 : vector<8x256xf32>
    %c56 = arith.constant 56 : index
    %69 = memref.load %arg3[%c56] : memref<72xf32, #tpu.memory_space<smem>>
    %70 = vector.broadcast %69 : f32 to vector<8x256xf32>
    %71 = arith.mulf %70, %38 : vector<8x256xf32>
    %72 = arith.addf %68, %71 : vector<8x256xf32>
    %c64 = arith.constant 64 : index
    %73 = memref.load %arg3[%c64] : memref<72xf32, #tpu.memory_space<smem>>
    %74 = vector.broadcast %73 : f32 to vector<8x256xf32>
    %75 = arith.mulf %74, %41 : vector<8x256xf32>
    %76 = arith.addf %72, %75 : vector<8x256xf32>
    %c0_4 = arith.constant 0 : index
    %77 = memref.load %arg4[%c0_4] : memref<8xf32, #tpu.memory_space<smem>>
    %78 = vector.broadcast %77 : f32 to vector<8x256xf32>
    %79 = arith.addf %76, %78 : vector<8x256xf32>
    %cst = arith.constant 0.000000e+00 : f32
    %80 = vector.broadcast %cst : f32 to vector<8x256xf32>
    %81 = arith.maximumf %79, %80 : vector<8x256xf32>
    %c1 = arith.constant 1 : index
    %82 = memref.load %arg3[%c1] : memref<72xf32, #tpu.memory_space<smem>>
    %83 = vector.broadcast %82 : f32 to vector<8x256xf32>
    %84 = arith.mulf %83, %20 : vector<8x256xf32>
    %c9 = arith.constant 9 : index
    %85 = memref.load %arg3[%c9] : memref<72xf32, #tpu.memory_space<smem>>
    %86 = vector.broadcast %85 : f32 to vector<8x256xf32>
    %87 = arith.mulf %86, %23 : vector<8x256xf32>
    %88 = arith.addf %84, %87 : vector<8x256xf32>
    %c17 = arith.constant 17 : index
    %89 = memref.load %arg3[%c17] : memref<72xf32, #tpu.memory_space<smem>>
    %90 = vector.broadcast %89 : f32 to vector<8x256xf32>
    %91 = arith.mulf %90, %26 : vector<8x256xf32>
    %92 = arith.addf %88, %91 : vector<8x256xf32>
    %c25 = arith.constant 25 : index
    %93 = memref.load %arg3[%c25] : memref<72xf32, #tpu.memory_space<smem>>
    %94 = vector.broadcast %93 : f32 to vector<8x256xf32>
    %95 = arith.mulf %94, %29 : vector<8x256xf32>
    %96 = arith.addf %92, %95 : vector<8x256xf32>
    %c33 = arith.constant 33 : index
    %97 = memref.load %arg3[%c33] : memref<72xf32, #tpu.memory_space<smem>>
    %98 = vector.broadcast %97 : f32 to vector<8x256xf32>
    %99 = arith.mulf %98, %0 : vector<8x256xf32>
    %100 = arith.addf %96, %99 : vector<8x256xf32>
    %c41 = arith.constant 41 : index
    %101 = memref.load %arg3[%c41] : memref<72xf32, #tpu.memory_space<smem>>
    %102 = vector.broadcast %101 : f32 to vector<8x256xf32>
    %103 = arith.mulf %102, %32 : vector<8x256xf32>
    %104 = arith.addf %100, %103 : vector<8x256xf32>
    %c49 = arith.constant 49 : index
    %105 = memref.load %arg3[%c49] : memref<72xf32, #tpu.memory_space<smem>>
    %106 = vector.broadcast %105 : f32 to vector<8x256xf32>
    %107 = arith.mulf %106, %35 : vector<8x256xf32>
    %108 = arith.addf %104, %107 : vector<8x256xf32>
    %c57 = arith.constant 57 : index
    %109 = memref.load %arg3[%c57] : memref<72xf32, #tpu.memory_space<smem>>
    %110 = vector.broadcast %109 : f32 to vector<8x256xf32>
    %111 = arith.mulf %110, %38 : vector<8x256xf32>
    %112 = arith.addf %108, %111 : vector<8x256xf32>
    %c65 = arith.constant 65 : index
    %113 = memref.load %arg3[%c65] : memref<72xf32, #tpu.memory_space<smem>>
    %114 = vector.broadcast %113 : f32 to vector<8x256xf32>
    %115 = arith.mulf %114, %41 : vector<8x256xf32>
    %116 = arith.addf %112, %115 : vector<8x256xf32>
    %c1_5 = arith.constant 1 : index
    %117 = memref.load %arg4[%c1_5] : memref<8xf32, #tpu.memory_space<smem>>
    %118 = vector.broadcast %117 : f32 to vector<8x256xf32>
    %119 = arith.addf %116, %118 : vector<8x256xf32>
    %cst_6 = arith.constant 0.000000e+00 : f32
    %120 = vector.broadcast %cst_6 : f32 to vector<8x256xf32>
    %121 = arith.maximumf %119, %120 : vector<8x256xf32>
    %c2 = arith.constant 2 : index
    %122 = memref.load %arg3[%c2] : memref<72xf32, #tpu.memory_space<smem>>
    %123 = vector.broadcast %122 : f32 to vector<8x256xf32>
    %124 = arith.mulf %123, %20 : vector<8x256xf32>
    %c10 = arith.constant 10 : index
    %125 = memref.load %arg3[%c10] : memref<72xf32, #tpu.memory_space<smem>>
    %126 = vector.broadcast %125 : f32 to vector<8x256xf32>
    %127 = arith.mulf %126, %23 : vector<8x256xf32>
    %128 = arith.addf %124, %127 : vector<8x256xf32>
    %c18 = arith.constant 18 : index
    %129 = memref.load %arg3[%c18] : memref<72xf32, #tpu.memory_space<smem>>
    %130 = vector.broadcast %129 : f32 to vector<8x256xf32>
    %131 = arith.mulf %130, %26 : vector<8x256xf32>
    %132 = arith.addf %128, %131 : vector<8x256xf32>
    %c26 = arith.constant 26 : index
    %133 = memref.load %arg3[%c26] : memref<72xf32, #tpu.memory_space<smem>>
    %134 = vector.broadcast %133 : f32 to vector<8x256xf32>
    %135 = arith.mulf %134, %29 : vector<8x256xf32>
    %136 = arith.addf %132, %135 : vector<8x256xf32>
    %c34 = arith.constant 34 : index
    %137 = memref.load %arg3[%c34] : memref<72xf32, #tpu.memory_space<smem>>
    %138 = vector.broadcast %137 : f32 to vector<8x256xf32>
    %139 = arith.mulf %138, %0 : vector<8x256xf32>
    %140 = arith.addf %136, %139 : vector<8x256xf32>
    %c42 = arith.constant 42 : index
    %141 = memref.load %arg3[%c42] : memref<72xf32, #tpu.memory_space<smem>>
    %142 = vector.broadcast %141 : f32 to vector<8x256xf32>
    %143 = arith.mulf %142, %32 : vector<8x256xf32>
    %144 = arith.addf %140, %143 : vector<8x256xf32>
    %c50 = arith.constant 50 : index
    %145 = memref.load %arg3[%c50] : memref<72xf32, #tpu.memory_space<smem>>
    %146 = vector.broadcast %145 : f32 to vector<8x256xf32>
    %147 = arith.mulf %146, %35 : vector<8x256xf32>
    %148 = arith.addf %144, %147 : vector<8x256xf32>
    %c58 = arith.constant 58 : index
    %149 = memref.load %arg3[%c58] : memref<72xf32, #tpu.memory_space<smem>>
    %150 = vector.broadcast %149 : f32 to vector<8x256xf32>
    %151 = arith.mulf %150, %38 : vector<8x256xf32>
    %152 = arith.addf %148, %151 : vector<8x256xf32>
    %c66 = arith.constant 66 : index
    %153 = memref.load %arg3[%c66] : memref<72xf32, #tpu.memory_space<smem>>
    %154 = vector.broadcast %153 : f32 to vector<8x256xf32>
    %155 = arith.mulf %154, %41 : vector<8x256xf32>
    %156 = arith.addf %152, %155 : vector<8x256xf32>
    %c2_7 = arith.constant 2 : index
    %157 = memref.load %arg4[%c2_7] : memref<8xf32, #tpu.memory_space<smem>>
    %158 = vector.broadcast %157 : f32 to vector<8x256xf32>
    %159 = arith.addf %156, %158 : vector<8x256xf32>
    %cst_8 = arith.constant 0.000000e+00 : f32
    %160 = vector.broadcast %cst_8 : f32 to vector<8x256xf32>
    %161 = arith.maximumf %159, %160 : vector<8x256xf32>
    %c3 = arith.constant 3 : index
    %162 = memref.load %arg3[%c3] : memref<72xf32, #tpu.memory_space<smem>>
    %163 = vector.broadcast %162 : f32 to vector<8x256xf32>
    %164 = arith.mulf %163, %20 : vector<8x256xf32>
    %c11 = arith.constant 11 : index
    %165 = memref.load %arg3[%c11] : memref<72xf32, #tpu.memory_space<smem>>
    %166 = vector.broadcast %165 : f32 to vector<8x256xf32>
    %167 = arith.mulf %166, %23 : vector<8x256xf32>
    %168 = arith.addf %164, %167 : vector<8x256xf32>
    %c19 = arith.constant 19 : index
    %169 = memref.load %arg3[%c19] : memref<72xf32, #tpu.memory_space<smem>>
    %170 = vector.broadcast %169 : f32 to vector<8x256xf32>
    %171 = arith.mulf %170, %26 : vector<8x256xf32>
    %172 = arith.addf %168, %171 : vector<8x256xf32>
    %c27 = arith.constant 27 : index
    %173 = memref.load %arg3[%c27] : memref<72xf32, #tpu.memory_space<smem>>
    %174 = vector.broadcast %173 : f32 to vector<8x256xf32>
    %175 = arith.mulf %174, %29 : vector<8x256xf32>
    %176 = arith.addf %172, %175 : vector<8x256xf32>
    %c35 = arith.constant 35 : index
    %177 = memref.load %arg3[%c35] : memref<72xf32, #tpu.memory_space<smem>>
    %178 = vector.broadcast %177 : f32 to vector<8x256xf32>
    %179 = arith.mulf %178, %0 : vector<8x256xf32>
    %180 = arith.addf %176, %179 : vector<8x256xf32>
    %c43 = arith.constant 43 : index
    %181 = memref.load %arg3[%c43] : memref<72xf32, #tpu.memory_space<smem>>
    %182 = vector.broadcast %181 : f32 to vector<8x256xf32>
    %183 = arith.mulf %182, %32 : vector<8x256xf32>
    %184 = arith.addf %180, %183 : vector<8x256xf32>
    %c51 = arith.constant 51 : index
    %185 = memref.load %arg3[%c51] : memref<72xf32, #tpu.memory_space<smem>>
    %186 = vector.broadcast %185 : f32 to vector<8x256xf32>
    %187 = arith.mulf %186, %35 : vector<8x256xf32>
    %188 = arith.addf %184, %187 : vector<8x256xf32>
    %c59 = arith.constant 59 : index
    %189 = memref.load %arg3[%c59] : memref<72xf32, #tpu.memory_space<smem>>
    %190 = vector.broadcast %189 : f32 to vector<8x256xf32>
    %191 = arith.mulf %190, %38 : vector<8x256xf32>
    %192 = arith.addf %188, %191 : vector<8x256xf32>
    %c67 = arith.constant 67 : index
    %193 = memref.load %arg3[%c67] : memref<72xf32, #tpu.memory_space<smem>>
    %194 = vector.broadcast %193 : f32 to vector<8x256xf32>
    %195 = arith.mulf %194, %41 : vector<8x256xf32>
    %196 = arith.addf %192, %195 : vector<8x256xf32>
    %c3_9 = arith.constant 3 : index
    %197 = memref.load %arg4[%c3_9] : memref<8xf32, #tpu.memory_space<smem>>
    %198 = vector.broadcast %197 : f32 to vector<8x256xf32>
    %199 = arith.addf %196, %198 : vector<8x256xf32>
    %cst_10 = arith.constant 0.000000e+00 : f32
    %200 = vector.broadcast %cst_10 : f32 to vector<8x256xf32>
    %201 = arith.maximumf %199, %200 : vector<8x256xf32>
    %c4 = arith.constant 4 : index
    %202 = memref.load %arg3[%c4] : memref<72xf32, #tpu.memory_space<smem>>
    %203 = vector.broadcast %202 : f32 to vector<8x256xf32>
    %204 = arith.mulf %203, %20 : vector<8x256xf32>
    %c12 = arith.constant 12 : index
    %205 = memref.load %arg3[%c12] : memref<72xf32, #tpu.memory_space<smem>>
    %206 = vector.broadcast %205 : f32 to vector<8x256xf32>
    %207 = arith.mulf %206, %23 : vector<8x256xf32>
    %208 = arith.addf %204, %207 : vector<8x256xf32>
    %c20 = arith.constant 20 : index
    %209 = memref.load %arg3[%c20] : memref<72xf32, #tpu.memory_space<smem>>
    %210 = vector.broadcast %209 : f32 to vector<8x256xf32>
    %211 = arith.mulf %210, %26 : vector<8x256xf32>
    %212 = arith.addf %208, %211 : vector<8x256xf32>
    %c28 = arith.constant 28 : index
    %213 = memref.load %arg3[%c28] : memref<72xf32, #tpu.memory_space<smem>>
    %214 = vector.broadcast %213 : f32 to vector<8x256xf32>
    %215 = arith.mulf %214, %29 : vector<8x256xf32>
    %216 = arith.addf %212, %215 : vector<8x256xf32>
    %c36 = arith.constant 36 : index
    %217 = memref.load %arg3[%c36] : memref<72xf32, #tpu.memory_space<smem>>
    %218 = vector.broadcast %217 : f32 to vector<8x256xf32>
    %219 = arith.mulf %218, %0 : vector<8x256xf32>
    %220 = arith.addf %216, %219 : vector<8x256xf32>
    %c44 = arith.constant 44 : index
    %221 = memref.load %arg3[%c44] : memref<72xf32, #tpu.memory_space<smem>>
    %222 = vector.broadcast %221 : f32 to vector<8x256xf32>
    %223 = arith.mulf %222, %32 : vector<8x256xf32>
    %224 = arith.addf %220, %223 : vector<8x256xf32>
    %c52 = arith.constant 52 : index
    %225 = memref.load %arg3[%c52] : memref<72xf32, #tpu.memory_space<smem>>
    %226 = vector.broadcast %225 : f32 to vector<8x256xf32>
    %227 = arith.mulf %226, %35 : vector<8x256xf32>
    %228 = arith.addf %224, %227 : vector<8x256xf32>
    %c60 = arith.constant 60 : index
    %229 = memref.load %arg3[%c60] : memref<72xf32, #tpu.memory_space<smem>>
    %230 = vector.broadcast %229 : f32 to vector<8x256xf32>
    %231 = arith.mulf %230, %38 : vector<8x256xf32>
    %232 = arith.addf %228, %231 : vector<8x256xf32>
    %c68 = arith.constant 68 : index
    %233 = memref.load %arg3[%c68] : memref<72xf32, #tpu.memory_space<smem>>
    %234 = vector.broadcast %233 : f32 to vector<8x256xf32>
    %235 = arith.mulf %234, %41 : vector<8x256xf32>
    %236 = arith.addf %232, %235 : vector<8x256xf32>
    %c4_11 = arith.constant 4 : index
    %237 = memref.load %arg4[%c4_11] : memref<8xf32, #tpu.memory_space<smem>>
    %238 = vector.broadcast %237 : f32 to vector<8x256xf32>
    %239 = arith.addf %236, %238 : vector<8x256xf32>
    %cst_12 = arith.constant 0.000000e+00 : f32
    %240 = vector.broadcast %cst_12 : f32 to vector<8x256xf32>
    %241 = arith.maximumf %239, %240 : vector<8x256xf32>
    %c5 = arith.constant 5 : index
    %242 = memref.load %arg3[%c5] : memref<72xf32, #tpu.memory_space<smem>>
    %243 = vector.broadcast %242 : f32 to vector<8x256xf32>
    %244 = arith.mulf %243, %20 : vector<8x256xf32>
    %c13 = arith.constant 13 : index
    %245 = memref.load %arg3[%c13] : memref<72xf32, #tpu.memory_space<smem>>
    %246 = vector.broadcast %245 : f32 to vector<8x256xf32>
    %247 = arith.mulf %246, %23 : vector<8x256xf32>
    %248 = arith.addf %244, %247 : vector<8x256xf32>
    %c21 = arith.constant 21 : index
    %249 = memref.load %arg3[%c21] : memref<72xf32, #tpu.memory_space<smem>>
    %250 = vector.broadcast %249 : f32 to vector<8x256xf32>
    %251 = arith.mulf %250, %26 : vector<8x256xf32>
    %252 = arith.addf %248, %251 : vector<8x256xf32>
    %c29 = arith.constant 29 : index
    %253 = memref.load %arg3[%c29] : memref<72xf32, #tpu.memory_space<smem>>
    %254 = vector.broadcast %253 : f32 to vector<8x256xf32>
    %255 = arith.mulf %254, %29 : vector<8x256xf32>
    %256 = arith.addf %252, %255 : vector<8x256xf32>
    %c37 = arith.constant 37 : index
    %257 = memref.load %arg3[%c37] : memref<72xf32, #tpu.memory_space<smem>>
    %258 = vector.broadcast %257 : f32 to vector<8x256xf32>
    %259 = arith.mulf %258, %0 : vector<8x256xf32>
    %260 = arith.addf %256, %259 : vector<8x256xf32>
    %c45 = arith.constant 45 : index
    %261 = memref.load %arg3[%c45] : memref<72xf32, #tpu.memory_space<smem>>
    %262 = vector.broadcast %261 : f32 to vector<8x256xf32>
    %263 = arith.mulf %262, %32 : vector<8x256xf32>
    %264 = arith.addf %260, %263 : vector<8x256xf32>
    %c53 = arith.constant 53 : index
    %265 = memref.load %arg3[%c53] : memref<72xf32, #tpu.memory_space<smem>>
    %266 = vector.broadcast %265 : f32 to vector<8x256xf32>
    %267 = arith.mulf %266, %35 : vector<8x256xf32>
    %268 = arith.addf %264, %267 : vector<8x256xf32>
    %c61 = arith.constant 61 : index
    %269 = memref.load %arg3[%c61] : memref<72xf32, #tpu.memory_space<smem>>
    %270 = vector.broadcast %269 : f32 to vector<8x256xf32>
    %271 = arith.mulf %270, %38 : vector<8x256xf32>
    %272 = arith.addf %268, %271 : vector<8x256xf32>
    %c69 = arith.constant 69 : index
    %273 = memref.load %arg3[%c69] : memref<72xf32, #tpu.memory_space<smem>>
    %274 = vector.broadcast %273 : f32 to vector<8x256xf32>
    %275 = arith.mulf %274, %41 : vector<8x256xf32>
    %276 = arith.addf %272, %275 : vector<8x256xf32>
    %c5_13 = arith.constant 5 : index
    %277 = memref.load %arg4[%c5_13] : memref<8xf32, #tpu.memory_space<smem>>
    %278 = vector.broadcast %277 : f32 to vector<8x256xf32>
    %279 = arith.addf %276, %278 : vector<8x256xf32>
    %cst_14 = arith.constant 0.000000e+00 : f32
    %280 = vector.broadcast %cst_14 : f32 to vector<8x256xf32>
    %281 = arith.maximumf %279, %280 : vector<8x256xf32>
    %c6 = arith.constant 6 : index
    %282 = memref.load %arg3[%c6] : memref<72xf32, #tpu.memory_space<smem>>
    %283 = vector.broadcast %282 : f32 to vector<8x256xf32>
    %284 = arith.mulf %283, %20 : vector<8x256xf32>
    %c14 = arith.constant 14 : index
    %285 = memref.load %arg3[%c14] : memref<72xf32, #tpu.memory_space<smem>>
    %286 = vector.broadcast %285 : f32 to vector<8x256xf32>
    %287 = arith.mulf %286, %23 : vector<8x256xf32>
    %288 = arith.addf %284, %287 : vector<8x256xf32>
    %c22 = arith.constant 22 : index
    %289 = memref.load %arg3[%c22] : memref<72xf32, #tpu.memory_space<smem>>
    %290 = vector.broadcast %289 : f32 to vector<8x256xf32>
    %291 = arith.mulf %290, %26 : vector<8x256xf32>
    %292 = arith.addf %288, %291 : vector<8x256xf32>
    %c30 = arith.constant 30 : index
    %293 = memref.load %arg3[%c30] : memref<72xf32, #tpu.memory_space<smem>>
    %294 = vector.broadcast %293 : f32 to vector<8x256xf32>
    %295 = arith.mulf %294, %29 : vector<8x256xf32>
    %296 = arith.addf %292, %295 : vector<8x256xf32>
    %c38 = arith.constant 38 : index
    %297 = memref.load %arg3[%c38] : memref<72xf32, #tpu.memory_space<smem>>
    %298 = vector.broadcast %297 : f32 to vector<8x256xf32>
    %299 = arith.mulf %298, %0 : vector<8x256xf32>
    %300 = arith.addf %296, %299 : vector<8x256xf32>
    %c46 = arith.constant 46 : index
    %301 = memref.load %arg3[%c46] : memref<72xf32, #tpu.memory_space<smem>>
    %302 = vector.broadcast %301 : f32 to vector<8x256xf32>
    %303 = arith.mulf %302, %32 : vector<8x256xf32>
    %304 = arith.addf %300, %303 : vector<8x256xf32>
    %c54 = arith.constant 54 : index
    %305 = memref.load %arg3[%c54] : memref<72xf32, #tpu.memory_space<smem>>
    %306 = vector.broadcast %305 : f32 to vector<8x256xf32>
    %307 = arith.mulf %306, %35 : vector<8x256xf32>
    %308 = arith.addf %304, %307 : vector<8x256xf32>
    %c62 = arith.constant 62 : index
    %309 = memref.load %arg3[%c62] : memref<72xf32, #tpu.memory_space<smem>>
    %310 = vector.broadcast %309 : f32 to vector<8x256xf32>
    %311 = arith.mulf %310, %38 : vector<8x256xf32>
    %312 = arith.addf %308, %311 : vector<8x256xf32>
    %c70 = arith.constant 70 : index
    %313 = memref.load %arg3[%c70] : memref<72xf32, #tpu.memory_space<smem>>
    %314 = vector.broadcast %313 : f32 to vector<8x256xf32>
    %315 = arith.mulf %314, %41 : vector<8x256xf32>
    %316 = arith.addf %312, %315 : vector<8x256xf32>
    %c6_15 = arith.constant 6 : index
    %317 = memref.load %arg4[%c6_15] : memref<8xf32, #tpu.memory_space<smem>>
    %318 = vector.broadcast %317 : f32 to vector<8x256xf32>
    %319 = arith.addf %316, %318 : vector<8x256xf32>
    %cst_16 = arith.constant 0.000000e+00 : f32
    %320 = vector.broadcast %cst_16 : f32 to vector<8x256xf32>
    %321 = arith.maximumf %319, %320 : vector<8x256xf32>
    %c7 = arith.constant 7 : index
    %322 = memref.load %arg3[%c7] : memref<72xf32, #tpu.memory_space<smem>>
    %323 = vector.broadcast %322 : f32 to vector<8x256xf32>
    %324 = arith.mulf %323, %20 : vector<8x256xf32>
    %c15 = arith.constant 15 : index
    %325 = memref.load %arg3[%c15] : memref<72xf32, #tpu.memory_space<smem>>
    %326 = vector.broadcast %325 : f32 to vector<8x256xf32>
    %327 = arith.mulf %326, %23 : vector<8x256xf32>
    %328 = arith.addf %324, %327 : vector<8x256xf32>
    %c23 = arith.constant 23 : index
    %329 = memref.load %arg3[%c23] : memref<72xf32, #tpu.memory_space<smem>>
    %330 = vector.broadcast %329 : f32 to vector<8x256xf32>
    %331 = arith.mulf %330, %26 : vector<8x256xf32>
    %332 = arith.addf %328, %331 : vector<8x256xf32>
    %c31 = arith.constant 31 : index
    %333 = memref.load %arg3[%c31] : memref<72xf32, #tpu.memory_space<smem>>
    %334 = vector.broadcast %333 : f32 to vector<8x256xf32>
    %335 = arith.mulf %334, %29 : vector<8x256xf32>
    %336 = arith.addf %332, %335 : vector<8x256xf32>
    %c39 = arith.constant 39 : index
    %337 = memref.load %arg3[%c39] : memref<72xf32, #tpu.memory_space<smem>>
    %338 = vector.broadcast %337 : f32 to vector<8x256xf32>
    %339 = arith.mulf %338, %0 : vector<8x256xf32>
    %340 = arith.addf %336, %339 : vector<8x256xf32>
    %c47 = arith.constant 47 : index
    %341 = memref.load %arg3[%c47] : memref<72xf32, #tpu.memory_space<smem>>
    %342 = vector.broadcast %341 : f32 to vector<8x256xf32>
    %343 = arith.mulf %342, %32 : vector<8x256xf32>
    %344 = arith.addf %340, %343 : vector<8x256xf32>
    %c55 = arith.constant 55 : index
    %345 = memref.load %arg3[%c55] : memref<72xf32, #tpu.memory_space<smem>>
    %346 = vector.broadcast %345 : f32 to vector<8x256xf32>
    %347 = arith.mulf %346, %35 : vector<8x256xf32>
    %348 = arith.addf %344, %347 : vector<8x256xf32>
    %c63 = arith.constant 63 : index
    %349 = memref.load %arg3[%c63] : memref<72xf32, #tpu.memory_space<smem>>
    %350 = vector.broadcast %349 : f32 to vector<8x256xf32>
    %351 = arith.mulf %350, %38 : vector<8x256xf32>
    %352 = arith.addf %348, %351 : vector<8x256xf32>
    %c71 = arith.constant 71 : index
    %353 = memref.load %arg3[%c71] : memref<72xf32, #tpu.memory_space<smem>>
    %354 = vector.broadcast %353 : f32 to vector<8x256xf32>
    %355 = arith.mulf %354, %41 : vector<8x256xf32>
    %356 = arith.addf %352, %355 : vector<8x256xf32>
    %c7_17 = arith.constant 7 : index
    %357 = memref.load %arg4[%c7_17] : memref<8xf32, #tpu.memory_space<smem>>
    %358 = vector.broadcast %357 : f32 to vector<8x256xf32>
    %359 = arith.addf %356, %358 : vector<8x256xf32>
    %cst_18 = arith.constant 0.000000e+00 : f32
    %360 = vector.broadcast %cst_18 : f32 to vector<8x256xf32>
    %361 = arith.maximumf %359, %360 : vector<8x256xf32>
    %c17_i32_19 = arith.constant 17 : i32
    %362 = tpu.dynamic_rotate %81 by %c17_i32_19 dim 1 : vector<8x256xf32>, i32 -> vector<8x256xf32>
    %c0_20 = arith.constant 0 : index
    %363 = memref.load %arg5[%c0_20] : memref<72xf32, #tpu.memory_space<smem>>
    %364 = vector.broadcast %363 : f32 to vector<8x256xf32>
    %365 = arith.mulf %364, %362 : vector<8x256xf32>
    %c17_i32_21 = arith.constant 17 : i32
    %366 = tpu.dynamic_rotate %121 by %c17_i32_21 dim 1 : vector<8x256xf32>, i32 -> vector<8x256xf32>
    %c1_22 = arith.constant 1 : index
    %367 = memref.load %arg5[%c1_22] : memref<72xf32, #tpu.memory_space<smem>>
    %368 = vector.broadcast %367 : f32 to vector<8x256xf32>
    %369 = arith.mulf %368, %366 : vector<8x256xf32>
    %c17_i32_23 = arith.constant 17 : i32
    %370 = tpu.dynamic_rotate %161 by %c17_i32_23 dim 1 : vector<8x256xf32>, i32 -> vector<8x256xf32>
    %c2_24 = arith.constant 2 : index
    %371 = memref.load %arg5[%c2_24] : memref<72xf32, #tpu.memory_space<smem>>
    %372 = vector.broadcast %371 : f32 to vector<8x256xf32>
    %373 = arith.mulf %372, %370 : vector<8x256xf32>
    %c17_i32_25 = arith.constant 17 : i32
    %374 = tpu.dynamic_rotate %201 by %c17_i32_25 dim 1 : vector<8x256xf32>, i32 -> vector<8x256xf32>
    %c3_26 = arith.constant 3 : index
    %375 = memref.load %arg5[%c3_26] : memref<72xf32, #tpu.memory_space<smem>>
    %376 = vector.broadcast %375 : f32 to vector<8x256xf32>
    %377 = arith.mulf %376, %374 : vector<8x256xf32>
    %c17_i32_27 = arith.constant 17 : i32
    %378 = tpu.dynamic_rotate %241 by %c17_i32_27 dim 1 : vector<8x256xf32>, i32 -> vector<8x256xf32>
    %c4_28 = arith.constant 4 : index
    %379 = memref.load %arg5[%c4_28] : memref<72xf32, #tpu.memory_space<smem>>
    %380 = vector.broadcast %379 : f32 to vector<8x256xf32>
    %381 = arith.mulf %380, %378 : vector<8x256xf32>
    %c17_i32_29 = arith.constant 17 : i32
    %382 = tpu.dynamic_rotate %281 by %c17_i32_29 dim 1 : vector<8x256xf32>, i32 -> vector<8x256xf32>
    %c5_30 = arith.constant 5 : index
    %383 = memref.load %arg5[%c5_30] : memref<72xf32, #tpu.memory_space<smem>>
    %384 = vector.broadcast %383 : f32 to vector<8x256xf32>
    %385 = arith.mulf %384, %382 : vector<8x256xf32>
    %c17_i32_31 = arith.constant 17 : i32
    %386 = tpu.dynamic_rotate %321 by %c17_i32_31 dim 1 : vector<8x256xf32>, i32 -> vector<8x256xf32>
    %c6_32 = arith.constant 6 : index
    %387 = memref.load %arg5[%c6_32] : memref<72xf32, #tpu.memory_space<smem>>
    %388 = vector.broadcast %387 : f32 to vector<8x256xf32>
    %389 = arith.mulf %388, %386 : vector<8x256xf32>
    %c17_i32_33 = arith.constant 17 : i32
    %390 = tpu.dynamic_rotate %361 by %c17_i32_33 dim 1 : vector<8x256xf32>, i32 -> vector<8x256xf32>
    %c7_34 = arith.constant 7 : index
    %391 = memref.load %arg5[%c7_34] : memref<72xf32, #tpu.memory_space<smem>>
    %392 = vector.broadcast %391 : f32 to vector<8x256xf32>
    %393 = arith.mulf %392, %390 : vector<8x256xf32>
    %394 = arith.addf %365, %369 : vector<8x256xf32>
    %395 = arith.addf %373, %377 : vector<8x256xf32>
    %396 = arith.addf %381, %385 : vector<8x256xf32>
    %397 = arith.addf %389, %393 : vector<8x256xf32>
    %398 = arith.addf %394, %395 : vector<8x256xf32>
    %399 = arith.addf %396, %397 : vector<8x256xf32>
    %400 = arith.addf %398, %399 : vector<8x256xf32>
    %401 = vector.broadcast %4 : vector<1x256xf32> to vector<8x256xf32>
    %402 = arith.mulf %400, %401 : vector<8x256xf32>
    %c16_i32_35 = arith.constant 16 : i32
    %403 = tpu.dynamic_rotate %81 by %c16_i32_35 dim 1 : vector<8x256xf32>, i32 -> vector<8x256xf32>
    %c8_36 = arith.constant 8 : index
    %404 = memref.load %arg5[%c8_36] : memref<72xf32, #tpu.memory_space<smem>>
    %405 = vector.broadcast %404 : f32 to vector<8x256xf32>
    %406 = arith.mulf %405, %403 : vector<8x256xf32>
    %c16_i32_37 = arith.constant 16 : i32
    %407 = tpu.dynamic_rotate %121 by %c16_i32_37 dim 1 : vector<8x256xf32>, i32 -> vector<8x256xf32>
    %c9_38 = arith.constant 9 : index
    %408 = memref.load %arg5[%c9_38] : memref<72xf32, #tpu.memory_space<smem>>
    %409 = vector.broadcast %408 : f32 to vector<8x256xf32>
    %410 = arith.mulf %409, %407 : vector<8x256xf32>
    %c16_i32_39 = arith.constant 16 : i32
    %411 = tpu.dynamic_rotate %161 by %c16_i32_39 dim 1 : vector<8x256xf32>, i32 -> vector<8x256xf32>
    %c10_40 = arith.constant 10 : index
    %412 = memref.load %arg5[%c10_40] : memref<72xf32, #tpu.memory_space<smem>>
    %413 = vector.broadcast %412 : f32 to vector<8x256xf32>
    %414 = arith.mulf %413, %411 : vector<8x256xf32>
    %c16_i32_41 = arith.constant 16 : i32
    %415 = tpu.dynamic_rotate %201 by %c16_i32_41 dim 1 : vector<8x256xf32>, i32 -> vector<8x256xf32>
    %c11_42 = arith.constant 11 : index
    %416 = memref.load %arg5[%c11_42] : memref<72xf32, #tpu.memory_space<smem>>
    %417 = vector.broadcast %416 : f32 to vector<8x256xf32>
    %418 = arith.mulf %417, %415 : vector<8x256xf32>
    %c16_i32_43 = arith.constant 16 : i32
    %419 = tpu.dynamic_rotate %241 by %c16_i32_43 dim 1 : vector<8x256xf32>, i32 -> vector<8x256xf32>
    %c12_44 = arith.constant 12 : index
    %420 = memref.load %arg5[%c12_44] : memref<72xf32, #tpu.memory_space<smem>>
    %421 = vector.broadcast %420 : f32 to vector<8x256xf32>
    %422 = arith.mulf %421, %419 : vector<8x256xf32>
    %c16_i32_45 = arith.constant 16 : i32
    %423 = tpu.dynamic_rotate %281 by %c16_i32_45 dim 1 : vector<8x256xf32>, i32 -> vector<8x256xf32>
    %c13_46 = arith.constant 13 : index
    %424 = memref.load %arg5[%c13_46] : memref<72xf32, #tpu.memory_space<smem>>
    %425 = vector.broadcast %424 : f32 to vector<8x256xf32>
    %426 = arith.mulf %425, %423 : vector<8x256xf32>
    %c16_i32_47 = arith.constant 16 : i32
    %427 = tpu.dynamic_rotate %321 by %c16_i32_47 dim 1 : vector<8x256xf32>, i32 -> vector<8x256xf32>
    %c14_48 = arith.constant 14 : index
    %428 = memref.load %arg5[%c14_48] : memref<72xf32, #tpu.memory_space<smem>>
    %429 = vector.broadcast %428 : f32 to vector<8x256xf32>
    %430 = arith.mulf %429, %427 : vector<8x256xf32>
    %c16_i32_49 = arith.constant 16 : i32
    %431 = tpu.dynamic_rotate %361 by %c16_i32_49 dim 1 : vector<8x256xf32>, i32 -> vector<8x256xf32>
    %c15_50 = arith.constant 15 : index
    %432 = memref.load %arg5[%c15_50] : memref<72xf32, #tpu.memory_space<smem>>
    %433 = vector.broadcast %432 : f32 to vector<8x256xf32>
    %434 = arith.mulf %433, %431 : vector<8x256xf32>
    %435 = arith.addf %406, %410 : vector<8x256xf32>
    %436 = arith.addf %414, %418 : vector<8x256xf32>
    %437 = arith.addf %422, %426 : vector<8x256xf32>
    %438 = arith.addf %430, %434 : vector<8x256xf32>
    %439 = arith.addf %435, %436 : vector<8x256xf32>
    %440 = arith.addf %437, %438 : vector<8x256xf32>
    %441 = arith.addf %439, %440 : vector<8x256xf32>
    %442 = vector.broadcast %5 : vector<1x256xf32> to vector<8x256xf32>
    %443 = arith.mulf %441, %442 : vector<8x256xf32>
    %c15_i32_51 = arith.constant 15 : i32
    %444 = tpu.dynamic_rotate %81 by %c15_i32_51 dim 1 : vector<8x256xf32>, i32 -> vector<8x256xf32>
    %c16_52 = arith.constant 16 : index
    %445 = memref.load %arg5[%c16_52] : memref<72xf32, #tpu.memory_space<smem>>
    %446 = vector.broadcast %445 : f32 to vector<8x256xf32>
    %447 = arith.mulf %446, %444 : vector<8x256xf32>
    %c15_i32_53 = arith.constant 15 : i32
    %448 = tpu.dynamic_rotate %121 by %c15_i32_53 dim 1 : vector<8x256xf32>, i32 -> vector<8x256xf32>
    %c17_54 = arith.constant 17 : index
    %449 = memref.load %arg5[%c17_54] : memref<72xf32, #tpu.memory_space<smem>>
    %450 = vector.broadcast %449 : f32 to vector<8x256xf32>
    %451 = arith.mulf %450, %448 : vector<8x256xf32>
    %c15_i32_55 = arith.constant 15 : i32
    %452 = tpu.dynamic_rotate %161 by %c15_i32_55 dim 1 : vector<8x256xf32>, i32 -> vector<8x256xf32>
    %c18_56 = arith.constant 18 : index
    %453 = memref.load %arg5[%c18_56] : memref<72xf32, #tpu.memory_space<smem>>
    %454 = vector.broadcast %453 : f32 to vector<8x256xf32>
    %455 = arith.mulf %454, %452 : vector<8x256xf32>
    %c15_i32_57 = arith.constant 15 : i32
    %456 = tpu.dynamic_rotate %201 by %c15_i32_57 dim 1 : vector<8x256xf32>, i32 -> vector<8x256xf32>
    %c19_58 = arith.constant 19 : index
    %457 = memref.load %arg5[%c19_58] : memref<72xf32, #tpu.memory_space<smem>>
    %458 = vector.broadcast %457 : f32 to vector<8x256xf32>
    %459 = arith.mulf %458, %456 : vector<8x256xf32>
    %c15_i32_59 = arith.constant 15 : i32
    %460 = tpu.dynamic_rotate %241 by %c15_i32_59 dim 1 : vector<8x256xf32>, i32 -> vector<8x256xf32>
    %c20_60 = arith.constant 20 : index
    %461 = memref.load %arg5[%c20_60] : memref<72xf32, #tpu.memory_space<smem>>
    %462 = vector.broadcast %461 : f32 to vector<8x256xf32>
    %463 = arith.mulf %462, %460 : vector<8x256xf32>
    %c15_i32_61 = arith.constant 15 : i32
    %464 = tpu.dynamic_rotate %281 by %c15_i32_61 dim 1 : vector<8x256xf32>, i32 -> vector<8x256xf32>
    %c21_62 = arith.constant 21 : index
    %465 = memref.load %arg5[%c21_62] : memref<72xf32, #tpu.memory_space<smem>>
    %466 = vector.broadcast %465 : f32 to vector<8x256xf32>
    %467 = arith.mulf %466, %464 : vector<8x256xf32>
    %c15_i32_63 = arith.constant 15 : i32
    %468 = tpu.dynamic_rotate %321 by %c15_i32_63 dim 1 : vector<8x256xf32>, i32 -> vector<8x256xf32>
    %c22_64 = arith.constant 22 : index
    %469 = memref.load %arg5[%c22_64] : memref<72xf32, #tpu.memory_space<smem>>
    %470 = vector.broadcast %469 : f32 to vector<8x256xf32>
    %471 = arith.mulf %470, %468 : vector<8x256xf32>
    %c15_i32_65 = arith.constant 15 : i32
    %472 = tpu.dynamic_rotate %361 by %c15_i32_65 dim 1 : vector<8x256xf32>, i32 -> vector<8x256xf32>
    %c23_66 = arith.constant 23 : index
    %473 = memref.load %arg5[%c23_66] : memref<72xf32, #tpu.memory_space<smem>>
    %474 = vector.broadcast %473 : f32 to vector<8x256xf32>
    %475 = arith.mulf %474, %472 : vector<8x256xf32>
    %476 = arith.addf %447, %451 : vector<8x256xf32>
    %477 = arith.addf %455, %459 : vector<8x256xf32>
    %478 = arith.addf %463, %467 : vector<8x256xf32>
    %479 = arith.addf %471, %475 : vector<8x256xf32>
    %480 = arith.addf %476, %477 : vector<8x256xf32>
    %481 = arith.addf %478, %479 : vector<8x256xf32>
    %482 = arith.addf %480, %481 : vector<8x256xf32>
    %483 = vector.broadcast %8 : vector<1x256xf32> to vector<8x256xf32>
    %484 = arith.mulf %482, %483 : vector<8x256xf32>
    %c1_i32_67 = arith.constant 1 : i32
    %485 = tpu.dynamic_rotate %81 by %c1_i32_67 dim 1 : vector<8x256xf32>, i32 -> vector<8x256xf32>
    %c24_68 = arith.constant 24 : index
    %486 = memref.load %arg5[%c24_68] : memref<72xf32, #tpu.memory_space<smem>>
    %487 = vector.broadcast %486 : f32 to vector<8x256xf32>
    %488 = arith.mulf %487, %485 : vector<8x256xf32>
    %c1_i32_69 = arith.constant 1 : i32
    %489 = tpu.dynamic_rotate %121 by %c1_i32_69 dim 1 : vector<8x256xf32>, i32 -> vector<8x256xf32>
    %c25_70 = arith.constant 25 : index
    %490 = memref.load %arg5[%c25_70] : memref<72xf32, #tpu.memory_space<smem>>
    %491 = vector.broadcast %490 : f32 to vector<8x256xf32>
    %492 = arith.mulf %491, %489 : vector<8x256xf32>
    %c1_i32_71 = arith.constant 1 : i32
    %493 = tpu.dynamic_rotate %161 by %c1_i32_71 dim 1 : vector<8x256xf32>, i32 -> vector<8x256xf32>
    %c26_72 = arith.constant 26 : index
    %494 = memref.load %arg5[%c26_72] : memref<72xf32, #tpu.memory_space<smem>>
    %495 = vector.broadcast %494 : f32 to vector<8x256xf32>
    %496 = arith.mulf %495, %493 : vector<8x256xf32>
    %c1_i32_73 = arith.constant 1 : i32
    %497 = tpu.dynamic_rotate %201 by %c1_i32_73 dim 1 : vector<8x256xf32>, i32 -> vector<8x256xf32>
    %c27_74 = arith.constant 27 : index
    %498 = memref.load %arg5[%c27_74] : memref<72xf32, #tpu.memory_space<smem>>
    %499 = vector.broadcast %498 : f32 to vector<8x256xf32>
    %500 = arith.mulf %499, %497 : vector<8x256xf32>
    %c1_i32_75 = arith.constant 1 : i32
    %501 = tpu.dynamic_rotate %241 by %c1_i32_75 dim 1 : vector<8x256xf32>, i32 -> vector<8x256xf32>
    %c28_76 = arith.constant 28 : index
    %502 = memref.load %arg5[%c28_76] : memref<72xf32, #tpu.memory_space<smem>>
    %503 = vector.broadcast %502 : f32 to vector<8x256xf32>
    %504 = arith.mulf %503, %501 : vector<8x256xf32>
    %c1_i32_77 = arith.constant 1 : i32
    %505 = tpu.dynamic_rotate %281 by %c1_i32_77 dim 1 : vector<8x256xf32>, i32 -> vector<8x256xf32>
    %c29_78 = arith.constant 29 : index
    %506 = memref.load %arg5[%c29_78] : memref<72xf32, #tpu.memory_space<smem>>
    %507 = vector.broadcast %506 : f32 to vector<8x256xf32>
    %508 = arith.mulf %507, %505 : vector<8x256xf32>
    %c1_i32_79 = arith.constant 1 : i32
    %509 = tpu.dynamic_rotate %321 by %c1_i32_79 dim 1 : vector<8x256xf32>, i32 -> vector<8x256xf32>
    %c30_80 = arith.constant 30 : index
    %510 = memref.load %arg5[%c30_80] : memref<72xf32, #tpu.memory_space<smem>>
    %511 = vector.broadcast %510 : f32 to vector<8x256xf32>
    %512 = arith.mulf %511, %509 : vector<8x256xf32>
    %c1_i32_81 = arith.constant 1 : i32
    %513 = tpu.dynamic_rotate %361 by %c1_i32_81 dim 1 : vector<8x256xf32>, i32 -> vector<8x256xf32>
    %c31_82 = arith.constant 31 : index
    %514 = memref.load %arg5[%c31_82] : memref<72xf32, #tpu.memory_space<smem>>
    %515 = vector.broadcast %514 : f32 to vector<8x256xf32>
    %516 = arith.mulf %515, %513 : vector<8x256xf32>
    %517 = arith.addf %488, %492 : vector<8x256xf32>
    %518 = arith.addf %496, %500 : vector<8x256xf32>
    %519 = arith.addf %504, %508 : vector<8x256xf32>
    %520 = arith.addf %512, %516 : vector<8x256xf32>
    %521 = arith.addf %517, %518 : vector<8x256xf32>
    %522 = arith.addf %519, %520 : vector<8x256xf32>
    %523 = arith.addf %521, %522 : vector<8x256xf32>
    %524 = vector.broadcast %9 : vector<1x256xf32> to vector<8x256xf32>
    %525 = arith.mulf %523, %524 : vector<8x256xf32>
    %c32_83 = arith.constant 32 : index
    %526 = memref.load %arg5[%c32_83] : memref<72xf32, #tpu.memory_space<smem>>
    %527 = vector.broadcast %526 : f32 to vector<8x256xf32>
    %528 = arith.mulf %527, %81 : vector<8x256xf32>
    %c33_84 = arith.constant 33 : index
    %529 = memref.load %arg5[%c33_84] : memref<72xf32, #tpu.memory_space<smem>>
    %530 = vector.broadcast %529 : f32 to vector<8x256xf32>
    %531 = arith.mulf %530, %121 : vector<8x256xf32>
    %c34_85 = arith.constant 34 : index
    %532 = memref.load %arg5[%c34_85] : memref<72xf32, #tpu.memory_space<smem>>
    %533 = vector.broadcast %532 : f32 to vector<8x256xf32>
    %534 = arith.mulf %533, %161 : vector<8x256xf32>
    %c35_86 = arith.constant 35 : index
    %535 = memref.load %arg5[%c35_86] : memref<72xf32, #tpu.memory_space<smem>>
    %536 = vector.broadcast %535 : f32 to vector<8x256xf32>
    %537 = arith.mulf %536, %201 : vector<8x256xf32>
    %c36_87 = arith.constant 36 : index
    %538 = memref.load %arg5[%c36_87] : memref<72xf32, #tpu.memory_space<smem>>
    %539 = vector.broadcast %538 : f32 to vector<8x256xf32>
    %540 = arith.mulf %539, %241 : vector<8x256xf32>
    %c37_88 = arith.constant 37 : index
    %541 = memref.load %arg5[%c37_88] : memref<72xf32, #tpu.memory_space<smem>>
    %542 = vector.broadcast %541 : f32 to vector<8x256xf32>
    %543 = arith.mulf %542, %281 : vector<8x256xf32>
    %c38_89 = arith.constant 38 : index
    %544 = memref.load %arg5[%c38_89] : memref<72xf32, #tpu.memory_space<smem>>
    %545 = vector.broadcast %544 : f32 to vector<8x256xf32>
    %546 = arith.mulf %545, %321 : vector<8x256xf32>
    %c39_90 = arith.constant 39 : index
    %547 = memref.load %arg5[%c39_90] : memref<72xf32, #tpu.memory_space<smem>>
    %548 = vector.broadcast %547 : f32 to vector<8x256xf32>
    %549 = arith.mulf %548, %361 : vector<8x256xf32>
    %550 = arith.addf %528, %531 : vector<8x256xf32>
    %551 = arith.addf %534, %537 : vector<8x256xf32>
    %552 = arith.addf %540, %543 : vector<8x256xf32>
    %553 = arith.addf %546, %549 : vector<8x256xf32>
    %554 = arith.addf %550, %551 : vector<8x256xf32>
    %555 = arith.addf %552, %553 : vector<8x256xf32>
    %556 = arith.addf %554, %555 : vector<8x256xf32>
    %c255_i32_91 = arith.constant 255 : i32
    %557 = tpu.dynamic_rotate %81 by %c255_i32_91 dim 1 : vector<8x256xf32>, i32 -> vector<8x256xf32>
    %c40_92 = arith.constant 40 : index
    %558 = memref.load %arg5[%c40_92] : memref<72xf32, #tpu.memory_space<smem>>
    %559 = vector.broadcast %558 : f32 to vector<8x256xf32>
    %560 = arith.mulf %559, %557 : vector<8x256xf32>
    %c255_i32_93 = arith.constant 255 : i32
    %561 = tpu.dynamic_rotate %121 by %c255_i32_93 dim 1 : vector<8x256xf32>, i32 -> vector<8x256xf32>
    %c41_94 = arith.constant 41 : index
    %562 = memref.load %arg5[%c41_94] : memref<72xf32, #tpu.memory_space<smem>>
    %563 = vector.broadcast %562 : f32 to vector<8x256xf32>
    %564 = arith.mulf %563, %561 : vector<8x256xf32>
    %c255_i32_95 = arith.constant 255 : i32
    %565 = tpu.dynamic_rotate %161 by %c255_i32_95 dim 1 : vector<8x256xf32>, i32 -> vector<8x256xf32>
    %c42_96 = arith.constant 42 : index
    %566 = memref.load %arg5[%c42_96] : memref<72xf32, #tpu.memory_space<smem>>
    %567 = vector.broadcast %566 : f32 to vector<8x256xf32>
    %568 = arith.mulf %567, %565 : vector<8x256xf32>
    %c255_i32_97 = arith.constant 255 : i32
    %569 = tpu.dynamic_rotate %201 by %c255_i32_97 dim 1 : vector<8x256xf32>, i32 -> vector<8x256xf32>
    %c43_98 = arith.constant 43 : index
    %570 = memref.load %arg5[%c43_98] : memref<72xf32, #tpu.memory_space<smem>>
    %571 = vector.broadcast %570 : f32 to vector<8x256xf32>
    %572 = arith.mulf %571, %569 : vector<8x256xf32>
    %c255_i32_99 = arith.constant 255 : i32
    %573 = tpu.dynamic_rotate %241 by %c255_i32_99 dim 1 : vector<8x256xf32>, i32 -> vector<8x256xf32>
    %c44_100 = arith.constant 44 : index
    %574 = memref.load %arg5[%c44_100] : memref<72xf32, #tpu.memory_space<smem>>
    %575 = vector.broadcast %574 : f32 to vector<8x256xf32>
    %576 = arith.mulf %575, %573 : vector<8x256xf32>
    %c255_i32_101 = arith.constant 255 : i32
    %577 = tpu.dynamic_rotate %281 by %c255_i32_101 dim 1 : vector<8x256xf32>, i32 -> vector<8x256xf32>
    %c45_102 = arith.constant 45 : index
    %578 = memref.load %arg5[%c45_102] : memref<72xf32, #tpu.memory_space<smem>>
    %579 = vector.broadcast %578 : f32 to vector<8x256xf32>
    %580 = arith.mulf %579, %577 : vector<8x256xf32>
    %c255_i32_103 = arith.constant 255 : i32
    %581 = tpu.dynamic_rotate %321 by %c255_i32_103 dim 1 : vector<8x256xf32>, i32 -> vector<8x256xf32>
    %c46_104 = arith.constant 46 : index
    %582 = memref.load %arg5[%c46_104] : memref<72xf32, #tpu.memory_space<smem>>
    %583 = vector.broadcast %582 : f32 to vector<8x256xf32>
    %584 = arith.mulf %583, %581 : vector<8x256xf32>
    %c255_i32_105 = arith.constant 255 : i32
    %585 = tpu.dynamic_rotate %361 by %c255_i32_105 dim 1 : vector<8x256xf32>, i32 -> vector<8x256xf32>
    %c47_106 = arith.constant 47 : index
    %586 = memref.load %arg5[%c47_106] : memref<72xf32, #tpu.memory_space<smem>>
    %587 = vector.broadcast %586 : f32 to vector<8x256xf32>
    %588 = arith.mulf %587, %585 : vector<8x256xf32>
    %589 = arith.addf %560, %564 : vector<8x256xf32>
    %590 = arith.addf %568, %572 : vector<8x256xf32>
    %591 = arith.addf %576, %580 : vector<8x256xf32>
    %592 = arith.addf %584, %588 : vector<8x256xf32>
    %593 = arith.addf %589, %590 : vector<8x256xf32>
    %594 = arith.addf %591, %592 : vector<8x256xf32>
    %595 = arith.addf %593, %594 : vector<8x256xf32>
    %596 = vector.broadcast %10 : vector<1x256xf32> to vector<8x256xf32>
    %597 = arith.mulf %595, %596 : vector<8x256xf32>
    %c241_i32_107 = arith.constant 241 : i32
    %598 = tpu.dynamic_rotate %81 by %c241_i32_107 dim 1 : vector<8x256xf32>, i32 -> vector<8x256xf32>
    %c48_108 = arith.constant 48 : index
    %599 = memref.load %arg5[%c48_108] : memref<72xf32, #tpu.memory_space<smem>>
    %600 = vector.broadcast %599 : f32 to vector<8x256xf32>
    %601 = arith.mulf %600, %598 : vector<8x256xf32>
    %c241_i32_109 = arith.constant 241 : i32
    %602 = tpu.dynamic_rotate %121 by %c241_i32_109 dim 1 : vector<8x256xf32>, i32 -> vector<8x256xf32>
    %c49_110 = arith.constant 49 : index
    %603 = memref.load %arg5[%c49_110] : memref<72xf32, #tpu.memory_space<smem>>
    %604 = vector.broadcast %603 : f32 to vector<8x256xf32>
    %605 = arith.mulf %604, %602 : vector<8x256xf32>
    %c241_i32_111 = arith.constant 241 : i32
    %606 = tpu.dynamic_rotate %161 by %c241_i32_111 dim 1 : vector<8x256xf32>, i32 -> vector<8x256xf32>
    %c50_112 = arith.constant 50 : index
    %607 = memref.load %arg5[%c50_112] : memref<72xf32, #tpu.memory_space<smem>>
    %608 = vector.broadcast %607 : f32 to vector<8x256xf32>
    %609 = arith.mulf %608, %606 : vector<8x256xf32>
    %c241_i32_113 = arith.constant 241 : i32
    %610 = tpu.dynamic_rotate %201 by %c241_i32_113 dim 1 : vector<8x256xf32>, i32 -> vector<8x256xf32>
    %c51_114 = arith.constant 51 : index
    %611 = memref.load %arg5[%c51_114] : memref<72xf32, #tpu.memory_space<smem>>
    %612 = vector.broadcast %611 : f32 to vector<8x256xf32>
    %613 = arith.mulf %612, %610 : vector<8x256xf32>
    %c241_i32_115 = arith.constant 241 : i32
    %614 = tpu.dynamic_rotate %241 by %c241_i32_115 dim 1 : vector<8x256xf32>, i32 -> vector<8x256xf32>
    %c52_116 = arith.constant 52 : index
    %615 = memref.load %arg5[%c52_116] : memref<72xf32, #tpu.memory_space<smem>>
    %616 = vector.broadcast %615 : f32 to vector<8x256xf32>
    %617 = arith.mulf %616, %614 : vector<8x256xf32>
    %c241_i32_117 = arith.constant 241 : i32
    %618 = tpu.dynamic_rotate %281 by %c241_i32_117 dim 1 : vector<8x256xf32>, i32 -> vector<8x256xf32>
    %c53_118 = arith.constant 53 : index
    %619 = memref.load %arg5[%c53_118] : memref<72xf32, #tpu.memory_space<smem>>
    %620 = vector.broadcast %619 : f32 to vector<8x256xf32>
    %621 = arith.mulf %620, %618 : vector<8x256xf32>
    %c241_i32_119 = arith.constant 241 : i32
    %622 = tpu.dynamic_rotate %321 by %c241_i32_119 dim 1 : vector<8x256xf32>, i32 -> vector<8x256xf32>
    %c54_120 = arith.constant 54 : index
    %623 = memref.load %arg5[%c54_120] : memref<72xf32, #tpu.memory_space<smem>>
    %624 = vector.broadcast %623 : f32 to vector<8x256xf32>
    %625 = arith.mulf %624, %622 : vector<8x256xf32>
    %c241_i32_121 = arith.constant 241 : i32
    %626 = tpu.dynamic_rotate %361 by %c241_i32_121 dim 1 : vector<8x256xf32>, i32 -> vector<8x256xf32>
    %c55_122 = arith.constant 55 : index
    %627 = memref.load %arg5[%c55_122] : memref<72xf32, #tpu.memory_space<smem>>
    %628 = vector.broadcast %627 : f32 to vector<8x256xf32>
    %629 = arith.mulf %628, %626 : vector<8x256xf32>
    %630 = arith.addf %601, %605 : vector<8x256xf32>
    %631 = arith.addf %609, %613 : vector<8x256xf32>
    %632 = arith.addf %617, %621 : vector<8x256xf32>
    %633 = arith.addf %625, %629 : vector<8x256xf32>
    %634 = arith.addf %630, %631 : vector<8x256xf32>
    %635 = arith.addf %632, %633 : vector<8x256xf32>
    %636 = arith.addf %634, %635 : vector<8x256xf32>
    %637 = vector.broadcast %13 : vector<1x256xf32> to vector<8x256xf32>
    %638 = arith.mulf %636, %637 : vector<8x256xf32>
    %c240_i32_123 = arith.constant 240 : i32
    %639 = tpu.dynamic_rotate %81 by %c240_i32_123 dim 1 : vector<8x256xf32>, i32 -> vector<8x256xf32>
    %c56_124 = arith.constant 56 : index
    %640 = memref.load %arg5[%c56_124] : memref<72xf32, #tpu.memory_space<smem>>
    %641 = vector.broadcast %640 : f32 to vector<8x256xf32>
    %642 = arith.mulf %641, %639 : vector<8x256xf32>
    %c240_i32_125 = arith.constant 240 : i32
    %643 = tpu.dynamic_rotate %121 by %c240_i32_125 dim 1 : vector<8x256xf32>, i32 -> vector<8x256xf32>
    %c57_126 = arith.constant 57 : index
    %644 = memref.load %arg5[%c57_126] : memref<72xf32, #tpu.memory_space<smem>>
    %645 = vector.broadcast %644 : f32 to vector<8x256xf32>
    %646 = arith.mulf %645, %643 : vector<8x256xf32>
    %c240_i32_127 = arith.constant 240 : i32
    %647 = tpu.dynamic_rotate %161 by %c240_i32_127 dim 1 : vector<8x256xf32>, i32 -> vector<8x256xf32>
    %c58_128 = arith.constant 58 : index
    %648 = memref.load %arg5[%c58_128] : memref<72xf32, #tpu.memory_space<smem>>
    %649 = vector.broadcast %648 : f32 to vector<8x256xf32>
    %650 = arith.mulf %649, %647 : vector<8x256xf32>
    %c240_i32_129 = arith.constant 240 : i32
    %651 = tpu.dynamic_rotate %201 by %c240_i32_129 dim 1 : vector<8x256xf32>, i32 -> vector<8x256xf32>
    %c59_130 = arith.constant 59 : index
    %652 = memref.load %arg5[%c59_130] : memref<72xf32, #tpu.memory_space<smem>>
    %653 = vector.broadcast %652 : f32 to vector<8x256xf32>
    %654 = arith.mulf %653, %651 : vector<8x256xf32>
    %c240_i32_131 = arith.constant 240 : i32
    %655 = tpu.dynamic_rotate %241 by %c240_i32_131 dim 1 : vector<8x256xf32>, i32 -> vector<8x256xf32>
    %c60_132 = arith.constant 60 : index
    %656 = memref.load %arg5[%c60_132] : memref<72xf32, #tpu.memory_space<smem>>
    %657 = vector.broadcast %656 : f32 to vector<8x256xf32>
    %658 = arith.mulf %657, %655 : vector<8x256xf32>
    %c240_i32_133 = arith.constant 240 : i32
    %659 = tpu.dynamic_rotate %281 by %c240_i32_133 dim 1 : vector<8x256xf32>, i32 -> vector<8x256xf32>
    %c61_134 = arith.constant 61 : index
    %660 = memref.load %arg5[%c61_134] : memref<72xf32, #tpu.memory_space<smem>>
    %661 = vector.broadcast %660 : f32 to vector<8x256xf32>
    %662 = arith.mulf %661, %659 : vector<8x256xf32>
    %c240_i32_135 = arith.constant 240 : i32
    %663 = tpu.dynamic_rotate %321 by %c240_i32_135 dim 1 : vector<8x256xf32>, i32 -> vector<8x256xf32>
    %c62_136 = arith.constant 62 : index
    %664 = memref.load %arg5[%c62_136] : memref<72xf32, #tpu.memory_space<smem>>
    %665 = vector.broadcast %664 : f32 to vector<8x256xf32>
    %666 = arith.mulf %665, %663 : vector<8x256xf32>
    %c240_i32_137 = arith.constant 240 : i32
    %667 = tpu.dynamic_rotate %361 by %c240_i32_137 dim 1 : vector<8x256xf32>, i32 -> vector<8x256xf32>
    %c63_138 = arith.constant 63 : index
    %668 = memref.load %arg5[%c63_138] : memref<72xf32, #tpu.memory_space<smem>>
    %669 = vector.broadcast %668 : f32 to vector<8x256xf32>
    %670 = arith.mulf %669, %667 : vector<8x256xf32>
    %671 = arith.addf %642, %646 : vector<8x256xf32>
    %672 = arith.addf %650, %654 : vector<8x256xf32>
    %673 = arith.addf %658, %662 : vector<8x256xf32>
    %674 = arith.addf %666, %670 : vector<8x256xf32>
    %675 = arith.addf %671, %672 : vector<8x256xf32>
    %676 = arith.addf %673, %674 : vector<8x256xf32>
    %677 = arith.addf %675, %676 : vector<8x256xf32>
    %678 = vector.broadcast %14 : vector<1x256xf32> to vector<8x256xf32>
    %679 = arith.mulf %677, %678 : vector<8x256xf32>
    %c239_i32_139 = arith.constant 239 : i32
    %680 = tpu.dynamic_rotate %81 by %c239_i32_139 dim 1 : vector<8x256xf32>, i32 -> vector<8x256xf32>
    %c64_140 = arith.constant 64 : index
    %681 = memref.load %arg5[%c64_140] : memref<72xf32, #tpu.memory_space<smem>>
    %682 = vector.broadcast %681 : f32 to vector<8x256xf32>
    %683 = arith.mulf %682, %680 : vector<8x256xf32>
    %c239_i32_141 = arith.constant 239 : i32
    %684 = tpu.dynamic_rotate %121 by %c239_i32_141 dim 1 : vector<8x256xf32>, i32 -> vector<8x256xf32>
    %c65_142 = arith.constant 65 : index
    %685 = memref.load %arg5[%c65_142] : memref<72xf32, #tpu.memory_space<smem>>
    %686 = vector.broadcast %685 : f32 to vector<8x256xf32>
    %687 = arith.mulf %686, %684 : vector<8x256xf32>
    %c239_i32_143 = arith.constant 239 : i32
    %688 = tpu.dynamic_rotate %161 by %c239_i32_143 dim 1 : vector<8x256xf32>, i32 -> vector<8x256xf32>
    %c66_144 = arith.constant 66 : index
    %689 = memref.load %arg5[%c66_144] : memref<72xf32, #tpu.memory_space<smem>>
    %690 = vector.broadcast %689 : f32 to vector<8x256xf32>
    %691 = arith.mulf %690, %688 : vector<8x256xf32>
    %c239_i32_145 = arith.constant 239 : i32
    %692 = tpu.dynamic_rotate %201 by %c239_i32_145 dim 1 : vector<8x256xf32>, i32 -> vector<8x256xf32>
    %c67_146 = arith.constant 67 : index
    %693 = memref.load %arg5[%c67_146] : memref<72xf32, #tpu.memory_space<smem>>
    %694 = vector.broadcast %693 : f32 to vector<8x256xf32>
    %695 = arith.mulf %694, %692 : vector<8x256xf32>
    %c239_i32_147 = arith.constant 239 : i32
    %696 = tpu.dynamic_rotate %241 by %c239_i32_147 dim 1 : vector<8x256xf32>, i32 -> vector<8x256xf32>
    %c68_148 = arith.constant 68 : index
    %697 = memref.load %arg5[%c68_148] : memref<72xf32, #tpu.memory_space<smem>>
    %698 = vector.broadcast %697 : f32 to vector<8x256xf32>
    %699 = arith.mulf %698, %696 : vector<8x256xf32>
    %c239_i32_149 = arith.constant 239 : i32
    %700 = tpu.dynamic_rotate %281 by %c239_i32_149 dim 1 : vector<8x256xf32>, i32 -> vector<8x256xf32>
    %c69_150 = arith.constant 69 : index
    %701 = memref.load %arg5[%c69_150] : memref<72xf32, #tpu.memory_space<smem>>
    %702 = vector.broadcast %701 : f32 to vector<8x256xf32>
    %703 = arith.mulf %702, %700 : vector<8x256xf32>
    %c239_i32_151 = arith.constant 239 : i32
    %704 = tpu.dynamic_rotate %321 by %c239_i32_151 dim 1 : vector<8x256xf32>, i32 -> vector<8x256xf32>
    %c70_152 = arith.constant 70 : index
    %705 = memref.load %arg5[%c70_152] : memref<72xf32, #tpu.memory_space<smem>>
    %706 = vector.broadcast %705 : f32 to vector<8x256xf32>
    %707 = arith.mulf %706, %704 : vector<8x256xf32>
    %c239_i32_153 = arith.constant 239 : i32
    %708 = tpu.dynamic_rotate %361 by %c239_i32_153 dim 1 : vector<8x256xf32>, i32 -> vector<8x256xf32>
    %c71_154 = arith.constant 71 : index
    %709 = memref.load %arg5[%c71_154] : memref<72xf32, #tpu.memory_space<smem>>
    %710 = vector.broadcast %709 : f32 to vector<8x256xf32>
    %711 = arith.mulf %710, %708 : vector<8x256xf32>
    %712 = arith.addf %683, %687 : vector<8x256xf32>
    %713 = arith.addf %691, %695 : vector<8x256xf32>
    %714 = arith.addf %699, %703 : vector<8x256xf32>
    %715 = arith.addf %707, %711 : vector<8x256xf32>
    %716 = arith.addf %712, %713 : vector<8x256xf32>
    %717 = arith.addf %714, %715 : vector<8x256xf32>
    %718 = arith.addf %716, %717 : vector<8x256xf32>
    %719 = vector.broadcast %17 : vector<1x256xf32> to vector<8x256xf32>
    %720 = arith.mulf %718, %719 : vector<8x256xf32>
    %721 = arith.addf %402, %443 : vector<8x256xf32>
    %722 = arith.addf %484, %525 : vector<8x256xf32>
    %723 = arith.addf %556, %597 : vector<8x256xf32>
    %724 = arith.addf %638, %679 : vector<8x256xf32>
    %725 = arith.addf %721, %722 : vector<8x256xf32>
    %726 = arith.addf %723, %724 : vector<8x256xf32>
    %727 = arith.addf %725, %726 : vector<8x256xf32>
    %728 = arith.addf %727, %720 : vector<8x256xf32>
    %c0_155 = arith.constant 0 : index
    %729 = memref.load %arg6[%c0_155] : memref<1xf32, #tpu.memory_space<smem>>
    %730 = vector.broadcast %729 : f32 to vector<8x256xf32>
    %731 = arith.addf %728, %730 : vector<8x256xf32>
    %732 = arith.addf %731, %0 : vector<8x256xf32>
    %c0_156 = arith.constant 0 : index
    %c0_157 = arith.constant 0 : index
    %733 = vector.load %arg7[%c0_156, %c0_157] : memref<8x256xf32, #tpu.memory_space<vmem>>, vector<8x256xf32>
    tpu.vector_store %arg7[%c0_156, %c0_157], %732 {strides = array<i32>} : memref<8x256xf32, #tpu.memory_space<vmem>>, vector<8x256xf32>,
    %734 = arith.mulf %732, %732 : vector<8x256xf32>
    %cst_158 = arith.constant 1.000000e-10 : f32
    %735 = vector.broadcast %cst_158 : f32 to vector<8x256xf32>
    %736 = arith.addf %734, %735 : vector<8x256xf32>
    %737 = math.log %736 : vector<8x256xf32>
    %738 = arith.negf %737 : vector<8x256xf32>
    %739 = math.exp %738 : vector<8x256xf32>
    %cst_159 = arith.constant 1.000000e+00 : f32
    %740 = vector.broadcast %cst_159 : f32 to vector<8x256xf32>
    %741 = arith.addf %740, %739 : vector<8x256xf32>
    %742 = arith.divf %740, %741 : vector<8x256xf32>
    %cst_160 = arith.constant 1.200000e+00 : f32
    %743 = vector.broadcast %cst_160 : f32 to vector<8x256xf32>
    %744 = arith.mulf %742, %743 : vector<8x256xf32>
    %cst_161 = arith.constant -1.000000e-01 : f32
    %745 = vector.broadcast %cst_161 : f32 to vector<8x256xf32>
    %746 = arith.addf %744, %745 : vector<8x256xf32>
    %cst_162 = arith.constant 0.000000e+00 : f32
    %cst_163 = arith.constant 1.000000e+00 : f32
    %747 = vector.broadcast %cst_162 : f32 to vector<8x256xf32>
    %748 = arith.maximumf %747, %746 : vector<8x256xf32>
    %749 = vector.broadcast %cst_163 : f32 to vector<8x256xf32>
    %750 = arith.minimumf %749, %748 : vector<8x256xf32>
    %c0_164 = arith.constant 0 : index
    %c0_165 = arith.constant 0 : index
    %751 = vector.load %arg8[%c0_164, %c0_165] : memref<8x256xf32, #tpu.memory_space<vmem>>, vector<8x256xf32>
    tpu.vector_store %arg8[%c0_164, %c0_165], %750 {strides = array<i32>} : memref<8x256xf32, #tpu.memory_space<vmem>>, vector<8x256xf32>,
    %cst_166 = arith.constant -1.5586319 : f32
    %752 = vector.broadcast %cst_166 : f32 to vector<8x256xf32>
    %753 = arith.subf %737, %752 : vector<8x256xf32>
    %754 = arith.negf %753 : vector<8x256xf32>
    %755 = math.exp %754 : vector<8x256xf32>
    %cst_167 = arith.constant 1.000000e+00 : f32
    %756 = vector.broadcast %cst_167 : f32 to vector<8x256xf32>
    %757 = arith.addf %756, %755 : vector<8x256xf32>
    %758 = arith.divf %756, %757 : vector<8x256xf32>
    %759 = vector.extract_strided_slice %758 {offsets = [0, 0], sizes = [8, 128], strides = [1, 1]} : vector<8x256xf32> to vector<8x128xf32>
    %760 = vector.extract_strided_slice %758 {offsets = [0, 128], sizes = [8, 128], strides = [1, 1]} : vector<8x256xf32> to vector<8x128xf32>
    %761 = arith.addf %759, %760 : vector<8x128xf32>
    %c0_168 = arith.constant 0 : index
    %c0_169 = arith.constant 0 : index
    %762 = vector.load %arg9[%c0_168, %c0_169] : memref<8x128xf32, #tpu.memory_space<vmem>>, vector<8x128xf32>
    tpu.vector_store %arg9[%c0_168, %c0_169], %761 {strides = array<i32>} : memref<8x128xf32, #tpu.memory_space<vmem>>, vector<8x128xf32>,
    return
  }
  func.func @transform_0(%arg0: i32) -> (i32, i32) {
    %c0_i32 = arith.constant 0 : i32
    %c0_i32_0 = arith.constant 0 : i32
    return %arg0, %c0_i32 : i32, i32
  }
  func.func @transform_1(%arg0: i32) -> (i32, i32) {
    %c0_i32 = arith.constant 0 : i32
    %c0_i32_0 = arith.constant 0 : i32
    %c0_i32_1 = arith.constant 0 : i32
    return %c0_i32, %c0_i32_0 : i32, i32
  }
  func.func @transform_2(%arg0: i32) -> i32 {
    %c0_i32 = arith.constant 0 : i32
    %c0_i32_0 = arith.constant 0 : i32
    return %c0_i32 : i32
  }
  func.func @transform_3(%arg0: i32) -> i32 {
    %c0_i32 = arith.constant 0 : i32
    %c0_i32_0 = arith.constant 0 : i32
    return %c0_i32 : i32
  }
  func.func @transform_4(%arg0: i32) -> i32 {
    %c0_i32 = arith.constant 0 : i32
    %c0_i32_0 = arith.constant 0 : i32
    return %c0_i32 : i32
  }
  func.func @transform_5(%arg0: i32) -> i32 {
    %c0_i32 = arith.constant 0 : i32
    %c0_i32_0 = arith.constant 0 : i32
    return %c0_i32 : i32
  }
  func.func @transform_6(%arg0: i32) -> (i32, i32) {
    %c0_i32 = arith.constant 0 : i32
    %c0_i32_0 = arith.constant 0 : i32
    return %arg0, %c0_i32 : i32, i32
  }
  func.func @transform_7(%arg0: i32) -> (i32, i32) {
    %c0_i32 = arith.constant 0 : i32
    %c0_i32_0 = arith.constant 0 : i32
    return %arg0, %c0_i32 : i32, i32
  }
  func.func @transform_8(%arg0: i32) -> (i32, i32) {
    %c0_i32 = arith.constant 0 : i32
    %c0_i32_0 = arith.constant 0 : i32
    return %arg0, %c0_i32 : i32, i32
  }
}

</mosaic_0001>

<bundles_post_ra>
// kernel: parsenet1_forward.1
= control target key start
LH: loop header
LB: loop body
LE: loop exit
PB: predicated region body
PF: predicated region fallthrough
CT: control target
= control target key end

     0   :  { %s4091_s0 = inlined_call_operand.vmem [shape: f32[16,256], index: 0, kind: input, shape index: {}]   ;;  %s4092_s1 = inlined_call_operand.vmem [shape: f32[4,256], index: 1, kind: input, shape index: {}]   ;;  %s4093_s2 = inlined_call_operand.vmem [shape: f32[72], index: 2, kind: input, shape index: {}]   ;;  %s4094_s3 = inlined_call_operand.vmem [shape: f32[8], index: 3, kind: input, shape index: {}]   ;;  %s4095_s4 = inlined_call_operand.vmem [shape: f32[72], index: 4, kind: input, shape index: {}]   ;;  %s4096_s5 = inlined_call_operand.<no memory space> [shape: f32[1], index: 5, kind: input, shape index: {}]   ;;  %s4097_s6 = inlined_call_operand.vmem [shape: f32[16,256], index: 6, kind: output, shape index: {0}]   ;;  %s4098_s7 = inlined_call_operand.vmem [shape: f32[16,256], index: 7, kind: output, shape index: {1}]   ;;  %s4099_s8 = inlined_call_operand.vmem [shape: f32[16,128], index: 8, kind: output, shape index: {2}]  }
   0x1   :  { %4152 = sst [smem:[#allocation34_spill]] %s4091_s0 }
   0x2   :  { %4153 = sst [smem:[#allocation35_spill]] %s4092_s1 }
   0x3   :  { %4154 = sst [smem:[#allocation36_spill]] %s4093_s2 }
   0x4   :  { %4155 = sst [smem:[#allocation37_spill]] %s4094_s3 }
   0x5   :  { %4156 = sst [smem:[#allocation38_spill]] %s4095_s4 }
   0x6   :  { %4157 = sst [smem:[#allocation39_spill]] %s4097_s6 }
   0x7   :  { %4158 = sst [smem:[#allocation40_spill]] %s4098_s7 }
   0x8   :  { %4159 = sst [smem:[#allocation41_spill]] %s4099_s8 }
   0x9   :  { %14 = sst [smem:[#allocation2]] %s4096_s5 }
   0xa   :  { %15 = vsyncpa [#allocation4], 0 }
   0xb   :  { %16 = vsyncpa [#allocation6], 0  ;;  %s2431_s29 = smov 0  }
   0xc LB: > { %4160 = sst [smem:[#allocation10_spill]] %s2370_s29  ;;  %s2060_s30 = sadd.s32 4294967295, %s2370_s29   ;;  %s2370_s29 = sphi %s2431_s29, %s22_s29  }
   0xd   : > { %p2062_p0 = scmp.ge.s32.totalorder %s2370_s29, 1  ;;  %p236_p1 = scmp.lt.s32.totalorder %s2370_s29, 3 }
   0xe   : > { %s4161_s3 = sld [smem:[#allocation37_spill]]  ;;  %p2263_p3 = scmp.eq.s32.totalorder %s2060_s30, 0 }
   0xf   : > { %p2442_p2 = pnand %p2062_p0, %p236_p1  ;;  %s4163_s2 = sld [smem:[#allocation36_spill]] }
  0x10   : > { %s4164_s4 = sld [smem:[#allocation38_spill]]  ;;  %s2372_s18 = smov [#allocation5]  }
  0x11   : > { %p2253_p4 = pneg %p2442_p2  ;;  %s2373_s19 = smov [#allocation3]  }
  0x12   : > { %s2374_s20 = smov [#allocation7]  }
  0x13   : > { %p2254_p5 = pnand %p2263_p3, %p2253_p4 }
  0x14   : > { %s261_s11 = sshll.u32 %s4161_s3, 4  ;;  %s262_s11 = int_to_ptr.vmem [resolvable:$true] %s261_s11 }
  0x15   : > { %s251_s14 = sshll.u32 %s4163_s2, 4  ;;  %295 = sbr.rel (%p2442_p2) target bundleno = 759 (0x2f7), region = 44  ;;  %s252_s14 = int_to_ptr.vmem [resolvable:$true] %s251_s14 }
  0x16   : > { %s271_s17 = sshll.u32 %s4164_s4, 4  ;;  %s272_s17 = int_to_ptr.vmem [resolvable:$true] %s271_s17 }
  0x17   : > { %2259 = dma.vmem_to_smem (!%p2254_p5), %s262_s11, 16, %s2372_s18, [#allocation6]  }
  0x18   : > { %2256 = dma.vmem_to_smem (!%p2254_p5), %s252_s14, 16, %s2373_s19, [#allocation4]  }
  0x19   : > { %2262 = dma.vmem_to_smem (!%p2254_p5), %s272_s17, 16, %s2374_s20, [#allocation6]  }
  0x1a   : > { %2361 = dma.done.wait (%p2263_p3), [#allocation4], 16  }
  0x1b   : > { %2363 = vsyncadd (%p2263_p3), [#allocation4], 4294967280 }
  0x1c   : > { %2365 = dma.done.wait (%p2263_p3), [#allocation6], 32  }
  0x1d   : > { %2367 = vsyncadd (%p2263_p3), [#allocation6], 4294967264 }
  0x1e   : > { %312 = sfence }
  0x1f   : > { %p350_p6 = scmp.lt.s32.totalorder %s2060_s30, 1  ;;  %s4167_s0 = sld [smem:[#allocation34_spill]]  ;;  %v389_v5 = vlaneseq }
  0x20   : > { %s4112_s25 = smov 16   ;;  %s4114_s26 = smov 17  }
  0x21   : > { %s4278_s30 = smov (!%p350_p6, %s2060_s30), 1  ;;  %s4110_s27 = smov 15   ;;  %v2564_v8 = vand.u32 127, %v389_v5 }
  0x22   : > { %4165 = sst [smem:[#allocation11_spill]] %s4278_s30  ;;  %s2464_s21 = sshll.u32 %s4278_s30, 4 }
  0x23   : > { %4166 = sst [smem:[#allocation12_spill]] %s2464_s21  ;;  %s4108_s28 = smov 1   ;;  %vm422_vm0 = vcmp.lt.s32.totalorder %v2564_v8, 15  ;;  %vm407_vm1 = vcmp.lt.s32.totalorder %v2564_v8, 16  ;;  %vm391_vm2 = vcmp.lt.s32.totalorder %v2564_v8, 17  ;;  %vm438_vm3 = vcmp.lt.s32.totalorder %v2564_v8, 1 }
  0x24   : > { %s4106_s9 = smov 127   ;;  %s4104_s10 = smov 113   ;;  %vm453_vm4 = vcmp.lt.s32.totalorder %v2564_v8, 127  ;;  %vm468_vm5 = vcmp.lt.s32.totalorder %v2564_v8, 113  ;;  %vm484_vm6 = vcmp.lt.s32.totalorder %v2564_v8, 112  ;;  %vm499_vm7 = vcmp.lt.s32.totalorder %v2564_v8, 111 }
  0x25   : > { %s2470_s24 = scalar_lea.vmem %s4167_s0, %s2464_s21  ;;  %s4102_s11 = smov 112  }
  0x26   : > { %4168 = sst [smem:[#allocation13_spill]] %s2470_s24  ;;  %v2473_v0 = vld [vmem:[%s2470_s24] sm:$0xff]  ;;  %v2482_v1 = vld [vmem:[%s2470_s24 + $0x8] sm:$0xff]  ;;  %s4100_s5 = smov 111  }
  0x27   : > { %4169 = vst [vmem:[#allocation14_spill] sm:$0xff] %v2473_v0  ;;  %403 = vrot.lane.b32.xlu1 %v2473_v0, %s4112_s25  ;;  %385 = vrot.lane.b32.xlu0 %v2473_v0, %s4114_s26  ;;  %s2510_s12 = sld [smem:[#allocation3 + $0x10]] }
  0x28   : > { %418 = vrot.lane.b32.xlu2 %v2473_v0, %s4110_s27  ;;  %4170 = vst [vmem:[#allocation15_spill] sm:$0xff] %v2482_v1  ;;  %s2512_s13 = sld [smem:[#allocation3 + $0x11]] }
  0x29   : > { %s2514_s14 = sld [smem:[#allocation3 + $0x12]] }
  0x2a   : > { %s2516_s15 = sld [smem:[#allocation3 + $0x13]] }
  0x2b   : > { %s2518_s16 = sld [smem:[#allocation3 + $0x14]] }
  0x2c   : > { %s2520_s17 = sld [smem:[#allocation3 + $0x15]] }
  0x2d   : > { %s2522_s18 = sld [smem:[#allocation3 + $0x16]]  ;;  %v521_v12 = vstv %s2510_s12 }
  0x2e   : > { %s2524_s19 = sld [smem:[#allocation3 + $0x17]]  ;;  %v579_v13 = vstv %s2512_s13 }
  0x2f   : > { %405 = vrot.lane.b32.xlu1 %v2482_v1, %s4112_s25  ;;  %387 = vrot.lane.b32.xlu0 %v2482_v1, %s4114_s26  ;;  %s2526_s20 = sld [smem:[#allocation3 + $0x8]]  ;;  %v637_v16 = vstv %s2514_s14 }
  0x30   : > { %420 = vrot.lane.b32.xlu2 %v2482_v1, %s4110_s27  ;;  %s2528_s22 = sld [smem:[#allocation3 + $0x9]]  ;;  %v695_v17 = vstv %s2516_s15 }
  0x31   : > { %s2530_s23 = sld [smem:[#allocation3 + $0xa]]  ;;  %v753_v18 = vstv %s2518_s16 }
  0x32   : > { %s4171_s1 = sld [smem:[#allocation35_spill]]  ;;  %v811_v22 = vstv %s2520_s17 }
  0x33   : > { %s2543_s27 = sld [smem:[#allocation3 + $0xe]]  ;;  %v869_v23 = vstv %s2522_s18 }
  0x34   : > { %s2545_s25 = sld [smem:[#allocation3 + $0xf]]  ;;  %v927_v29 = vstv %s2524_s19 }
  0x35   : > { %s2547_s26 = sld [smem:[#allocation3]]  ;;  %v515_v31 = vstv %s2526_s20 }
  0x36   : > { %s2550_s0 = sld [smem:[#allocation3 + $0x1]]  ;;  %v573_v32 = vstv %s2528_s22 }
  0x37   : > { %436 = vrot.lane.b32.xlu1 %v2482_v1, %s4108_s28  ;;  %434 = vrot.lane.b32.xlu0 %v2473_v0, %s4108_s28  ;;  %s2552_s2 = sld [smem:[#allocation3 + $0x2]]  ;;  %v631_v35 = vstv %s2530_s23 }
  0x38   : > { %449 = vrot.lane.b32.xlu2 %v2473_v0, %s4106_s9  ;;  %v2541_v2 = vld [vmem:[%s4171_s1] sm:$0xff]  ;;  %s2554_s3 = sld [smem:[#allocation3 + $0x3]] }
  0x39   : > { %4172 = vst [vmem:[#allocation16_spill] sm:$0xff] %v2541_v2  ;;  %v2079_v4 = vrot.slane %v2541_v2, 11  ;;  %s2556_s28 = sld [smem:[#allocation3 + $0x4]]  ;;  %v2078_v7 = vrot.slane %v2541_v2, 10  ;;  %v410_v15 = vperm.slane %v2541_v2, 0  ;;  %v411_v19 = vperm.slane %v2541_v2, 4 }
  0x3a   : > { %s2562_s1 = sld [smem:[#allocation3 + $0x6]]  ;;  %v863_v41 = vstv %s2543_s27  ;;  %v921_v42 = vstv %s2545_s25  ;;  %v441_v60 = vperm.slane %v2541_v2, 2 }
  0x3b   : > { %v380_v6 = vmul.f32 %v2079_v4, %v2541_v2  ;;  %s2566_s4 = sld [smem:[#allocation3 + $0x7]]  ;;  %v2573_v11 = vmul.f32 %v2078_v7, %v2541_v2  ;;  %v2608_v30 = vperm.slane %v410_v15, 0  ;;  %v2617_v34 = vperm.slane %v411_v19, 0 }
  0x3c   : > { %s2568_s29 = sld [smem:[#allocation3 + $0x18]]  ;;  %v511_v45 = vstv %s2547_s26  ;;  %v569_v46 = vstv %s2550_s0 }
  0x3d   : > { %v426_v9 = vperm.slane %v380_v6, 0  ;;  %v427_v10 = vperm.slane %v380_v6, 4  ;;  %s2570_s7 = sld [smem:[#allocation3 + $0x19]]  ;;  %4177 = vst [vmem:[#allocation21_spill] sm:$0xff] %v2573_v11  ;;  %v395_v27 = vperm.slane %v2573_v11, 0  ;;  %v396_v28 = vperm.slane %v2573_v11, 4 }
  0x3e   : > { %s2575_s8 = sld [smem:[#allocation3 + $0x1a]]  ;;  %4180 = vst [vmem:[#allocation24_spill] sm:$0xff] %v2608_v30 }
  0x3f   : > { %464 = vrot.lane.b32.xlu1 %v2473_v0, %s4104_s10  ;;  %451 = vrot.lane.b32.xlu0 %v2482_v1, %s4106_s9  ;;  %4173 = sst [smem:[#allocation17_spill]] %s2556_s28  ;;  %v2589_v20 = vperm.slane %v426_v9, 0  ;;  %v2591_v21 = vperm.slane %v427_v10, 0  ;;  %4181 = vst [vmem:[#allocation25_spill] sm:$0xff] %v2617_v34  ;;  %v2632_v43 = vperm.slane %v395_v27, 0  ;;  %v2634_v44 = vperm.slane %v396_v28, 0 }
  0x40   : > { %466 = vrot.lane.b32.xlu2 %v2482_v1, %s4104_s10  ;;  %s2536_s10 = sld [smem:[#allocation3 + $0xd]]  ;;  %v456_v28 = vperm.slane %v2541_v2, 3 }
  0x41   : > { %s2559_s9 = sld [smem:[#allocation3 + $0x5]]  ;;  %4178 = vst [vmem:[#allocation22_spill] sm:$0xff] %v2589_v20 }
  0x42   : > { %4175 = sst [smem:[#allocation19_spill]] %s2562_s1  ;;  %4179 = vst [vmem:[#allocation23_spill] sm:$0xff] %v2591_v21 }
  0x43   : > { %4176 = sst [smem:[#allocation20_spill]] %s2566_s4  ;;  %4182 = vst [vmem:[#allocation26_spill] sm:$0xff] %v2632_v43 }
  0x44   : > { %s2581_s30 = sld [smem:[#allocation3 + $0x1b]]  ;;  %4183 = vst [vmem:[#allocation27_spill] sm:$0xff] %v2634_v44 }
  0x45   : > { %s2587_s6 = sld [smem:[#allocation3 + $0x1c]] }
  0x46   : > { %s2595_s12 = sld [smem:[#allocation3 + $0x1d]]  ;;  %v805_v40 = vstv %s2536_s10 }
  0x47   : > { %482 = vrot.lane.b32.xlu1 %v2482_v1, %s4102_s11  ;;  %480 = vrot.lane.b32.xlu0 %v2473_v0, %s4102_s11  ;;  %s2534_s11 = sld [smem:[#allocation3 + $0xc]] }
  0x48   : > { %495 = vrot.lane.b32.xlu2 %v2473_v0, %s4100_s5  ;;  %4174 = sst [smem:[#allocation18_spill]] %s2559_s9 }
  0x49   : > { %s2605_s13 = sld [smem:[#allocation3 + $0x1e]] }
  0x4a   : > { %s2612_s14 = sld [smem:[#allocation3 + $0x1f]] }
  0x4b   : > { %s2622_s15 = sld [smem:[#allocation3 + $0x20]] }
  0x4c   : > { %s2628_s16 = sld [smem:[#allocation3 + $0x28]] }
  0x4d   : > { %v747_v37 = vstv %s2534_s11  ;;  %s2636_s17 = sld [smem:[#allocation3 + $0x21]] }
  0x4e   : > { %s2642_s18 = sld [smem:[#allocation3 + $0x29]] }
  0x4f   : > { %497 = vrot.lane.b32.xlu0 %v2482_v1, %s4100_s5  ;;  %s2532_s5 = sld [smem:[#allocation3 + $0xb]] }
  0x50   : > { %s2648_s19 = sld [smem:[#allocation3 + $0x22]] }
  0x51   : > { %s2658_s21 = sld [smem:[#allocation3 + $0x2a]] }
  0x52   : > { %s2667_s24 = sld [smem:[#allocation3 + $0x23]] }
  0x53   : > { %s2676_s4 = sld [smem:[#allocation3 + $0x2b]] }
  0x54   : > { %s2686_s1 = sld [smem:[#allocation3 + $0x24]] }
  0x55   : > { %v689_v36 = vstv %s2532_s5  ;;  %s2694_s9 = sld [smem:[#allocation3 + $0x2c]] }
  0x56   : > { %s2701_s28 = sld [smem:[#allocation3 + $0x25]] }
  0x57   : > { %s4190_s20 = sld [smem:[#allocation17_spill]] }
  0x58   : > { %s4191_s22 = sld [smem:[#allocation18_spill]] }
  0x59   : > { %s4192_s5 = sld [smem:[#allocation19_spill]] }
  0x5a   : > { %s4193_s26 = sld [smem:[#allocation20_spill]] }
  0x5b   : > { %s2824_s0 = sld [smem:[#allocation3 + $0x26]] }
  0x5c   : > { %s2836_s25 = sld [smem:[#allocation3 + $0x27]] }
  0x5d   : > { %v4198_v11 = vstv %s4190_s20  ;;  %s2839_s27 = sld [smem:[#allocation3 + $0x2f]] }
  0x5e   : > { %s3062_s10 = sld [smem:[#allocation3 + $0x40]] }
  0x5f   : > { %s3077_s11 = sld [smem:[#allocation3 + $0x41]] }
  0x60   : > { %s3097_s23 = sld [smem:[#allocation3 + $0x42]] }
  0x61   : > { %s3184_s20 = sld [smem:[#allocation3 + $0x45]] }
  0x82   : > { %v419_v3 = vpop.permute.xlu2 %418 }
  0x8a   : > { %v421_v14 = vpop.permute.xlu2 %420 }
  0x8b   : > { %v423_v25 = vsel %vm422_vm0, %v419_v3, %v421_v14  ;;  %v424_v26 = vsel %vm422_vm0, %v421_v14, %v419_v3  ;;  %v442_v3 = vperm.slane %v2541_v2, 6 }
  0x8c   : > { %v432_v38 = vmul.f32 %v2589_v20, %v424_v26  ;;  %v433_v39 = vmul.f32 %v2591_v21, %v423_v25  ;;  %v4130_v26 = vstv %s2622_s15  ;;  %v4131_v25 = vstv %s2648_s19 }
  0x8e   : > { %v2650_v53 = vmul.f32 %v521_v12, %v432_v38  ;;  %v2652_v54 = vmul.f32 %v521_v12, %v433_v39  ;;  %v2654_v55 = vmul.f32 %v579_v13, %v432_v38  ;;  %v2656_v56 = vmul.f32 %v579_v13, %v433_v39 }
  0x8f   : > { %v2660_v57 = vmul.f32 %v637_v16, %v432_v38  ;;  %v2662_v58 = vmul.f32 %v637_v16, %v433_v39  ;;  %v2664_v59 = vmul.f32 %v695_v17, %v432_v38  ;;  %v2669_v61 = vmul.f32 %v695_v17, %v433_v39 }
  0x90   : > { %v2671_v62 = vmul.f32 %v753_v18, %v432_v38  ;;  %v2673_v63 = vmul.f32 %v753_v18, %v433_v39  ;;  %v2678_v4 = vmul.f32 %v811_v22, %v432_v38  ;;  %v2680_v5 = vmul.f32 %v811_v22, %v433_v39 }
  0x91   : > { %v2682_v6 = vmul.f32 %v869_v23, %v432_v38  ;;  %v2684_v7 = vmul.f32 %v869_v23, %v433_v39  ;;  %v2688_v10 = vmul.f32 %v927_v29, %v432_v38  ;;  %v2690_v12 = vmul.f32 %v927_v29, %v433_v39 }
  0x92   : > { %v2696_v16 = vperm.slane %v441_v60, 2  ;;  %v2706_v23 = vperm.slane %v442_v3, 2  ;;  %v457_v29 = vperm.slane %v2541_v2, 7  ;;  %v4132_v38 = vstv %s2636_s17 }
  0x93   : > { %v4133_v18 = vstv %s2667_s24 }
  0x99   : > { %v2597_v24 = vpop.permute.xlu1 %403  ;;  %v2614_v33 = vpop.permute.xlu0 %385 }
  0xa1   : > { %v406_v9 = vpop.permute.xlu1 %405  ;;  %v388_v15 = vpop.permute.xlu0 %387 }
  0xa2   : > { %v409_v22 = vsel %vm407_vm1, %v406_v9, %v2597_v24  ;;  %v408_v27 = vsel %vm407_vm1, %v2597_v24, %v406_v9  ;;  %v393_v39 = vsel %vm391_vm2, %v388_v15, %v2614_v33  ;;  %v392_v24 = vsel %vm391_vm2, %v2614_v33, %v388_v15 }
  0xa3   : > { %v416_v19 = vmul.f32 %v2608_v30, %v409_v22  ;;  %v2729_v9 = vmul.f32 %v4130_v26, %v2482_v1  ;;  %v417_v3 = vmul.f32 %v2617_v34, %v408_v27  ;;  %v2737_v22 = vmul.f32 %v4132_v38, %v2482_v1 }
  0xa4   : > { %v401_v33 = vmul.f32 %v2632_v43, %v393_v39  ;;  %v2741_v15 = vperm.slane %v456_v28, 3  ;;  %v2743_v26 = vperm.slane %v457_v29, 3  ;;  %v2748_v27 = vmul.f32 %v4131_v25, %v2482_v1 }
  0xa5   : > { %4184 = vst [vmem:[#allocation28_spill] sm:$0xff] %v2729_v9  ;;  %v402_v60 = vmul.f32 %v2634_v44, %v392_v24  ;;  %v2756_v28 = vmul.f32 %v4133_v18, %v2482_v1  ;;  %v516_v39 = vmul.f32 %v515_v31, %v416_v19  ;;  %v517_v14 = vmul.f32 %v515_v31, %v417_v3 }
  0xa6   : > { %4185 = vst [vmem:[#allocation29_spill] sm:$0xff] %v2737_v22  ;;  %v574_v17 = vmul.f32 %v573_v32, %v416_v19  ;;  %v575_v18 = vmul.f32 %v573_v32, %v417_v3  ;;  %v632_v29 = vmul.f32 %v631_v35, %v416_v19  ;;  %v633_v13 = vmul.f32 %v631_v35, %v417_v3 }
  0xa7   : > { %4186 = vst [vmem:[#allocation30_spill] sm:$0xff] %v2741_v15  ;;  %v690_v25 = vmul.f32 %v689_v36, %v416_v19  ;;  %v691_v38 = vmul.f32 %v689_v36, %v417_v3  ;;  %v512_v31 = vmul.f32 %v511_v45, %v401_v33  ;;  %v748_v24 = vmul.f32 %v747_v37, %v416_v19 }
  0xa8   : > { %4187 = vst [vmem:[#allocation31_spill] sm:$0xff] %v2743_v26  ;;  %v749_v52 = vmul.f32 %v747_v37, %v417_v3  ;;  %v806_v32 = vmul.f32 %v805_v40, %v416_v19  ;;  %v513_v51 = vmul.f32 %v511_v45, %v402_v60  ;;  %v807_v35 = vmul.f32 %v805_v40, %v417_v3 }
  0xa9   : > { %4188 = vst [vmem:[#allocation32_spill] sm:$0xff] %v2748_v27  ;;  %v864_v50 = vmul.f32 %v863_v41, %v416_v19  ;;  %v865_v36 = vmul.f32 %v863_v41, %v417_v3  ;;  %v922_v49 = vmul.f32 %v921_v42, %v416_v19  ;;  %v923_v48 = vmul.f32 %v921_v42, %v417_v3  ;;  %v437_v9 = vpop.permute.xlu1 %436  ;;  %v435_v2 = vpop.permute.xlu0 %434 }
  0xaa   : > { %4189 = vst [vmem:[#allocation33_spill] sm:$0xff] %v2756_v28  ;;  %v570_v37 = vmul.f32 %v569_v46, %v401_v33  ;;  %v571_v47 = vmul.f32 %v569_v46, %v402_v60  ;;  %v4194_v45 = vstv %s2552_s2  ;;  %v518_v20 = vadd.f32 %v516_v39, %v512_v31  ;;  %s2828_s2 = sld [smem:[#allocation3 + $0x2d]] }
  0xab   : > { %v628_v21 = vmul.f32 %v4194_v45, %v401_v33  ;;  %v4195_v40 = vmov %v4194_v45  ;;  %v4196_v30 = vstv %s2554_s3  ;;  %v519_v19 = vadd.f32 %v517_v14, %v513_v51  ;;  %s2832_s3 = sld [smem:[#allocation3 + $0x2e]] }
  0xac   : > { %v629_v34 = vmul.f32 %v4195_v40, %v402_v60  ;;  %v686_v44 = vmul.f32 %v4196_v30, %v401_v33  ;;  %v4197_v41 = vmov %v4196_v30  ;;  %v744_v28 = vmul.f32 %v4198_v11, %v401_v33 }
  0xad   : > { %v687_v43 = vmul.f32 %v4197_v41, %v402_v60  ;;  %v4199_v42 = vmov %v4198_v11  ;;  %v4200_v27 = vstv %s4191_s22  ;;  %v4202_v45 = vstv %s4192_s5  ;;  %s3193_s22 = sld [smem:[#allocation5 + $0x4]]  ;;  %s4250_s5 = smov 17  }
  0xae   : > { %v745_v3 = vmul.f32 %v4199_v42, %v402_v60  ;;  %v802_v22 = vmul.f32 %v4200_v27, %v401_v33  ;;  %v4201_v46 = vmov %v4200_v27  ;;  %v860_v39 = vmul.f32 %v4202_v45, %v401_v33 }
  0xaf   : > { %v803_v0 = vmul.f32 %v4201_v46, %v402_v60  ;;  %v4203_v31 = vmov %v4202_v45  ;;  %v4204_v26 = vstv %s4193_s26  ;;  %v576_v41 = vadd.f32 %v574_v17, %v570_v37  ;;  %s3204_s26 = sld [smem:[#allocation3 + $0x37]] }
  0xb0   : > { %v861_v40 = vmul.f32 %v4203_v31, %v402_v60  ;;  %v918_v30 = vmul.f32 %v4204_v26, %v401_v33  ;;  %v577_v51 = vadd.f32 %v575_v18, %v571_v47  ;;  %v634_v14 = vadd.f32 %v632_v29, %v628_v21  ;;  %v4210_v33 = vld [vmem:[#allocation15_spill] sm:$0xff] }
  0xb1   : > { %v4205_v11 = vmov %v4204_v26  ;;  %v635_v27 = vadd.f32 %v633_v13, %v629_v34  ;;  %v692_v42 = vadd.f32 %v690_v25, %v686_v44  ;;  %v693_v1 = vadd.f32 %v691_v38, %v687_v43  ;;  %v452_v37 = vpop.permute.xlu0 %451 }
  0xb2   : > { %v919_v15 = vmul.f32 %v4205_v11, %v402_v60  ;;  %v440_v46 = vsel %vm438_vm3, %v437_v9, %v435_v2  ;;  %v750_v45 = vadd.f32 %v748_v24, %v744_v28  ;;  %v751_v31 = vadd.f32 %v749_v52, %v745_v3 }
  0xb3   : > { %v808_v26 = vadd.f32 %v806_v32, %v802_v22  ;;  %v439_v17 = vsel %vm438_vm3, %v435_v2, %v437_v9  ;;  %v809_v21 = vadd.f32 %v807_v35, %v803_v0  ;;  %v866_v47 = vadd.f32 %v864_v50, %v860_v39 }
  0xb4   : > { %v867_v18 = vadd.f32 %v865_v36, %v861_v40  ;;  %v924_v60 = vadd.f32 %v922_v49, %v918_v30  ;;  %v925_v34 = vadd.f32 %v923_v48, %v919_v15  ;;  %v524_v43 = vadd.f32 %v2650_v53, %v518_v20 }
  0xb5   : > { %v525_v44 = vadd.f32 %v2652_v54, %v519_v19  ;;  %v447_v52 = vmul.f32 %v2696_v16, %v440_v46  ;;  %v582_v2 = vadd.f32 %v2654_v55, %v576_v41  ;;  %v583_v0 = vadd.f32 %v2656_v56, %v577_v51 }
  0xb6   : > { %v640_v49 = vadd.f32 %v2660_v57, %v634_v14  ;;  %v448_v50 = vmul.f32 %v2706_v23, %v439_v17  ;;  %v641_v48 = vadd.f32 %v2662_v58, %v635_v27  ;;  %v698_v20 = vadd.f32 %v2664_v59, %v692_v42 }
  0xb7   : > { %v699_v53 = vadd.f32 %v2669_v61, %v693_v1  ;;  %v756_v54 = vadd.f32 %v2671_v62, %v750_v45  ;;  %v757_v55 = vadd.f32 %v2673_v63, %v751_v31  ;;  %v814_v56 = vadd.f32 %v2678_v4, %v808_v26  ;;  %v450_v45 = vpop.permute.xlu2 %449 }
  0xb8   : > { %v815_v57 = vadd.f32 %v2680_v5, %v809_v21  ;;  %v881_v58 = vstv %s2824_s0  ;;  %v872_v59 = vadd.f32 %v2682_v6, %v866_v47  ;;  %v873_v13 = vadd.f32 %v2684_v7, %v867_v18  ;;  %s3223_s0 = sld [smem:[#allocation3 + $0x3e]] }
  0xb9   : > { %v930_v1 = vadd.f32 %v2688_v10, %v924_v60  ;;  %v4206_v61 = vstv %s2568_s29  ;;  %v2862_v63 = vadd.f32 %v2690_v12, %v925_v34  ;;  %v4208_v5 = vstv %s2570_s7  ;;  %s2972_s7 = sld [smem:[#allocation3 + $0x31]] }
  0xba   : > { %v528_v62 = vmul.f32 %v4206_v61, %v447_v52  ;;  %v4207_v4 = vmov %v4206_v61  ;;  %v586_v38 = vmul.f32 %v4208_v5, %v447_v52  ;;  %v4209_v9 = vmov %v4208_v5  ;;  %s3009_s29 = sld [smem:[#allocation3 + $0x38]] }
  0xbb   : > { %v529_v25 = vmul.f32 %v4207_v4, %v448_v50  ;;  %v587_v22 = vmul.f32 %v4209_v9, %v448_v50  ;;  %v4211_v6 = vstv %s2686_s1  ;;  %v4212_v7 = vstv %s2701_s28 }
  0xbc   : > { %v767_v15 = vmul.f32 %v4211_v6, %v4210_v33  ;;  %v825_v10 = vmul.f32 %v4212_v7, %v4210_v33  ;;  %v829_v28 = vstv %s2828_s2  ;;  %v883_v12 = vmul.f32 %v881_v58, %v4210_v33  ;;  %v4225_v6 = vld [vmem:[#allocation30_spill] sm:$0xff]  ;;  %s3233_s2 = sld [smem:[#allocation3 + $0x3f]] }
  0xbd   : > { %v4213_v29 = vstv %s2575_s8  ;;  %v887_v32 = vstv %s2832_s3  ;;  %v4151_v35 = vstv %s2836_s25  ;;  %v4150_v36 = vstv %s2839_s27  ;;  %s2990_s8 = sld [smem:[#allocation3 + $0x33]] }
  0xbe   : > { %v644_v24 = vmul.f32 %v4213_v29, %v447_v52  ;;  %v530_v19 = vadd.f32 %v528_v62, %v524_v43  ;;  %v4214_v3 = vmov %v4213_v29  ;;  %v4215_v40 = vstv %s2581_s30  ;;  %v4226_v29 = vld [vmem:[#allocation31_spill] sm:$0xff]  ;;  %s3019_s30 = sld [smem:[#allocation3 + $0x39]] }
  0xbf   : > { %v645_v39 = vmul.f32 %v4214_v3, %v448_v50  ;;  %v702_v30 = vmul.f32 %v4215_v40, %v447_v52  ;;  %v4216_v41 = vmov %v4215_v40  ;;  %v531_v14 = vadd.f32 %v529_v25, %v525_v44  ;;  %s3236_s3 = sld [smem:[#allocation5 + $0x5]] }
  0xc0   : > { %v703_v51 = vmul.f32 %v4216_v41, %v448_v50  ;;  %v588_v11 = vadd.f32 %v586_v38, %v582_v2  ;;  %v589_v27 = vadd.f32 %v587_v22, %v583_v0  ;;  %v4217_v42 = vstv %s2587_s6  ;;  %s2966_s6 = sld [smem:[#allocation3 + $0x30]] }
  0xc1   : > { %v760_v46 = vmul.f32 %v4217_v42, %v447_v52  ;;  %v4218_v31 = vmov %v4217_v42  ;;  %v4219_v17 = vstv %s2595_s12  ;;  %v454_v47 = vsel %vm453_vm4, %v450_v45, %v452_v37  ;;  %s3125_s12 = sld [smem:[#allocation3 + $0x3c]] }
  0xc2   : > { %v761_v26 = vmul.f32 %v4218_v31, %v448_v50  ;;  %v818_v21 = vmul.f32 %v4219_v17, %v447_v52  ;;  %v455_v18 = vsel %vm453_vm4, %v452_v37, %v450_v45  ;;  %v4220_v60 = vmov %v4219_v17  ;;  %v465_v31 = vpop.permute.xlu1 %464 }
  0xc3   : > { %v819_v34 = vmul.f32 %v4220_v60, %v448_v50  ;;  %v4221_v43 = vstv %s2605_s13  ;;  %v4223_v61 = vstv %s2612_s14  ;;  %v646_v4 = vadd.f32 %v644_v24, %v640_v49  ;;  %v4227_v49 = vld [vmem:[#allocation14_spill] sm:$0xff]  ;;  %s3135_s13 = sld [smem:[#allocation5 + $0x2]] }
  0xc4   : > { %v876_v44 = vmul.f32 %v4221_v43, %v447_v52  ;;  %v4222_v2 = vmov %v4221_v43  ;;  %v934_v62 = vmul.f32 %v4223_v61, %v447_v52  ;;  %v647_v25 = vadd.f32 %v645_v39, %v641_v48  ;;  %s3145_s14 = sld [smem:[#allocation3 + $0x43]] }
  0xc5   : > { %v877_v0 = vmul.f32 %v4222_v2, %v448_v50  ;;  %v704_v5 = vadd.f32 %v702_v30, %v698_v20  ;;  %v705_v38 = vadd.f32 %v703_v51, %v699_v53  ;;  %v762_v9 = vadd.f32 %v760_v46, %v756_v54  ;;  %v4229_v53 = vld [vmem:[#allocation16_spill] sm:$0xff] }
  0xc6   : > { %v4224_v22 = vmov %v4223_v61  ;;  %v2914_v7 = vmul.f32 %v4225_v6, %v454_v47  ;;  %v2917_v37 = vmul.f32 %v4226_v29, %v455_v18  ;;  %v763_v3 = vadd.f32 %v761_v26, %v757_v55  ;;  %v4230_v30 = vld [vmem:[#allocation28_spill] sm:$0xff]  ;;  %v4231_v55 = vld [vmem:[#allocation29_spill] sm:$0xff] }
  0xc7   : > { %v2911_v33 = vmul.f32 %v4224_v22, %v448_v50  ;;  %v2919_v52 = vadd.f32 %v818_v21, %v814_v56  ;;  %v4228_v48 = vstv %s2622_s15  ;;  %v2080_v54 = vrot.slane %v4229_v53, 9  ;;  %v4232_v51 = vld [vmem:[#allocation32_spill] sm:$0xff]  ;;  %s3147_s15 = sld [smem:[#allocation3 + $0x44]] }
  0xc8   : > { %v534_v20 = vmul.f32 %v4228_v48, %v4227_v49  ;;  %v821_v50 = vadd.f32 %v819_v34, %v815_v57  ;;  %v2925_v24 = vadd.f32 %v876_v44, %v872_v59  ;;  %v879_v39 = vadd.f32 %v877_v0, %v873_v13 }
  0xc9   : > { %v2927_v40 = vadd.f32 %v934_v62, %v930_v1  ;;  %v537_v41 = vadd.f32 %v4230_v30, %v531_v14  ;;  %v595_v56 = vadd.f32 %v4231_v55, %v589_v27  ;;  %v653_v42 = vadd.f32 %v4232_v51, %v647_v25  ;;  %v4238_v27 = vld [vmem:[#allocation33_spill] sm:$0xff] }
  0xca   : > { %v4233_v46 = vstv %s2636_s17  ;;  %v4234_v57 = vstv %s2628_s16  ;;  %v4236_v26 = vstv %s2648_s19  ;;  %v4237_v14 = vstv %s2667_s24  ;;  %s3050_s24 = sld [smem:[#allocation3 + $0x3b]] }
  0xcb   : > { %v592_v45 = vmul.f32 %v4233_v46, %v4227_v49  ;;  %v540_v59 = vmul.f32 %v4234_v57, %v2914_v7  ;;  %v4235_v13 = vmov %v4234_v57  ;;  %v650_v17 = vmul.f32 %v4236_v26, %v4227_v49  ;;  %s3152_s16 = sld [smem:[#allocation3 + $0x35]] }
  0xcc   : > { %v541_v1 = vmul.f32 %v4235_v13, %v2917_v37  ;;  %v708_v21 = vmul.f32 %v4237_v14, %v4227_v49  ;;  %v711_v47 = vadd.f32 %v4238_v27, %v705_v38  ;;  %v769_v18 = vadd.f32 %v767_v15, %v763_v3  ;;  %s3162_s17 = sld [smem:[#allocation3 + $0x36]] }
  0xcd   : > { %v536_v60 = vadd.f32 %v534_v20, %v530_v19  ;;  %v384_v34 = vmul.f32 %v2080_v54, %v4229_v53  ;;  %v4239_v43 = vstv %s2642_s18  ;;  %v4241_v61 = vstv %s2658_s21  ;;  %s3029_s21 = sld [smem:[#allocation3 + $0x3a]] }
  0xce   : > { %v598_v44 = vmul.f32 %v4239_v43, %v2914_v7  ;;  %v4240_v2 = vmov %v4239_v43  ;;  %v656_v62 = vmul.f32 %v4241_v61, %v2914_v7  ;;  %v4242_v25 = vmov %v4241_v61  ;;  %s3169_s18 = sld [smem:[#allocation3 + $0x3d]] }
  0xcf   : > { %v599_v0 = vmul.f32 %v4240_v2, %v2917_v37  ;;  %v657_v22 = vmul.f32 %v4242_v25, %v2917_v37  ;;  %v827_v48 = vadd.f32 %v825_v10, %v821_v50  ;;  %v2961_v38 = vadd.f32 %v883_v12, %v879_v39  ;;  %s3171_s19 = sld [smem:[#allocation5 + $0x3]] }
  0xd0   : > { %v594_v15 = vadd.f32 %v592_v45, %v588_v11  ;;  %v4243_v19 = vstv %s2686_s1  ;;  %v2968_v20 = vadd.f32 %v540_v59, %v536_v60  ;;  %v2970_v54 = vadd.f32 %v541_v1, %v537_v41  ;;  %s2980_s1 = sld [smem:[#allocation3 + $0x32]] }
  0xd1   : > { %v766_v3 = vmul.f32 %v4243_v19, %v4227_v49  ;;  %v652_v30 = vadd.f32 %v650_v17, %v646_v4  ;;  %v710_v55 = vadd.f32 %v708_v21, %v704_v5  ;;  %v4244_v10 = vstv %s2676_s4  ;;  %s3002_s4 = sld [smem:[#allocation3 + $0x34]] }
  0xd2   : > { %v714_v12 = vmul.f32 %v4244_v10, %v2914_v7  ;;  %v4245_v11 = vmov %v4244_v10  ;;  %v472_v39 = vperm.slane %v384_v34, 1  ;;  %v473_v51 = vperm.slane %v384_v34, 5 }
  0xd3   : > { %v715_v50 = vmul.f32 %v4245_v11, %v2917_v37  ;;  %v2982_v46 = vadd.f32 %v598_v44, %v594_v15  ;;  %v2984_v41 = vadd.f32 %v599_v0, %v595_v56  ;;  %v2986_v45 = vadd.f32 %v656_v62, %v652_v30  ;;  %v467_v56 = vpop.permute.xlu2 %466  ;;  %v483_v0 = vpop.permute.xlu1 %482 }
  0xd4   : > { %v2988_v4 = vadd.f32 %v657_v22, %v653_v42  ;;  %v4246_v5 = vstv %s2694_s9  ;;  %v4248_v1 = vstv %s2701_s28  ;;  %v768_v17 = vadd.f32 %v766_v3, %v762_v9  ;;  %v481_v9 = vpop.permute.xlu0 %480  ;;  %s3103_s28 = sld [smem:[#allocation5]] }
  0xd5   : > { %v772_v57 = vmul.f32 %v4246_v5, %v2914_v7  ;;  %v4247_v59 = vmov %v4246_v5  ;;  %v824_v26 = vmul.f32 %v4248_v1, %v4227_v49  ;;  %v831_v42 = vmul.f32 %v829_v28, %v2917_v37  ;;  %s3109_s9 = sld [smem:[#allocation5 + $0x1]] }
  0xd6   : > { %v773_v13 = vmul.f32 %v4247_v59, %v2917_v37  ;;  %v487_v14 = vperm.slane %v4229_v53, 1  ;;  %v488_v21 = vperm.slane %v4229_v53, 5  ;;  %v3011_v27 = vadd.f32 %v714_v12, %v710_v55 }
  0xd7   : > { %v3013_v60 = vadd.f32 %v715_v50, %v711_v47  ;;  %v3015_v34 = vperm.slane %v472_v39, 1  ;;  %v3017_v43 = vperm.slane %v473_v51, 1  ;;  %v830_v44 = vmul.f32 %v829_v28, %v2914_v7 }
  0xd8   : > { %v469_v53 = vsel %vm468_vm5, %v465_v31, %v467_v56  ;;  %v470_v2 = vsel %vm468_vm5, %v467_v56, %v465_v31  ;;  %v3031_v47 = vadd.f32 %v772_v57, %v768_v17  ;;  %v3033_v61 = vadd.f32 %v773_v13, %v769_v18 }
  0xd9   : > { %v826_v28 = vadd.f32 %v824_v26, %v2919_v52  ;;  %v882_v62 = vmul.f32 %v881_v58, %v4227_v49  ;;  %v3039_v25 = vadd.f32 %v831_v42, %v827_v48  ;;  %v3044_v31 = vmul.f32 %v887_v32, %v2914_v7 }
  0xda   : > { %v3046_v22 = vperm.slane %v487_v14, 1  ;;  %v3048_v15 = vperm.slane %v488_v21, 1  ;;  %v3053_v52 = vmul.f32 %v3015_v34, %v469_v53  ;;  %v3056_v58 = vmul.f32 %v3017_v43, %v470_v2 }
  0xdb   : > { %v485_v18 = vsel %vm484_vm6, %v481_v9, %v483_v0  ;;  %v486_v48 = vsel %vm484_vm6, %v483_v0, %v481_v9  ;;  %v3064_v19 = vadd.f32 %v830_v44, %v826_v28  ;;  %v3069_v3 = vmul.f32 %v887_v32, %v2917_v37  ;;  %v4249_v32 = vld [vmem:[#allocation21_spill] sm:$0xff]  ;;  %v496_v42 = vpop.permute.xlu2 %495 }
  0xdc   : > { %v3074_v30 = vmul.f32 %v4151_v35, %v4227_v49  ;;  %v545_v55 = vstv %s2966_s6  ;;  %v3080_v10 = vadd.f32 %v882_v62, %v2925_v24  ;;  %v3085_v12 = vmul.f32 %v4150_v36, %v2914_v7  ;;  %v498_v9 = vpop.permute.xlu0 %497  ;;  %s3242_s6 = sld [smem:[#allocation3 + $0x46]] }
  0xdd   : > { %v502_v11 = vperm.slane %v4249_v32, 1  ;;  %v503_v50 = vperm.slane %v4249_v32, 5  ;;  %v603_v39 = vstv %s2972_s7  ;;  %v661_v49 = vstv %s2980_s1  ;;  %s3248_s7 = sld [smem:[#allocation3 + $0x47]] }
  0xde   : > { %v3092_v51 = vmul.f32 %v3046_v22, %v485_v18  ;;  %v3095_v5 = vmul.f32 %v3048_v15, %v486_v48  ;;  %v719_v24 = vstv %s2990_s8  ;;  %v546_v57 = vmul.f32 %v545_v55, %v3053_v52  ;;  %s4251_s1 = sld [smem:[#allocation13_spill]] }
  0xdf   : > { %v547_v7 = vmul.f32 %v545_v55, %v3056_v58  ;;  %v551_v59 = vstv %s3009_s29  ;;  %v777_v13 = vstv %s3002_s4  ;;  %v609_v1 = vstv %s3019_s30  ;;  %s3280_s8 = sld [smem:[#allocation5 + $0x6]] }
  0xe0   : > { %v667_v26 = vstv %s3029_s21  ;;  %v604_v56 = vmul.f32 %v603_v39, %v3053_v52  ;;  %v662_v17 = vmul.f32 %v661_v49, %v3053_v52  ;;  %v3113_v14 = vperm.slane %v502_v11, 1  ;;  %s3286_s4 = sld [smem:[#allocation5 + $0x7]] }
  0xe1   : > { %v3115_v21 = vperm.slane %v503_v50, 1  ;;  %v605_v44 = vmul.f32 %v603_v39, %v3056_v58  ;;  %v725_v53 = vstv %s3050_s24  ;;  %v552_v2 = vmul.f32 %v551_v59, %v3092_v51  ;;  %s980_s29 = sld [smem:[#allocation7]] }
  0xe2   : > { %v553_v0 = vmul.f32 %v551_v59, %v3095_v5  ;;  %v548_v28 = vadd.f32 %v546_v57, %v2968_v20  ;;  %v549_v62 = vadd.f32 %v547_v7, %v2970_v54  ;;  %v663_v18 = vmul.f32 %v661_v49, %v3056_v58  ;;  %s2159_s30 = sld [smem:[#allocation7 + $0x1]] }
  0xe3   : > { %v610_v48 = vmul.f32 %v609_v1, %v3092_v51  ;;  %v557_v55 = vstv %s3062_s10  ;;  %v615_v32 = vstv %s3077_s11  ;;  %v500_v11 = vsel %vm499_vm7, %v496_v42, %v498_v9  ;;  %s2160_s21 = sld [smem:[#allocation7 + $0x2]]  ;;  %s4256_s10 = smov 1  }
  0xe4   : > { %v501_v50 = vsel %vm499_vm7, %v498_v9, %v496_v42  ;;  %v606_v39 = vadd.f32 %v604_v56, %v2982_v46  ;;  %v664_v20 = vadd.f32 %v662_v17, %v2986_v45  ;;  %v3138_v54 = vmul.f32 %v3113_v14, %v500_v11  ;;  %s2161_s24 = sld [smem:[#allocation7 + $0x3]] }
  0xe5   : > { %v3141_v49 = vmul.f32 %v3115_v21, %v501_v50  ;;  %v554_v57 = vadd.f32 %v552_v2, %v548_v28  ;;  %v555_v7 = vadd.f32 %v553_v0, %v549_v62  ;;  %v668_v59 = vmul.f32 %v667_v26, %v3092_v51  ;;  %s2163_s11 = sld [smem:[#allocation7 + $0x5]] }
  0xe6   : > { %v673_v36 = vstv %s3097_s23  ;;  %v612_v46 = vadd.f32 %v610_v48, %v606_v39  ;;  %v558_v45 = vmul.f32 %v557_v55, %v3138_v54  ;;  %v616_v17 = vmul.f32 %v615_v32, %v3138_v54  ;;  %s2162_s23 = sld [smem:[#allocation7 + $0x4]] }
  0xe7   : > { %v559_v56 = vmul.f32 %v557_v55, %v3141_v49  ;;  %v611_v42 = vmul.f32 %v609_v1, %v3095_v5  ;;  %v669_v9 = vmul.f32 %v667_v26, %v3095_v5  ;;  %v563_v2 = vstv %s3103_s28  ;;  %s2164_s28 = sld [smem:[#allocation7 + $0x6]] }
  0xe8   : > { %v621_v0 = vstv %s3109_s9  ;;  %v560_v28 = vadd.f32 %v558_v45, %v554_v57  ;;  %v618_v48 = vadd.f32 %v616_v17, %v612_v46  ;;  %v674_v11 = vmul.f32 %v673_v36, %v3138_v54  ;;  %s2165_s9 = sld [smem:[#allocation7 + $0x7]] }
  0xe9   : > { %v561_v62 = vadd.f32 %v559_v56, %v555_v7  ;;  %v607_v50 = vadd.f32 %v605_v44, %v2984_v41  ;;  %v665_v55 = vadd.f32 %v663_v18, %v2988_v4  ;;  %v670_v39 = vadd.f32 %v668_v59, %v664_v20 }
  0xea   : > { %v675_v35 = vmul.f32 %v673_v36, %v3141_v49  ;;  %v564_v1 = vadd.f32 %v563_v2, %v560_v28  ;;  %v617_v57 = vmul.f32 %v615_v32, %v3141_v49  ;;  %v622_v7 = vadd.f32 %v621_v0, %v618_v48 }
  0xeb   : > { %v565_v26 = vadd.f32 %v563_v2, %v561_v62  ;;  %v721_v46 = vmul.f32 %v719_v24, %v3056_v58  ;;  %v783_v41 = vstv %s3125_s12  ;;  %v613_v36 = vadd.f32 %v611_v42, %v607_v50  ;;  %s3464_s12 = sld [smem:[#allocation7 + $0x8]] }
  0xec   : > { %v671_v4 = vadd.f32 %v669_v9, %v665_v55  ;;  %v3173_v44 = vmax.f32 %v564_v1, 0.0  ;;  %v3177_v32 = vmax.f32 %v622_v7, 0.0  ;;  %v676_v20 = vadd.f32 %v674_v11, %v670_v39 }
  0xed   : > { %v3175_v18 = vmax.f32 %v565_v26, 0.0  ;;  %v778_v59 = vmul.f32 %v777_v13, %v3053_v52  ;;  %v679_v45 = vstv %s3135_s13  ;;  %v731_v56 = vstv %s3145_s14  ;;  %s3468_s13 = sld [smem:[#allocation7 + $0x9]] }
  0xee   : > { %v677_v17 = vadd.f32 %v675_v35, %v671_v4  ;;  %v720_v42 = vmul.f32 %v719_v24, %v3053_v52  ;;  %v727_v9 = vmul.f32 %v725_v53, %v3095_v5  ;;  %v789_v2 = vstv %s3147_s15  ;;  %984 = vrot.lane.b32.xlu0 %v3177_v32, %s4250_s5  ;;  %974 = vrot.lane.b32.xlu1 %v3173_v44, %s4250_s5  ;;  %s2169_s14 = sld [smem:[#allocation7 + $0xb]] }
  0xef   : > { %v619_v28 = vadd.f32 %v617_v57, %v613_v36  ;;  %976 = vrot.lane.b32.xlu2 %v3175_v18, %s4250_s5  ;;  %v3199_v62 = vadd.f32 %v3069_v3, %v2961_v38  ;;  %v942_v35 = vadd.f32 %v3074_v30, %v2927_v40  ;;  %v835_v48 = vstv %s3152_s16  ;;  %s2168_s15 = sld [smem:[#allocation7 + $0xa]]  ;;  %s4257_s16 = smov 127  }
  0xf0   : > { %v784_v24 = vmul.f32 %v783_v41, %v3092_v51  ;;  %v723_v11 = vadd.f32 %v721_v46, %v3013_v60  ;;  %v726_v38 = vmul.f32 %v725_v53, %v3092_v51  ;;  %v680_v3 = vadd.f32 %v679_v45, %v676_v20 }
  0xf1   : > { %v733_v50 = vmul.f32 %v731_v56, %v3141_v49  ;;  %v3220_v40 = vadd.f32 %v3044_v31, %v3080_v10  ;;  %v780_v30 = vadd.f32 %v778_v59, %v3031_v47  ;;  %v681_v55 = vadd.f32 %v679_v45, %v677_v17 }
  0xf2   : > { %v790_v60 = vmul.f32 %v789_v2, %v3138_v54  ;;  %v722_v53 = vadd.f32 %v720_v42, %v3011_v27  ;;  %v729_v39 = vadd.f32 %v727_v9, %v723_v11  ;;  %v623_v1 = vadd.f32 %v621_v0, %v619_v28 }
  0xf3   : > { %v732_v26 = vmul.f32 %v731_v56, %v3138_v54  ;;  %v779_v57 = vmul.f32 %v777_v13, %v3056_v58  ;;  %v836_v31 = vmul.f32 %v835_v48, %v3053_v52  ;;  %v841_v47 = vstv %s3169_s18  ;;  %s2171_s18 = sld [smem:[#allocation7 + $0xd]] }
  0xf4   : > { %v786_v10 = vadd.f32 %v784_v24, %v780_v30  ;;  %v837_v7 = vmul.f32 %v835_v48, %v3056_v58  ;;  %v728_v46 = vadd.f32 %v726_v38, %v722_v53  ;;  %v3238_v27 = vmax.f32 %v680_v3, 0.0 }
  0xf5   : > { %v735_v0 = vadd.f32 %v733_v50, %v729_v39  ;;  %v737_v36 = vstv %s3171_s19  ;;  %v847_v4 = vstv %s3184_s20  ;;  %v3244_v13 = vmax.f32 %v681_v55, 0.0  ;;  %s2172_s19 = sld [smem:[#allocation7 + $0xe]] }
  0xf6   : > { %v792_v20 = vadd.f32 %v790_v60, %v786_v10  ;;  %v842_v59 = vmul.f32 %v841_v47, %v3092_v51  ;;  %v795_v45 = vstv %s3193_s22  ;;  %v3250_v56 = vmax.f32 %v623_v1, 0.0  ;;  %s2173_s20 = sld [smem:[#allocation7 + $0xf]] }
  0xf7   : > { %v734_v17 = vadd.f32 %v732_v26, %v728_v46  ;;  %994 = vrot.lane.b32.xlu2 %v3238_v27, %s4250_s5  ;;  %v948_v42 = vadd.f32 %v3085_v12, %v942_v35  ;;  %v893_v9 = vstv %s3162_s17  ;;  %v951_v28 = vstv %s3204_s26  ;;  %996 = vrot.lane.b32.xlu0 %v3244_v13, %s4250_s5  ;;  %s2170_s17 = sld [smem:[#allocation7 + $0xc]]  ;;  %s4262_s26 = smov 113  }
  0xf8   : > { %v843_v48 = vmul.f32 %v841_v47, %v3095_v5  ;;  %v838_v24 = vadd.f32 %v836_v31, %v3064_v19  ;;  %v785_v11 = vmul.f32 %v783_v41, %v3095_v5  ;;  %v739_v38 = vadd.f32 %v737_v36, %v735_v0  ;;  %986 = vrot.lane.b32.xlu1 %v3250_v56, %s4250_s5  ;;  %s3544_s22 = sld [smem:[#allocation7 + $0x11]] }
  0xf9   : > { %v848_v3 = vmul.f32 %v847_v4, %v3138_v54  ;;  %v839_v12 = vadd.f32 %v837_v7, %v3039_v25  ;;  %v899_v35 = vstv %s3223_s0  ;;  %v796_v50 = vadd.f32 %v795_v45, %v792_v20  ;;  %v2308_v20 = vld [vmem:[%s4251_s1 + $0x8] sm:$0xff]  ;;  %s2176_s0 = sld [smem:[#allocation7 + $0x12]] }
  0xfa   : > { %v849_v30 = vmul.f32 %v847_v4, %v3141_v49  ;;  %v781_v55 = vadd.f32 %v779_v57, %v3033_v61  ;;  %v844_v19 = vadd.f32 %v842_v59, %v838_v24  ;;  %v738_v60 = vadd.f32 %v737_v36, %v734_v17 }
  0xfb   : > { %v791_v41 = vmul.f32 %v789_v2, %v3141_v49  ;;  %v894_v53 = vmul.f32 %v893_v9, %v3053_v52  ;;  %v895_v39 = vmul.f32 %v893_v9, %v3056_v58  ;;  %v957_v1 = vstv %s3233_s2  ;;  %s2177_s2 = sld [smem:[#allocation7 + $0x13]] }
  0xfc   : > { %v845_v26 = vadd.f32 %v843_v48, %v839_v12  ;;  %v952_v25 = vmul.f32 %v951_v28, %v3053_v52  ;;  %v787_v31 = vadd.f32 %v785_v11, %v781_v55  ;;  %v3276_v47 = vmax.f32 %v739_v38, 0.0 }
  0xfd   : > { %v850_v10 = vadd.f32 %v848_v3, %v844_v19  ;;  %v853_v61 = vstv %s3236_s3  ;;  %v905_v57 = vstv %s3242_s6  ;;  %v3282_v7 = vmax.f32 %v796_v50, 0.0  ;;  %s3598_s3 = sld [smem:[#allocation7 + $0x14]] }
  0xfe   : > { %v851_v2 = vadd.f32 %v849_v30, %v845_v26  ;;  %v901_v46 = vmul.f32 %v899_v35, %v3095_v5  ;;  %v963_v0 = vstv %s3248_s7  ;;  %v3288_v52 = vmax.f32 %v738_v60, 0.0  ;;  %s2179_s6 = sld [smem:[#allocation7 + $0x15]] }
  0xff   : > { %v793_v36 = vadd.f32 %v791_v41, %v787_v31  ;;  %1006 = vrot.lane.b32.xlu2 %v3276_v47, %s4250_s5  ;;  %v937_v4 = vadd.f32 %v2911_v33, %v2862_v63  ;;  %v4252_v59 = vstv %s2836_s25  ;;  %v958_v9 = vmul.f32 %v957_v1, %v3092_v51  ;;  %1014 = vrot.lane.b32.xlu0 %v3282_v7, %s4250_s5  ;;  %s4254_s25 = smov 16   ;;  %s2181_s7 = sld [smem:[#allocation7 + $0x17]] }
 0x100   : > { %v941_v17 = vmul.f32 %v2308_v20, %v4252_v59  ;;  %v897_v48 = vadd.f32 %v895_v39, %v3199_v62  ;;  %v900_v24 = vmul.f32 %v899_v35, %v3092_v51  ;;  %v854_v11 = vadd.f32 %v853_v61, %v850_v10  ;;  %1004 = vrot.lane.b32.xlu1 %v3288_v52, %s4250_s5 }
 0x101   : > { %v907_v38 = vmul.f32 %v905_v57, %v3141_v49  ;;  %v4253_v63 = vstv %s2839_s27  ;;  %v954_v3 = vadd.f32 %v952_v25, %v948_v42  ;;  %v855_v12 = vadd.f32 %v853_v61, %v851_v2  ;;  %s4255_s27 = smov 15  }
 0x102   : > { %v947_v33 = vmul.f32 %v4253_v63, %v2917_v37  ;;  %v964_v50 = vmul.f32 %v963_v0, %v3138_v54  ;;  %v896_v30 = vadd.f32 %v894_v53, %v3220_v40  ;;  %v903_v62 = vadd.f32 %v901_v46, %v897_v48 }
 0x103   : > { %v797_v55 = vadd.f32 %v795_v45, %v793_v36  ;;  %v906_v51 = vmul.f32 %v905_v57, %v3138_v54  ;;  %v943_v35 = vadd.f32 %v941_v17, %v937_v4  ;;  %v960_v19 = vadd.f32 %v958_v9, %v954_v3 }
 0x104   : > { %v902_v60 = vadd.f32 %v900_v24, %v896_v30  ;;  %v3311_v41 = vmax.f32 %v854_v11, 0.0  ;;  %v909_v39 = vadd.f32 %v907_v38, %v903_v62  ;;  %v911_v31 = vstv %s3280_s8  ;;  %s2180_s8 = sld [smem:[#allocation7 + $0x16]] }
 0x105   : > { %v949_v26 = vadd.f32 %v947_v33, %v943_v35  ;;  %v3314_v37 = vmax.f32 %v855_v12, 0.0  ;;  %v966_v42 = vadd.f32 %v964_v50, %v960_v19  ;;  %v953_v25 = vmul.f32 %v951_v28, %v3056_v58 }
 0x106   : > { %v969_v10 = vstv %s3286_s4  ;;  %v3318_v61 = vmax.f32 %v797_v55, 0.0  ;;  %v908_v40 = vadd.f32 %v906_v51, %v902_v60  ;;  %v959_v54 = vmul.f32 %v957_v1, %v3095_v5  ;;  %s2182_s4 = sld [smem:[#allocation7 + $0x18]] }
 0x107   : > { %1024 = vrot.lane.b32.xlu2 %v3311_v41, %s4250_s5  ;;  %1026 = vrot.lane.b32.xlu0 %v3314_v37, %s4250_s5  ;;  %v913_v45 = vadd.f32 %v911_v31, %v909_v39  ;;  %v970_v53 = vadd.f32 %v969_v10, %v966_v42  ;;  %v955_v57 = vadd.f32 %v953_v25, %v949_v26  ;;  %v981_v63 = vstv %s980_s29  ;;  %s2185_s29 = sld [smem:[#allocation7 + $0x1b]] }
 0x108   : > { %1016 = vrot.lane.b32.xlu1 %v3318_v61, %s4250_s5  ;;  %v912_v2 = vadd.f32 %v911_v31, %v908_v40  ;;  %v965_v58 = vmul.f32 %v963_v0, %v3141_v49  ;;  %v991_v3 = vstv %s2159_s30  ;;  %v1001_v42 = vstv %s2160_s21  ;;  %s4263_s30 = smov 112   ;;  %s2187_s21 = sld [smem:[#allocation7 + $0x1d]] }
 0x109   : > { %v961_v28 = vadd.f32 %v959_v54, %v955_v57  ;;  %v3328_v46 = vmax.f32 %v913_v45, 0.0  ;;  %v3330_v36 = vmax.f32 %v970_v53, 0.0 }
 0x10a   : > { %v3332_v4 = vmax.f32 %v912_v2, 0.0 }
 0x10b   : > { %v967_v20 = vadd.f32 %v965_v58, %v961_v28 }
 0x10d   : > { %v971_v5 = vadd.f32 %v969_v10, %v967_v20  ;;  %v1011_v10 = vstv %s2161_s24  ;;  %s2186_s24 = sld [smem:[#allocation7 + $0x1c]] }
 0x10f   : > { %1036 = vrot.lane.b32.xlu2 %v3328_v46, %s4250_s5  ;;  %1044 = vrot.lane.b32.xlu0 %v3330_v36, %s4250_s5  ;;  %v3340_v1 = vmax.f32 %v971_v5, 0.0 }
 0x110   : > { %1034 = vrot.lane.b32.xlu1 %v3332_v4, %s4250_s5 }
 0x117   : > { %1070 = vrot.lane.b32.xlu2 %v3173_v44, %s4254_s25  ;;  %1072 = vrot.lane.b32.xlu0 %v3175_v18, %s4254_s25 }
 0x118   : > { %1046 = vrot.lane.b32.xlu1 %v3340_v1, %s4250_s5  ;;  %s3546_s5 = sld [smem:[#allocation7 + $0x10]] }
 0x11f   : > { %1082 = vrot.lane.b32.xlu2 %v3250_v56, %s4254_s25  ;;  %1090 = vrot.lane.b32.xlu0 %v3238_v27, %s4254_s25 }
 0x120   : > { %1080 = vrot.lane.b32.xlu1 %v3177_v32, %s4254_s25 }
 0x127   : > { %1100 = vrot.lane.b32.xlu2 %v3288_v52, %s4254_s25  ;;  %1102 = vrot.lane.b32.xlu0 %v3276_v47, %s4254_s25 }
 0x128   : > { %1092 = vrot.lane.b32.xlu1 %v3244_v13, %s4254_s25 }
 0x12f   : > { %1112 = vrot.lane.b32.xlu2 %v3318_v61, %s4254_s25  ;;  %1120 = vrot.lane.b32.xlu0 %v3311_v41, %s4254_s25 }
 0x130   : > { %1110 = vrot.lane.b32.xlu1 %v3282_v7, %s4254_s25 }
 0x137   : > { %1130 = vrot.lane.b32.xlu2 %v3332_v4, %s4254_s25  ;;  %1132 = vrot.lane.b32.xlu0 %v3328_v46, %s4254_s25 }
 0x138   : > { %1122 = vrot.lane.b32.xlu1 %v3314_v37, %s4254_s25 }
 0x13f   : > { %1142 = vrot.lane.b32.xlu2 %v3340_v1, %s4254_s25  ;;  %1166 = vrot.lane.b32.xlu0 %v3173_v44, %s4255_s27 }
 0x140   : > { %1140 = vrot.lane.b32.xlu1 %v3330_v36, %s4254_s25  ;;  %s2183_s25 = sld [smem:[#allocation7 + $0x19]] }
 0x147   : > { %1176 = vrot.lane.b32.xlu2 %v3177_v32, %s4255_s27  ;;  %1178 = vrot.lane.b32.xlu0 %v3250_v56, %s4255_s27 }
 0x148   : > { %1168 = vrot.lane.b32.xlu1 %v3175_v18, %s4255_s27 }
 0x149   : > { %v977_v49 = vpop.permute.xlu2 %976 }
 0x14f   : > { %1188 = vrot.lane.b32.xlu2 %v3244_v13, %s4255_s27  ;;  %1196 = vrot.lane.b32.xlu0 %v3288_v52, %s4255_s27 }
 0x150   : > { %1186 = vrot.lane.b32.xlu1 %v3238_v27, %s4255_s27 }
 0x151   : > { %v995_v0 = vpop.permute.xlu2 %994 }
 0x157   : > { %1206 = vrot.lane.b32.xlu2 %v3282_v7, %s4255_s27  ;;  %1208 = vrot.lane.b32.xlu0 %v3318_v61, %s4255_s27 }
 0x158   : > { %1198 = vrot.lane.b32.xlu1 %v3276_v47, %s4255_s27 }
 0x159   : > { %v1007_v59 = vpop.permute.xlu2 %1006 }
 0x15f   : > { %1218 = vrot.lane.b32.xlu2 %v3314_v37, %s4255_s27  ;;  %1226 = vrot.lane.b32.xlu0 %v3332_v4, %s4255_s27 }
 0x160   : > { %1216 = vrot.lane.b32.xlu1 %v3311_v41, %s4255_s27  ;;  %v985_v9 = vpop.permute.xlu0 %984  ;;  %v975_v48 = vpop.permute.xlu1 %974 }
 0x161   : > { %v1025_v17 = vpop.permute.xlu2 %1024  ;;  %v978_v24 = vsel %vm391_vm2, %v975_v48, %v977_v49  ;;  %v979_v11 = vsel %vm391_vm2, %v977_v49, %v975_v48  ;;  %v1021_v48 = vstv %s2162_s23  ;;  %s3717_s23 = sld [smem:[#allocation7 + $0x28]] }
 0x162   : > { %v982_v51 = vmul.f32 %v981_v63, %v979_v11  ;;  %v983_v35 = vmul.f32 %v981_v63, %v978_v24 }
 0x167   : > { %1236 = vrot.lane.b32.xlu2 %v3330_v36, %s4255_s27  ;;  %1238 = vrot.lane.b32.xlu0 %v3340_v1, %s4255_s27 }
 0x168   : > { %1228 = vrot.lane.b32.xlu1 %v3328_v46, %s4255_s27  ;;  %s2184_s27 = sld [smem:[#allocation7 + $0x1a]] }
 0x169   : > { %v3412_v38 = vpop.permute.xlu2 %1036  ;;  %v997_v33 = vpop.permute.xlu0 %996 }
 0x16a   : > { %v998_v12 = vsel %vm391_vm2, %v995_v0, %v997_v33  ;;  %v999_v50 = vsel %vm391_vm2, %v997_v33, %v995_v0  ;;  %v987_v30 = vpop.permute.xlu1 %986  ;;  %v1031_v0 = vstv %s2163_s11  ;;  %s2189_s11 = sld [smem:[#allocation7 + $0x1f]] }
 0x16b   : > { %v988_v62 = vsel %vm391_vm2, %v985_v9, %v987_v30  ;;  %v989_v55 = vsel %vm391_vm2, %v987_v30, %v985_v9  ;;  %v1002_v53 = vmul.f32 %v1001_v42, %v999_v50  ;;  %v1003_v57 = vmul.f32 %v1001_v42, %v998_v12 }
 0x16c   : > { %v992_v19 = vmul.f32 %v991_v3, %v989_v55  ;;  %v993_v60 = vmul.f32 %v991_v3, %v988_v62  ;;  %v1041_v42 = vstv %s2164_s28  ;;  %s3721_s28 = sld [smem:[#allocation7 + $0x29]] }
 0x16e   : > { %v1054_v39 = vadd.f32 %v992_v19, %v982_v51  ;;  %v1055_v26 = vadd.f32 %v993_v60, %v983_v35 }
 0x16f   : > { %1264 = vrot.lane.b32.xlu2 %v3175_v18, %s4256_s10  ;;  %1272 = vrot.lane.b32.xlu0 %v3177_v32, %s4256_s10 }
 0x170   : > { %1262 = vrot.lane.b32.xlu1 %v3173_v44, %s4256_s10 }
 0x171   : > { %v1071_v31 = vpop.permute.xlu2 %1070  ;;  %v1015_v25 = vpop.permute.xlu0 %1014 }
 0x172   : > { %v1005_v40 = vpop.permute.xlu1 %1004 }
 0x173   : > { %v1008_v54 = vsel %vm391_vm2, %v1005_v40, %v1007_v59  ;;  %v1009_v45 = vsel %vm391_vm2, %v1007_v59, %v1005_v40 }
 0x174   : > { %v1012_v2 = vmul.f32 %v1011_v10, %v1009_v45  ;;  %v1013_v58 = vmul.f32 %v1011_v10, %v1008_v54  ;;  %v1051_v10 = vstv %s2165_s9  ;;  %s3740_s9 = sld [smem:[#allocation7 + $0x2b]] }
 0x176   : > { %v1056_v28 = vadd.f32 %v1012_v2, %v1002_v53  ;;  %v1057_v20 = vadd.f32 %v1013_v58, %v1003_v57 }
 0x177   : > { %1282 = vrot.lane.b32.xlu2 %v3238_v27, %s4256_s10  ;;  %1284 = vrot.lane.b32.xlu0 %v3244_v13, %s4256_s10 }
 0x178   : > { %v1062_v5 = vadd.f32 %v1056_v28, %v1054_v39  ;;  %v1063_v49 = vadd.f32 %v1057_v20, %v1055_v26  ;;  %1274 = vrot.lane.b32.xlu1 %v3250_v56, %s4256_s10 }
 0x179   : > { %v1083_v9 = vpop.permute.xlu2 %1082  ;;  %v1027_v59 = vpop.permute.xlu0 %1026 }
 0x17a   : > { %v1028_v24 = vsel %vm391_vm2, %v1025_v17, %v1027_v59  ;;  %v1029_v11 = vsel %vm391_vm2, %v1027_v59, %v1025_v17  ;;  %v1017_v63 = vpop.permute.xlu1 %1016 }
 0x17b   : > { %v1032_v33 = vmul.f32 %v1031_v0, %v1029_v11  ;;  %v1033_v3 = vmul.f32 %v1031_v0, %v1028_v24  ;;  %v1018_v12 = vsel %vm391_vm2, %v1015_v25, %v1017_v63  ;;  %v1019_v50 = vsel %vm391_vm2, %v1017_v63, %v1015_v25 }
 0x17c   : > { %v1022_v30 = vmul.f32 %v1021_v48, %v1019_v50  ;;  %v1023_v62 = vmul.f32 %v1021_v48, %v1018_v12  ;;  %v1077_v24 = vstv %s3464_s12  ;;  %v1087_v63 = vstv %s3468_s13  ;;  %s3743_s12 = sld [smem:[#allocation7 + $0x2a]]  ;;  %s4266_s13 = smov 111  }
 0x17e   : > { %v1058_v55 = vadd.f32 %v1032_v33, %v1022_v30  ;;  %v1059_v51 = vadd.f32 %v1033_v3, %v1023_v62 }
 0x17f   : > { %1294 = vrot.lane.b32.xlu2 %v3276_v47, %s4256_s10  ;;  %1302 = vrot.lane.b32.xlu0 %v3282_v7, %s4256_s10 }
 0x180   : > { %1292 = vrot.lane.b32.xlu1 %v3288_v52, %s4256_s10 }
 0x181   : > { %v1101_v17 = vpop.permute.xlu2 %1100  ;;  %v1045_v35 = vpop.permute.xlu0 %1044 }
 0x182   : > { %v1035_v19 = vpop.permute.xlu1 %1034 }
 0x183   : > { %v1038_v60 = vsel %vm391_vm2, %v1035_v19, %v3412_v38  ;;  %v1039_v39 = vsel %vm391_vm2, %v3412_v38, %v1035_v19 }
 0x184   : > { %v1042_v57 = vmul.f32 %v1041_v42, %v1039_v39  ;;  %v1043_v2 = vmul.f32 %v1041_v42, %v1038_v60  ;;  %v1097_v42 = vstv %s2168_s15  ;;  %s2203_s15 = sld [smem:[#allocation7 + $0x2d]] }
 0x187   : > { %1312 = vrot.lane.b32.xlu2 %v3311_v41, %s4256_s10  ;;  %1314 = vrot.lane.b32.xlu0 %v3314_v37, %s4256_s10 }
 0x188   : > { %1304 = vrot.lane.b32.xlu1 %v3318_v61, %s4256_s10 }
 0x189   : > { %v3466_v26 = vpop.permute.xlu2 %1112  ;;  %v1073_v25 = vpop.permute.xlu0 %1072 }
 0x18a   : > { %v1074_v38 = vsel %vm407_vm1, %v1071_v31, %v1073_v25  ;;  %v1075_v40 = vsel %vm407_vm1, %v1073_v25, %v1071_v31  ;;  %v1047_v54 = vpop.permute.xlu1 %1046 }
 0x18b   : > { %v1048_v45 = vsel %vm391_vm2, %v1045_v35, %v1047_v54  ;;  %v1049_v53 = vsel %vm391_vm2, %v1047_v54, %v1045_v35  ;;  %v1078_v62 = vmul.f32 %v1077_v24, %v1075_v40 }
 0x18c   : > { %v1052_v58 = vmul.f32 %v1051_v10, %v1049_v53  ;;  %v1053_v28 = vmul.f32 %v1051_v10, %v1048_v45 }
 0x18e   : > { %v1060_v20 = vadd.f32 %v1052_v58, %v1042_v57  ;;  %v1061_v0 = vadd.f32 %v1053_v28, %v1043_v2 }
 0x18f   : > { %1324 = vrot.lane.b32.xlu2 %v3328_v46, %s4256_s10  ;;  %1332 = vrot.lane.b32.xlu0 %v3330_v36, %s4256_s10 }
 0x190   : > { %v1064_v31 = vadd.f32 %v1060_v20, %v1058_v55  ;;  %v1065_v59 = vadd.f32 %v1061_v0, %v1059_v51  ;;  %1322 = vrot.lane.b32.xlu1 %v3332_v4, %s4256_s10  ;;  %v1079_v55 = vmul.f32 %v1077_v24, %v1074_v38 }
 0x191   : > { %v1131_v48 = vpop.permute.xlu2 %1130  ;;  %v1091_v11 = vpop.permute.xlu0 %1090 }
 0x192   : > { %v3486_v33 = vadd.f32 %v1064_v31, %v1062_v5  ;;  %v3488_v3 = vadd.f32 %v1065_v59, %v1063_v49  ;;  %v1081_v12 = vpop.permute.xlu1 %1080  ;;  %v1107_v5 = vstv %s2169_s14  ;;  %s2202_s14 = sld [smem:[#allocation7 + $0x2c]] }
 0x193   : > { %v1084_v50 = vsel %vm407_vm1, %v1081_v12, %v1083_v9  ;;  %v1085_v30 = vsel %vm407_vm1, %v1083_v9, %v1081_v12 }
 0x194   : > { %v1088_v51 = vmul.f32 %v1087_v63, %v1085_v30  ;;  %v1089_v35 = vmul.f32 %v1087_v63, %v1084_v50  ;;  %v1117_v63 = vstv %s2170_s17  ;;  %v1127_v50 = vstv %s2171_s18  ;;  %s2205_s17 = sld [smem:[#allocation7 + $0x2f]] }
 0x195   : > { %s2207_s18 = sld [smem:[#allocation7 + $0x31]] }
 0x196   : > { %v1150_v19 = vadd.f32 %v1088_v51, %v1078_v62  ;;  %v1151_v60 = vadd.f32 %v1089_v35, %v1079_v55 }
 0x197   : > { %1404 = vrot.lane.b32.xlu2 %v3173_v44, %s4257_s16  ;;  %1406 = vrot.lane.b32.xlu0 %v3175_v18, %s4257_s16 }
 0x198   : > { %1334 = vrot.lane.b32.xlu1 %v3340_v1, %s4256_s10  ;;  %s2188_s10 = sld [smem:[#allocation7 + $0x1e]] }
 0x199   : > { %v1143_v49 = vpop.permute.xlu2 %1142  ;;  %v1103_v39 = vpop.permute.xlu0 %1102 }
 0x19a   : > { %v1104_v9 = vsel %vm407_vm1, %v1101_v17, %v1103_v39  ;;  %v1105_v25 = vsel %vm407_vm1, %v1103_v39, %v1101_v17  ;;  %v1093_v10 = vpop.permute.xlu1 %1092 }
 0x19b   : > { %v1108_v38 = vmul.f32 %v1107_v5, %v1105_v25  ;;  %v1109_v40 = vmul.f32 %v1107_v5, %v1104_v9  ;;  %v1094_v54 = vsel %vm407_vm1, %v1091_v11, %v1093_v10  ;;  %v1095_v45 = vsel %vm407_vm1, %v1093_v10, %v1091_v11 }
 0x19c   : > { %v1098_v53 = vmul.f32 %v1097_v42, %v1095_v45  ;;  %v1099_v57 = vmul.f32 %v1097_v42, %v1094_v54  ;;  %v1137_v9 = vstv %s2172_s19  ;;  %v1147_v10 = vstv %s2173_s20  ;;  %s2206_s19 = sld [smem:[#allocation7 + $0x30]] }
 0x19d   : > { %s2208_s20 = sld [smem:[#allocation7 + $0x32]] }
 0x19e   : > { %v1152_v2 = vadd.f32 %v1108_v38, %v1098_v53  ;;  %v1153_v58 = vadd.f32 %v1109_v40, %v1099_v57 }
 0x19f   : > { %1416 = vrot.lane.b32.xlu2 %v3250_v56, %s4257_s16  ;;  %1424 = vrot.lane.b32.xlu0 %v3238_v27, %s4257_s16 }
 0x1a0   : > { %v1158_v17 = vadd.f32 %v1152_v2, %v1150_v19  ;;  %v1159_v28 = vadd.f32 %v1153_v58, %v1151_v60  ;;  %1414 = vrot.lane.b32.xlu1 %v3177_v32, %s4257_s16 }
 0x1a1   : > { %v1177_v20 = vpop.permute.xlu2 %1176  ;;  %v1121_v0 = vpop.permute.xlu0 %1120 }
 0x1a2   : > { %v1111_v31 = vpop.permute.xlu1 %1110 }
 0x1a3   : > { %v1114_v59 = vsel %vm407_vm1, %v1111_v31, %v3466_v26  ;;  %v1115_v24 = vsel %vm407_vm1, %v3466_v26, %v1111_v31 }
 0x1a4   : > { %v1118_v35 = vmul.f32 %v1117_v63, %v1115_v24  ;;  %v1119_v19 = vmul.f32 %v1117_v63, %v1114_v59  ;;  %v1183_v24 = vstv %s3544_s22  ;;  %v4258_v63 = vld [vmem:[#allocation26_spill] sm:$0xff]  ;;  %s2209_s22 = sld [smem:[#allocation7 + $0x33]] }
 0x1a7   : > { %1434 = vrot.lane.b32.xlu2 %v3288_v52, %s4257_s16  ;;  %1436 = vrot.lane.b32.xlu0 %v3276_v47, %s4257_s16 }
 0x1a8   : > { %1426 = vrot.lane.b32.xlu1 %v3244_v13, %s4257_s16 }
 0x1a9   : > { %v3526_v11 = vpop.permute.xlu2 %1188  ;;  %v1133_v12 = vpop.permute.xlu0 %1132 }
 0x1aa   : > { %v1134_v30 = vsel %vm407_vm1, %v1131_v48, %v1133_v12  ;;  %v1135_v26 = vsel %vm407_vm1, %v1133_v12, %v1131_v48  ;;  %v1123_v62 = vpop.permute.xlu1 %1122  ;;  %v1068_v12 = vmul.f32 %v3486_v33, %v4258_v63 }
 0x1ab   : > { %v1124_v55 = vsel %vm407_vm1, %v1121_v0, %v1123_v62  ;;  %v1125_v51 = vsel %vm407_vm1, %v1123_v62, %v1121_v0  ;;  %v1138_v45 = vmul.f32 %v1137_v9, %v1135_v26  ;;  %v1139_v53 = vmul.f32 %v1137_v9, %v1134_v30 }
 0x1ac   : > { %v1128_v60 = vmul.f32 %v1127_v50, %v1125_v51  ;;  %v1129_v5 = vmul.f32 %v1127_v50, %v1124_v55  ;;  %v4259_v50 = vld [vmem:[#allocation27_spill] sm:$0xff]  ;;  %v1173_v62 = vstv %s3546_s5  ;;  %s2210_s5 = sld [smem:[#allocation7 + $0x34]] }
 0x1ad   : > { %v1069_v30 = vmul.f32 %v3488_v3, %v4259_v50  ;;  %v4260_v3 = vld [vmem:[#allocation24_spill] sm:$0xff] }
 0x1ae   : > { %v1154_v39 = vadd.f32 %v1128_v60, %v1118_v35  ;;  %v1155_v42 = vadd.f32 %v1129_v5, %v1119_v19 }
 0x1af   : > { %1446 = vrot.lane.b32.xlu2 %v3318_v61, %s4257_s16  ;;  %1454 = vrot.lane.b32.xlu0 %v3311_v41, %s4257_s16 }
 0x1b0   : > { %1444 = vrot.lane.b32.xlu1 %v3282_v7, %s4257_s16 }
 0x1b1   : > { %v3542_v48 = vpop.permute.xlu2 %1206  ;;  %v1167_v25 = vpop.permute.xlu0 %1166 }
 0x1b2   : > { %v1141_v38 = vpop.permute.xlu1 %1140 }
 0x1b3   : > { %v1144_v40 = vsel %vm407_vm1, %v1141_v38, %v1143_v49  ;;  %v1145_v54 = vsel %vm407_vm1, %v1143_v49, %v1141_v38 }
 0x1b4   : > { %v1148_v57 = vmul.f32 %v1147_v10, %v1145_v54  ;;  %v1149_v2 = vmul.f32 %v1147_v10, %v1144_v40  ;;  %v4261_v10 = vld [vmem:[#allocation25_spill] sm:$0xff] }
 0x1b6   : > { %v1156_v58 = vadd.f32 %v1148_v57, %v1138_v45  ;;  %v1157_v0 = vadd.f32 %v1149_v2, %v1139_v53 }
 0x1b7   : > { %1464 = vrot.lane.b32.xlu2 %v3332_v4, %s4257_s16  ;;  %1466 = vrot.lane.b32.xlu0 %v3328_v46, %s4257_s16 }
 0x1b8   : > { %v1160_v31 = vadd.f32 %v1156_v58, %v1154_v39  ;;  %v1161_v59 = vadd.f32 %v1157_v0, %v1155_v42  ;;  %1456 = vrot.lane.b32.xlu1 %v3314_v37, %s4257_s16 }
 0x1b9   : > { %v3559_v49 = vpop.permute.xlu2 %1218  ;;  %v1179_v26 = vpop.permute.xlu0 %1178 }
 0x1ba   : > { %v1162_v55 = vadd.f32 %v1160_v31, %v1158_v17  ;;  %v1163_v51 = vadd.f32 %v1161_v59, %v1159_v28  ;;  %v1180_v35 = vsel %vm422_vm0, %v1177_v20, %v1179_v26  ;;  %v1181_v19 = vsel %vm422_vm0, %v1179_v26, %v1177_v20  ;;  %v1169_v60 = vpop.permute.xlu1 %1168 }
 0x1bb   : > { %v1184_v5 = vmul.f32 %v1183_v24, %v1181_v19  ;;  %v1185_v39 = vmul.f32 %v1183_v24, %v1180_v35  ;;  %v1170_v42 = vsel %vm422_vm0, %v1167_v25, %v1169_v60  ;;  %v1171_v33 = vsel %vm422_vm0, %v1169_v60, %v1167_v25 }
 0x1bc   : > { %v1164_v9 = vmul.f32 %v1162_v55, %v4260_v3  ;;  %v1165_v17 = vmul.f32 %v1163_v51, %v4261_v10  ;;  %v1174_v28 = vmul.f32 %v1173_v62, %v1171_v33  ;;  %v1175_v38 = vmul.f32 %v1173_v62, %v1170_v42 }
 0x1bd   : > { %v1193_v31 = vstv %s2176_s0  ;;  %v1203_v24 = vstv %s2177_s2  ;;  %v1223_v33 = vstv %s2179_s6  ;;  %s2213_s0 = sld [smem:[#allocation7 + $0x37]] }
 0x1be   : > { %v3576_v40 = vadd.f32 %v1164_v9, %v1068_v12  ;;  %v3578_v54 = vadd.f32 %v1165_v17, %v1069_v30  ;;  %v1246_v20 = vadd.f32 %v1184_v5, %v1174_v28  ;;  %v1247_v45 = vadd.f32 %v1185_v39, %v1175_v38  ;;  %s2212_s2 = sld [smem:[#allocation7 + $0x36]] }
 0x1bf   : > { %1476 = vrot.lane.b32.xlu2 %v3340_v1, %s4257_s16  ;;  %1500 = vrot.lane.b32.xlu0 %v3173_v44, %s4262_s26  ;;  %v1213_v39 = vstv %s3598_s3  ;;  %s2214_s3 = sld [smem:[#allocation7 + $0x38]] }
 0x1c0   : > { %1474 = vrot.lane.b32.xlu1 %v3330_v36, %s4257_s16  ;;  %s2204_s16 = sld [smem:[#allocation7 + $0x2e]] }
 0x1c1   : > { %v1237_v25 = vpop.permute.xlu2 %1236  ;;  %v1197_v53 = vpop.permute.xlu0 %1196  ;;  %s2215_s6 = sld [smem:[#allocation7 + $0x39]] }
 0x1c2   : > { %v1187_v57 = vpop.permute.xlu1 %1186 }
 0x1c3   : > { %v1190_v2 = vsel %vm422_vm0, %v1187_v57, %v3526_v11  ;;  %v1191_v58 = vsel %vm422_vm0, %v3526_v11, %v1187_v57  ;;  %v1243_v57 = vstv %s2181_s7  ;;  %s2216_s7 = sld [smem:[#allocation7 + $0x3a]] }
 0x1c4   : > { %v1194_v26 = vmul.f32 %v1193_v31, %v1191_v58  ;;  %v1195_v62 = vmul.f32 %v1193_v31, %v1190_v2  ;;  %v1233_v31 = vstv %s2180_s8  ;;  %s2217_s8 = sld [smem:[#allocation7 + $0x3b]] }
 0x1c7   : > { %1510 = vrot.lane.b32.xlu2 %v3177_v32, %s4262_s26  ;;  %1512 = vrot.lane.b32.xlu0 %v3250_v56, %s4262_s26 }
 0x1c8   : > { %1502 = vrot.lane.b32.xlu1 %v3175_v18, %s4262_s26 }
 0x1c9   : > { %v3600_v0 = vpop.permute.xlu2 %1264  ;;  %v1209_v59 = vpop.permute.xlu0 %1208 }
 0x1ca   : > { %v1210_v11 = vsel %vm422_vm0, %v3542_v48, %v1209_v59  ;;  %v1211_v63 = vsel %vm422_vm0, %v1209_v59, %v3542_v48  ;;  %v1199_v12 = vpop.permute.xlu1 %1198 }
 0x1cb   : > { %v1200_v50 = vsel %vm422_vm0, %v1197_v53, %v1199_v12  ;;  %v1201_v30 = vsel %vm422_vm0, %v1199_v12, %v1197_v53  ;;  %v1214_v17 = vmul.f32 %v1213_v39, %v1211_v63  ;;  %v1215_v28 = vmul.f32 %v1213_v39, %v1210_v11 }
 0x1cc   : > { %v1204_v55 = vmul.f32 %v1203_v24, %v1201_v30  ;;  %v1205_v51 = vmul.f32 %v1203_v24, %v1200_v50 }
 0x1ce   : > { %v1248_v35 = vadd.f32 %v1204_v55, %v1194_v26  ;;  %v1249_v19 = vadd.f32 %v1205_v51, %v1195_v62 }
 0x1cf   : > { %1522 = vrot.lane.b32.xlu2 %v3244_v13, %s4262_s26  ;;  %1530 = vrot.lane.b32.xlu0 %v3288_v52, %s4262_s26 }
 0x1d0   : > { %v1254_v48 = vadd.f32 %v1248_v35, %v1246_v20  ;;  %v1255_v60 = vadd.f32 %v1249_v19, %v1247_v45  ;;  %1520 = vrot.lane.b32.xlu1 %v3238_v27, %s4262_s26 }
 0x1d1   : > { %v1283_v5 = vpop.permute.xlu2 %1282  ;;  %v1227_v42 = vpop.permute.xlu0 %1226 }
 0x1d2   : > { %v1217_v3 = vpop.permute.xlu1 %1216 }
 0x1d3   : > { %v1220_v9 = vsel %vm422_vm0, %v1217_v3, %v3559_v49  ;;  %v1221_v10 = vsel %vm422_vm0, %v3559_v49, %v1217_v3 }
 0x1d4   : > { %v1224_v38 = vmul.f32 %v1223_v33, %v1221_v10  ;;  %v1225_v20 = vmul.f32 %v1223_v33, %v1220_v9 }
 0x1d6   : > { %v1250_v45 = vadd.f32 %v1224_v38, %v1214_v17  ;;  %v1251_v53 = vadd.f32 %v1225_v20, %v1215_v28  ;;  %v1279_v17 = vstv %s2183_s25  ;;  %s3891_s25 = sld [smem:[#allocation7 + $0x21]] }
 0x1d7   : > { %1540 = vrot.lane.b32.xlu2 %v3282_v7, %s4262_s26  ;;  %1542 = vrot.lane.b32.xlu0 %v3318_v61, %s4262_s26 }
 0x1d8   : > { %1532 = vrot.lane.b32.xlu1 %v3276_v47, %s4262_s26 }
 0x1d9   : > { %v1295_v2 = vpop.permute.xlu2 %1294  ;;  %v1239_v58 = vpop.permute.xlu0 %1238 }
 0x1da   : > { %v1240_v49 = vsel %vm422_vm0, %v1237_v25, %v1239_v58  ;;  %v1241_v59 = vsel %vm422_vm0, %v1239_v58, %v1237_v25  ;;  %v1229_v24 = vpop.permute.xlu1 %1228 }
 0x1db   : > { %v1244_v11 = vmul.f32 %v1243_v57, %v1241_v59  ;;  %v1245_v63 = vmul.f32 %v1243_v57, %v1240_v49  ;;  %v1230_v12 = vsel %vm422_vm0, %v1227_v42, %v1229_v24  ;;  %v1231_v50 = vsel %vm422_vm0, %v1229_v24, %v1227_v42 }
 0x1dc   : > { %v1234_v30 = vmul.f32 %v1233_v31, %v1231_v50  ;;  %v1235_v26 = vmul.f32 %v1233_v31, %v1230_v12  ;;  %v1289_v24 = vstv %s2184_s27  ;;  %s3897_s27 = sld [smem:[#allocation7 + $0x22]] }
 0x1de   : > { %v1252_v62 = vadd.f32 %v1244_v11, %v1234_v30  ;;  %v1253_v55 = vadd.f32 %v1245_v63, %v1235_v26  ;;  %v1299_v63 = vstv %s2185_s29  ;;  %s3899_s29 = sld [smem:[#allocation7 + $0x23]] }
 0x1df   : > { %1552 = vrot.lane.b32.xlu2 %v3314_v37, %s4262_s26  ;;  %1560 = vrot.lane.b32.xlu0 %v3332_v4, %s4262_s26 }
 0x1e0   : > { %v1256_v25 = vadd.f32 %v1252_v62, %v1250_v45  ;;  %v1257_v51 = vadd.f32 %v1253_v55, %v1251_v53  ;;  %1550 = vrot.lane.b32.xlu1 %v3311_v41, %s4262_s26 }
 0x1e1   : > { %v1313_v35 = vpop.permute.xlu2 %1312  ;;  %v1273_v19 = vpop.permute.xlu0 %1272 }
 0x1e2   : > { %v3645_v39 = vadd.f32 %v1256_v25, %v1254_v48  ;;  %v3647_v42 = vadd.f32 %v1257_v51, %v1255_v60  ;;  %v1263_v33 = vpop.permute.xlu1 %1262  ;;  %v1269_v60 = vstv %s2182_s4  ;;  %s3889_s4 = sld [smem:[#allocation7 + $0x20]] }
 0x1e3   : > { %v1266_v3 = vsel %vm438_vm3, %v1263_v33, %v3600_v0  ;;  %v1267_v9 = vsel %vm438_vm3, %v3600_v0, %v1263_v33 }
 0x1e4   : > { %v1270_v53 = vmul.f32 %v1269_v60, %v1267_v9  ;;  %v1271_v57 = vmul.f32 %v1269_v60, %v1266_v3  ;;  %v1319_v9 = vstv %s2187_s21  ;;  %s3903_s21 = sld [smem:[#allocation7 + $0x25]] }
 0x1e7   : > { %1570 = vrot.lane.b32.xlu2 %v3330_v36, %s4262_s26  ;;  %1572 = vrot.lane.b32.xlu0 %v3340_v1, %s4262_s26 }
 0x1e8   : > { %1562 = vrot.lane.b32.xlu1 %v3328_v46, %s4262_s26  ;;  %s2211_s26 = sld [smem:[#allocation7 + $0x35]] }
 0x1e9   : > { %v3661_v48 = vpop.permute.xlu2 %1324  ;;  %v1285_v10 = vpop.permute.xlu0 %1284 }
 0x1ea   : > { %v1286_v28 = vsel %vm438_vm3, %v1283_v5, %v1285_v10  ;;  %v1287_v0 = vsel %vm438_vm3, %v1285_v10, %v1283_v5  ;;  %v1275_v38 = vpop.permute.xlu1 %1274  ;;  %v1309_v10 = vstv %s2186_s24  ;;  %s3905_s24 = sld [smem:[#allocation7 + $0x26]] }
 0x1eb   : > { %v1276_v20 = vsel %vm438_vm3, %v1273_v19, %v1275_v38  ;;  %v1277_v45 = vsel %vm438_vm3, %v1275_v38, %v1273_v19  ;;  %v1290_v26 = vmul.f32 %v1289_v24, %v1287_v0  ;;  %v1291_v62 = vmul.f32 %v1289_v24, %v1286_v28 }
 0x1ec   : > { %v1280_v58 = vmul.f32 %v1279_v17, %v1277_v45  ;;  %v1281_v31 = vmul.f32 %v1279_v17, %v1276_v20 }
 0x1ee   : > { %v1342_v49 = vadd.f32 %v1280_v58, %v1270_v53  ;;  %v1343_v59 = vadd.f32 %v1281_v31, %v1271_v57 }
 0x1ef   : > { %1598 = vrot.lane.b32.xlu2 %v3175_v18, %s4263_s30  ;;  %1606 = vrot.lane.b32.xlu0 %v3177_v32, %s4263_s30 }
 0x1f0   : > { %1596 = vrot.lane.b32.xlu1 %v3173_v44, %s4263_s30 }
 0x1f1   : > { %v1405_v5 = vpop.permute.xlu2 %1404  ;;  %v1303_v11 = vpop.permute.xlu0 %1302 }
 0x1f2   : > { %v1293_v12 = vpop.permute.xlu1 %1292 }
 0x1f3   : > { %v1296_v50 = vsel %vm438_vm3, %v1293_v12, %v1295_v2  ;;  %v1297_v30 = vsel %vm438_vm3, %v1295_v2, %v1293_v12 }
 0x1f4   : > { %v1300_v55 = vmul.f32 %v1299_v63, %v1297_v30  ;;  %v1301_v25 = vmul.f32 %v1299_v63, %v1296_v50  ;;  %v1329_v50 = vstv %s2188_s10  ;;  %s3911_s10 = sld [smem:[#allocation7 + $0x27]] }
 0x1f6   : > { %v1344_v51 = vadd.f32 %v1300_v55, %v1290_v26  ;;  %v1345_v19 = vadd.f32 %v1301_v25, %v1291_v62  ;;  %v1339_v26 = vstv %s2189_s11  ;;  %s3913_s11 = sld [smem:[#allocation7 + $0x3d]] }
 0x1f7   : > { %1616 = vrot.lane.b32.xlu2 %v3238_v27, %s4263_s30  ;;  %1618 = vrot.lane.b32.xlu0 %v3244_v13, %s4263_s30 }
 0x1f8   : > { %v1350_v33 = vadd.f32 %v1344_v51, %v1342_v49  ;;  %v1351_v3 = vadd.f32 %v1345_v19, %v1343_v59  ;;  %1608 = vrot.lane.b32.xlu1 %v3250_v56, %s4263_s30 }
 0x1f9   : > { %v3687_v60 = vpop.permute.xlu2 %1416  ;;  %v1315_v2 = vpop.permute.xlu0 %1314 }
 0x1fa   : > { %v1316_v17 = vsel %vm438_vm3, %v1313_v35, %v1315_v2  ;;  %v1317_v28 = vsel %vm438_vm3, %v1315_v2, %v1313_v35  ;;  %v1305_v0 = vpop.permute.xlu1 %1304 }
 0x1fb   : > { %v1320_v38 = vmul.f32 %v1319_v9, %v1317_v28  ;;  %v1321_v20 = vmul.f32 %v1319_v9, %v1316_v17  ;;  %v1306_v45 = vsel %vm438_vm3, %v1303_v11, %v1305_v0  ;;  %v1307_v53 = vsel %vm438_vm3, %v1305_v0, %v1303_v11 }
 0x1fc   : > { %v1310_v57 = vmul.f32 %v1309_v10, %v1307_v53  ;;  %v1311_v58 = vmul.f32 %v1309_v10, %v1306_v45  ;;  %v1421_v53 = vstv %s3721_s28  ;;  %s3925_s28 = sld [smem:[#allocation7 + $0x3e]] }
 0x1fe   : > { %v1346_v31 = vadd.f32 %v1320_v38, %v1310_v57  ;;  %v1347_v49 = vadd.f32 %v1321_v20, %v1311_v58  ;;  %v4264_v57 = vld [vmem:[#allocation22_spill] sm:$0xff] }
 0x1ff   : > { %1628 = vrot.lane.b32.xlu2 %v3276_v47, %s4263_s30  ;;  %1636 = vrot.lane.b32.xlu0 %v3282_v7, %s4263_s30  ;;  %v1260_v58 = vmul.f32 %v3645_v39, %v4264_v57 }
 0x200   : > { %1626 = vrot.lane.b32.xlu1 %v3288_v52, %s4263_s30 }
 0x201   : > { %v3703_v35 = vpop.permute.xlu2 %1434  ;;  %v1333_v59 = vpop.permute.xlu0 %1332 }
 0x202   : > { %v1323_v24 = vpop.permute.xlu1 %1322 }
 0x203   : > { %v1326_v11 = vsel %vm438_vm3, %v1323_v24, %v3661_v48  ;;  %v1327_v63 = vsel %vm438_vm3, %v3661_v48, %v1323_v24 }
 0x204   : > { %v1330_v19 = vmul.f32 %v1329_v50, %v1327_v63  ;;  %v1331_v9 = vmul.f32 %v1329_v50, %v1326_v11 }
 0x207   : > { %1646 = vrot.lane.b32.xlu2 %v3311_v41, %s4263_s30  ;;  %1648 = vrot.lane.b32.xlu0 %v3314_v37, %s4263_s30 }
 0x208   : > { %1638 = vrot.lane.b32.xlu1 %v3318_v61, %s4263_s30 }
 0x209   : > { %v3719_v12 = vpop.permute.xlu2 %1446  ;;  %v1407_v30 = vpop.permute.xlu0 %1406 }
 0x20a   : > { %v1408_v48 = vsel %vm453_vm4, %v1405_v5, %v1407_v30  ;;  %v1409_v62 = vsel %vm453_vm4, %v1407_v30, %v1405_v5  ;;  %v1335_v55 = vpop.permute.xlu1 %1334  ;;  %v1411_v5 = vstv %s3717_s23  ;;  %s3917_s23 = sld [smem:[#allocation7 + $0x3c]] }
 0x20b   : > { %v1336_v25 = vsel %vm438_vm3, %v1333_v59, %v1335_v55  ;;  %v1337_v51 = vsel %vm438_vm3, %v1335_v55, %v1333_v59  ;;  %v4265_v59 = vld [vmem:[#allocation23_spill] sm:$0xff]  ;;  %v1412_v63 = vmul.f32 %v1411_v5, %v1408_v48  ;;  %v1413_v50 = vmul.f32 %v1411_v5, %v1409_v62 }
 0x20c   : > { %v1340_v2 = vmul.f32 %v1339_v26, %v1337_v51  ;;  %v1341_v10 = vmul.f32 %v1339_v26, %v1336_v25  ;;  %v1261_v24 = vmul.f32 %v3647_v42, %v4265_v59 }
 0x20e   : > { %v1348_v17 = vadd.f32 %v1340_v2, %v1330_v19  ;;  %v1349_v28 = vadd.f32 %v1341_v10, %v1331_v9  ;;  %v1431_v9 = vstv %s3743_s12  ;;  %s3993_s12 = sld [smem:[#allocation7 + $0x40]] }
 0x20f   : > { %1658 = vrot.lane.b32.xlu2 %v3328_v46, %s4263_s30  ;;  %1666 = vrot.lane.b32.xlu0 %v3330_v36, %s4263_s30 }
 0x210   : > { %v1352_v0 = vadd.f32 %v1348_v17, %v1346_v31  ;;  %v1353_v38 = vadd.f32 %v1349_v28, %v1347_v49  ;;  %1656 = vrot.lane.b32.xlu1 %v3332_v4, %s4263_s30 }
 0x211   : > { %v3738_v20 = vpop.permute.xlu2 %1464  ;;  %v1425_v45 = vpop.permute.xlu0 %1424 }
 0x212   : > { %v1354_v11 = vadd.f32 %v1352_v0, %v1350_v33  ;;  %v1355_v31 = vadd.f32 %v1353_v38, %v1351_v3  ;;  %v1415_v49 = vpop.permute.xlu1 %1414 }
 0x213   : > { %v1418_v30 = vsel %vm453_vm4, %v1415_v49, %v3687_v60  ;;  %v1419_v26 = vsel %vm453_vm4, %v3687_v60, %v1415_v49 }
 0x214   : > { %v1356_v55 = vmul.f32 %v1354_v11, %v2696_v16  ;;  %v1357_v39 = vmul.f32 %v1355_v31, %v2706_v23  ;;  %v1422_v42 = vmul.f32 %v1421_v53, %v1418_v30  ;;  %v1423_v33 = vmul.f32 %v1421_v53, %v1419_v26 }
 0x215   : > { %v1441_v23 = vstv %s3740_s9  ;;  %v1461_v30 = vstv %s2203_s15  ;;  %s3931_s9 = sld [smem:[#allocation7 + $0x3f]] }
 0x216   : > { %v1790_v3 = vadd.f32 %v1356_v55, %v1260_v58  ;;  %v1791_v25 = vadd.f32 %v1357_v39, %v1261_v24  ;;  %v1484_v48 = vadd.f32 %v1422_v42, %v1412_v63  ;;  %v1485_v62 = vadd.f32 %v1423_v33, %v1413_v50  ;;  %s3995_s15 = sld [smem:[#allocation7 + $0x41]] }
 0x217   : > { %1692 = vrot.lane.b32.xlu2 %v3173_v44, %s4266_s13  ;;  %1694 = vrot.lane.b32.xlu0 %v3175_v18, %s4266_s13  ;;  %v1451_v63 = vstv %s2202_s14  ;;  %s2224_s14 = sld [smem:[#allocation7 + $0x42]] }
 0x218   : > { %v3762_v51 = vadd.f32 %v1790_v3, %v3576_v40  ;;  %v3765_v16 = vadd.f32 %v1791_v25, %v3578_v54  ;;  %1668 = vrot.lane.b32.xlu1 %v3340_v1, %s4263_s30  ;;  %s3901_s30 = sld [smem:[#allocation7 + $0x24]] }
 0x219   : > { %v1477_v60 = vpop.permute.xlu2 %1476  ;;  %v1437_v19 = vpop.permute.xlu0 %1436 }
 0x21a   : > { %v1438_v2 = vsel %vm453_vm4, %v3703_v35, %v1437_v19  ;;  %v1439_v10 = vsel %vm453_vm4, %v1437_v19, %v3703_v35  ;;  %v1427_v40 = vpop.permute.xlu1 %1426  ;;  %v1471_v19 = vstv %s2204_s16  ;;  %s3997_s16 = sld [smem:[#allocation7 + $0x44]] }
 0x21b   : > { %v1442_v17 = vmul.f32 %v1441_v23, %v1438_v2  ;;  %v1443_v28 = vmul.f32 %v1441_v23, %v1439_v10  ;;  %v1428_v54 = vsel %vm453_vm4, %v1425_v45, %v1427_v40  ;;  %v1429_v5 = vsel %vm453_vm4, %v1427_v40, %v1425_v45 }
 0x21c   : > { %v1432_v0 = vmul.f32 %v1431_v9, %v1428_v54  ;;  %v1433_v38 = vmul.f32 %v1431_v9, %v1429_v5  ;;  %v1481_v2 = vstv %s2205_s17  ;;  %s3999_s17 = sld [smem:[#allocation7 + $0x46]] }
 0x21e   : > { %v1486_v53 = vadd.f32 %v1442_v17, %v1432_v0  ;;  %v1487_v57 = vadd.f32 %v1443_v28, %v1433_v38 }
 0x21f   : > { %1704 = vrot.lane.b32.xlu2 %v3250_v56, %s4266_s13  ;;  %1712 = vrot.lane.b32.xlu0 %v3238_v27, %s4266_s13 }
 0x220   : > { %v1492_v35 = vadd.f32 %v1486_v53, %v1484_v48  ;;  %v1493_v58 = vadd.f32 %v1487_v57, %v1485_v62  ;;  %1702 = vrot.lane.b32.xlu1 %v3177_v32, %s4266_s13 }
 0x221   : > { %v1511_v59 = vpop.permute.xlu2 %1510  ;;  %v1455_v24 = vpop.permute.xlu0 %1454 }
 0x222   : > { %v1445_v45 = vpop.permute.xlu1 %1444 }
 0x223   : > { %v1448_v11 = vsel %vm453_vm4, %v1445_v45, %v3719_v12  ;;  %v1449_v31 = vsel %vm453_vm4, %v3719_v12, %v1445_v45  ;;  %v1517_v45 = vstv %s2207_s18  ;;  %s4001_s18 = sld [smem:[#allocation7 + $0x45]] }
 0x224   : > { %v1452_v33 = vmul.f32 %v1451_v63, %v1448_v11  ;;  %v1453_v3 = vmul.f32 %v1451_v63, %v1449_v31 }
 0x227   : > { %1722 = vrot.lane.b32.xlu2 %v3288_v52, %s4266_s13  ;;  %1724 = vrot.lane.b32.xlu0 %v3276_v47, %s4266_s13 }
 0x228   : > { %1714 = vrot.lane.b32.xlu1 %v3244_v13, %s4266_s13 }
 0x229   : > { %v3799_v49 = vpop.permute.xlu2 %1522  ;;  %v1467_v50 = vpop.permute.xlu0 %1466 }
 0x22a   : > { %v1468_v12 = vsel %vm453_vm4, %v3738_v20, %v1467_v50  ;;  %v1469_v26 = vsel %vm453_vm4, %v1467_v50, %v3738_v20  ;;  %v1457_v55 = vpop.permute.xlu1 %1456 }
 0x22b   : > { %v1458_v39 = vsel %vm453_vm4, %v1455_v24, %v1457_v55  ;;  %v1459_v42 = vsel %vm453_vm4, %v1457_v55, %v1455_v24  ;;  %v1472_v28 = vmul.f32 %v1471_v19, %v1468_v12  ;;  %v1473_v54 = vmul.f32 %v1471_v19, %v1469_v26 }
 0x22c   : > { %v1462_v25 = vmul.f32 %v1461_v30, %v1458_v39  ;;  %v1463_v48 = vmul.f32 %v1461_v30, %v1459_v42 }
 0x22e   : > { %v1488_v62 = vadd.f32 %v1462_v25, %v1452_v33  ;;  %v1489_v23 = vadd.f32 %v1463_v48, %v1453_v3 }
 0x22f   : > { %1734 = vrot.lane.b32.xlu2 %v3318_v61, %s4266_s13  ;;  %1742 = vrot.lane.b32.xlu0 %v3311_v41, %s4266_s13 }
 0x230   : > { %1732 = vrot.lane.b32.xlu1 %v3282_v7, %s4266_s13 }
 0x231   : > { %v1541_v20 = vpop.permute.xlu2 %1540  ;;  %v1501_v9 = vpop.permute.xlu0 %1500 }
 0x232   : > { %v1475_v10 = vpop.permute.xlu1 %1474 }
 0x233   : > { %v1478_v40 = vsel %vm453_vm4, %v1475_v10, %v1477_v60  ;;  %v1479_v17 = vsel %vm453_vm4, %v1477_v60, %v1475_v10  ;;  %v1507_v60 = vstv %s2206_s19  ;;  %v1537_v10 = vstv %s2209_s22  ;;  %s4003_s19 = sld [smem:[#allocation7 + $0x47]] }
 0x234   : > { %v1482_v5 = vmul.f32 %v1481_v2, %v1478_v40  ;;  %v1483_v0 = vmul.f32 %v1481_v2, %v1479_v17  ;;  %s4267_s22 = sld [smem:[#allocation12_spill]] }
 0x236   : > { %v1490_v38 = vadd.f32 %v1482_v5, %v1472_v28  ;;  %v1491_v53 = vadd.f32 %v1483_v0, %v1473_v54 }
 0x237   : > { %1752 = vrot.lane.b32.xlu2 %v3332_v4, %s4266_s13  ;;  %1754 = vrot.lane.b32.xlu0 %v3328_v46, %s4266_s13 }
 0x238   : > { %v1494_v57 = vadd.f32 %v1490_v38, %v1488_v62  ;;  %v1495_v24 = vadd.f32 %v1491_v53, %v1489_v23  ;;  %1744 = vrot.lane.b32.xlu1 %v3314_v37, %s4266_s13 }
 0x239   : > { %v1513_v11 = vpop.permute.xlu0 %1512  ;;  %v1553_v12 = vpop.permute.xlu2 %1552 }
 0x23a   : > { %v3827_v31 = vadd.f32 %v1494_v57, %v1492_v35  ;;  %v3829_v63 = vadd.f32 %v1495_v24, %v1493_v58  ;;  %v1514_v50 = vsel %vm468_vm5, %v1511_v59, %v1513_v11  ;;  %v1515_v30 = vsel %vm468_vm5, %v1513_v11, %v1511_v59  ;;  %v1503_v26 = vpop.permute.xlu1 %1502 }
 0x23b   : > { %v1518_v55 = vmul.f32 %v1517_v45, %v1514_v50  ;;  %v1519_v39 = vmul.f32 %v1517_v45, %v1515_v30  ;;  %v1504_v42 = vsel %vm468_vm5, %v1501_v9, %v1503_v26  ;;  %v1505_v33 = vsel %vm468_vm5, %v1503_v26, %v1501_v9 }
 0x23c   : > { %v1508_v35 = vmul.f32 %v1507_v60, %v1504_v42  ;;  %v1509_v3 = vmul.f32 %v1507_v60, %v1505_v33  ;;  %v1527_v9 = vstv %s2208_s20  ;;  %v1547_v50 = vstv %s2210_s5  ;;  %s1804_s20 = sld [smem:[#allocation2]] }
 0x23e   : > { %v1580_v58 = vadd.f32 %v1518_v55, %v1508_v35  ;;  %v1581_v25 = vadd.f32 %v1519_v39, %v1509_v3 }
 0x23f   : > { %1764 = vrot.lane.b32.xlu2 %v3340_v1, %s4266_s13 }
 0x240   : > { %1762 = vrot.lane.b32.xlu1 %v3330_v36, %s4266_s13  ;;  %s2225_s13 = sld [smem:[#allocation7 + $0x43]] }
 0x241   : > { %v1531_v59 = vpop.permute.xlu0 %1530  ;;  %v1571_v19 = vpop.permute.xlu2 %1570 }
 0x242   : > { %v1521_v48 = vpop.permute.xlu1 %1520 }
 0x243   : > { %v1524_v62 = vsel %vm468_vm5, %v1521_v48, %v3799_v49  ;;  %v1525_v23 = vsel %vm468_vm5, %v3799_v49, %v1521_v48 }
 0x244   : > { %v1528_v49 = vmul.f32 %v1527_v9, %v1524_v62  ;;  %v1529_v0 = vmul.f32 %v1527_v9, %v1525_v23  ;;  %v1567_v23 = vstv %s2212_s2 }
 0x249   : > { %v1543_v2 = vpop.permute.xlu0 %1542  ;;  %v1599_v57 = vpop.permute.xlu2 %1598 }
 0x24a   : > { %v1544_v40 = vsel %vm468_vm5, %v1541_v20, %v1543_v2  ;;  %v1545_v17 = vsel %vm468_vm5, %v1543_v2, %v1541_v20  ;;  %v1533_v28 = vpop.permute.xlu1 %1532  ;;  %v1557_v20 = vstv %s2211_s26 }
 0x24b   : > { %v1534_v54 = vsel %vm468_vm5, %v1531_v59, %v1533_v28  ;;  %v1535_v5 = vsel %vm468_vm5, %v1533_v28, %v1531_v59  ;;  %v1548_v42 = vmul.f32 %v1547_v50, %v1544_v40  ;;  %v1549_v33 = vmul.f32 %v1547_v50, %v1545_v17 }
 0x24c   : > { %v1538_v38 = vmul.f32 %v1537_v10, %v1534_v54  ;;  %v1539_v53 = vmul.f32 %v1537_v10, %v1535_v5 }
 0x24e   : > { %v1582_v24 = vadd.f32 %v1538_v38, %v1528_v49  ;;  %v1583_v45 = vadd.f32 %v1539_v53, %v1529_v0 }
 0x250   : > { %v1588_v11 = vadd.f32 %v1582_v24, %v1580_v58  ;;  %v1589_v60 = vadd.f32 %v1583_v45, %v1581_v25  ;;  %v1577_v25 = vstv %s2213_s0  ;;  %s4268_s0 = sld [smem:[#allocation39_spill]] }
 0x251   : > { %v1561_v30 = vpop.permute.xlu0 %1560  ;;  %v1617_v58 = vpop.permute.xlu2 %1616 }
 0x252   : > { %v1551_v26 = vpop.permute.xlu1 %1550 }
 0x253   : > { %v1554_v55 = vsel %vm468_vm5, %v1551_v26, %v1553_v12  ;;  %v1555_v39 = vsel %vm468_vm5, %v1553_v12, %v1551_v26 }
 0x254   : > { %v1558_v35 = vmul.f32 %v1557_v20, %v1554_v55  ;;  %v1559_v3 = vmul.f32 %v1557_v20, %v1555_v39  ;;  %v1603_v55 = vstv %s2214_s3 }
 0x256   : > { %v1584_v59 = vadd.f32 %v1558_v35, %v1548_v42  ;;  %v1585_v48 = vadd.f32 %v1559_v3, %v1549_v33  ;;  %v1613_v42 = vstv %s2215_s6  ;;  %s359_s2 = scalar_lea.vmem %s4268_s0, %s4267_s22 }
 0x259   : > { %v1573_v62 = vpop.permute.xlu0 %1572  ;;  %v1629_v45 = vpop.permute.xlu2 %1628 }
 0x25a   : > { %v1574_v9 = vsel %vm468_vm5, %v1571_v19, %v1573_v62  ;;  %v1575_v2 = vsel %vm468_vm5, %v1573_v62, %v1571_v19  ;;  %v1563_v10 = vpop.permute.xlu1 %1562 }
 0x25b   : > { %v1578_v28 = vmul.f32 %v1577_v25, %v1574_v9  ;;  %v1579_v54 = vmul.f32 %v1577_v25, %v1575_v2  ;;  %v1564_v12 = vsel %vm468_vm5, %v1561_v30, %v1563_v10  ;;  %v1565_v40 = vsel %vm468_vm5, %v1563_v10, %v1561_v30 }
 0x25c   : > { %v1568_v17 = vmul.f32 %v1567_v23, %v1564_v12  ;;  %v1569_v5 = vmul.f32 %v1567_v23, %v1565_v40  ;;  %v1623_v23 = vstv %s2216_s7 }
 0x25e   : > { %v1586_v49 = vadd.f32 %v1578_v28, %v1568_v17  ;;  %v1587_v0 = vadd.f32 %v1579_v54, %v1569_v5  ;;  %v1633_v28 = vstv %s2217_s8  ;;  %s4274_s8 = sld [smem:[#allocation41_spill]] }
 0x260   : > { %v1590_v38 = vadd.f32 %v1586_v49, %v1584_v59  ;;  %v1591_v53 = vadd.f32 %v1587_v0, %v1585_v48 }
 0x261   : > { %v1607_v24 = vpop.permute.xlu0 %1606 }
 0x262   : > { %v3869_v19 = vadd.f32 %v1590_v38, %v1588_v11  ;;  %v3871_v50 = vadd.f32 %v1591_v53, %v1589_v60  ;;  %v1597_v20 = vpop.permute.xlu1 %1596  ;;  %v3881_v60 = vpop.permute.xlu2 %1646 }
 0x263   : > { %v1600_v26 = vsel %vm484_vm6, %v1597_v20, %v1599_v57  ;;  %v1601_v30 = vsel %vm484_vm6, %v1599_v57, %v1597_v20 }
 0x264   : > { %v1604_v3 = vmul.f32 %v1603_v55, %v1600_v26  ;;  %v1605_v59 = vmul.f32 %v1603_v55, %v1601_v30  ;;  %v1359_v30 = vstv %s3889_s4  ;;  %v1363_v55 = vstv %s3891_s25 }
 0x269   : > { %v1619_v39 = vpop.permute.xlu0 %1618 }
 0x26a   : > { %v1609_v33 = vpop.permute.xlu1 %1608  ;;  %v1620_v9 = vsel %vm484_vm6, %v1617_v58, %v1619_v39  ;;  %v1621_v2 = vsel %vm484_vm6, %v1619_v39, %v1617_v58  ;;  %v1659_v0 = vpop.permute.xlu2 %1658  ;;  %v1367_v39 = vstv %s3897_s27 }
 0x26b   : > { %v1610_v35 = vsel %vm484_vm6, %v1607_v24, %v1609_v33  ;;  %v1611_v11 = vsel %vm484_vm6, %v1609_v33, %v1607_v24  ;;  %v1624_v17 = vmul.f32 %v1623_v23, %v1620_v9  ;;  %v1625_v5 = vmul.f32 %v1623_v23, %v1621_v2 }
 0x26c   : > { %v1614_v48 = vmul.f32 %v1613_v42, %v1610_v35  ;;  %v1615_v25 = vmul.f32 %v1613_v42, %v1611_v11  ;;  %v1371_v42 = vstv %s3899_s29  ;;  %v1375_v33 = vstv %s3901_s30  ;;  %s4275_s29 = sld [smem:[#allocation40_spill]] }
 0x26d   : > { %v1379_v35 = vstv %s3903_s21  ;;  %v1372_v23 = vmul.f32 %v1371_v42, %v3288_v52  ;;  %v1369_v2 = vmul.f32 %v1367_v39, %v3244_v13  ;;  %v1364_v52 = vmul.f32 %v1363_v55, %v3177_v32 }
 0x26e   : > { %v1676_v62 = vadd.f32 %v1614_v48, %v1604_v3  ;;  %v1677_v57 = vadd.f32 %v1615_v25, %v1605_v59  ;;  %v1361_v3 = vmul.f32 %v1359_v30, %v3175_v18  ;;  %v1365_v59 = vmul.f32 %v1363_v55, %v3250_v56 }
 0x26f   : > { %v1383_v48 = vstv %s3905_s24  ;;  %v1387_v25 = vstv %s3911_s10  ;;  %v1376_v18 = vmul.f32 %v1375_v33, %v3282_v7  ;;  %v1377_v56 = vmul.f32 %v1375_v33, %v3318_v61 }
 0x270   : > { %v1389_v13 = vmul.f32 %v1387_v25, %v3340_v1  ;;  %v1360_v7 = vmul.f32 %v1359_v30, %v3173_v44  ;;  %v1653_v61 = vstv %s3913_s11 }
 0x271   : > { %v3887_v10 = vpop.permute.xlu0 %1636 }
 0x272   : > { %v1627_v54 = vpop.permute.xlu1 %1626  ;;  %v3923_v11 = vpop.permute.xlu2 %1692  ;;  %s364_s30 = scalar_lea.vmem %s4275_s29, %s4267_s22 }
 0x273   : > { %v1630_v12 = vsel %vm484_vm6, %v1627_v54, %v1629_v45  ;;  %v1631_v40 = vsel %vm484_vm6, %v1629_v45, %v1627_v54  ;;  %v1380_v54 = vmul.f32 %v1379_v35, %v3311_v41  ;;  %v1643_v41 = vstv %s3917_s23 }
 0x274   : > { %v1634_v58 = vmul.f32 %v1633_v28, %v1630_v12  ;;  %v1635_v49 = vmul.f32 %v1633_v28, %v1631_v40  ;;  %v1373_v28 = vmul.f32 %v1371_v42, %v3276_v47  ;;  %v1381_v12 = vmul.f32 %v1379_v35, %v3314_v37 }
 0x275   : > { %v1384_v40 = vmul.f32 %v1383_v48, %v3332_v4  ;;  %v1391_v47 = vadd.f32 %v1365_v59, %v1361_v3  ;;  %v1394_v44 = vadd.f32 %v1380_v54, %v1376_v18  ;;  %v1390_v35 = vadd.f32 %v1364_v52, %v1360_v7 }
 0x276   : > { %v1678_v38 = vadd.f32 %v1634_v58, %v1624_v17  ;;  %v1679_v53 = vadd.f32 %v1635_v49, %v1625_v5  ;;  %v1385_v17 = vmul.f32 %v1383_v48, %v3328_v46  ;;  %v1393_v4 = vadd.f32 %v1373_v28, %v1369_v2 }
 0x277   : > { %v1395_v1 = vadd.f32 %v1381_v12, %v1377_v56  ;;  %v1663_v49 = vstv %s3925_s28 }
 0x278   : > { %v3907_v24 = vadd.f32 %v1678_v38, %v1676_v62  ;;  %v3909_v45 = vadd.f32 %v1679_v53, %v1677_v57  ;;  %v1368_v57 = vmul.f32 %v1367_v39, %v3238_v27  ;;  %v1388_v27 = vmul.f32 %v1387_v25, %v3330_v36 }
 0x279   : > { %v1649_v20 = vpop.permute.xlu0 %1648  ;;  %v1397_v33 = vadd.f32 %v1389_v13, %v1385_v17  ;;  %v1399_v18 = vadd.f32 %v1393_v4, %v1391_v47  ;;  %v1498_v17 = vmul.f32 %v3827_v31, %v4225_v6  ;;  %v1594_v47 = vmul.f32 %v3869_v19, %v3015_v34 }
 0x27a   : > { %v1639_v26 = vpop.permute.xlu1 %1638  ;;  %v1392_v5 = vadd.f32 %v1372_v23, %v1368_v57  ;;  %v1650_v37 = vsel %vm484_vm6, %v3881_v60, %v1649_v20  ;;  %v1651_v32 = vsel %vm484_vm6, %v1649_v20, %v3881_v60  ;;  %v1396_v58 = vadd.f32 %v1388_v27, %v1384_v40  ;;  %v3969_v39 = vpop.permute.xlu2 %1704 }
 0x27b   : > { %v1640_v46 = vsel %vm484_vm6, %v3887_v10, %v1639_v26  ;;  %v1641_v36 = vsel %vm484_vm6, %v1639_v26, %v3887_v10  ;;  %v1673_v20 = vstv %s3931_s9  ;;  %v1654_v30 = vmul.f32 %v1653_v61, %v1650_v37 }
 0x27c   : > { %v1655_v55 = vmul.f32 %v1653_v61, %v1651_v32  ;;  %v1644_v42 = vmul.f32 %v1643_v41, %v1640_v46  ;;  %v1645_v10 = vmul.f32 %v1643_v41, %v1641_v36  ;;  %v1400_v56 = vadd.f32 %v1396_v58, %v1394_v44 }
 0x27d   : > { %v1401_v54 = vadd.f32 %v1397_v33, %v1395_v1  ;;  %v1398_v12 = vadd.f32 %v1392_v5, %v1390_v35  ;;  %v1595_v5 = vmul.f32 %v3871_v50, %v3017_v43  ;;  %v1719_v19 = vstv %s2224_s14 }
 0x27e   : > { %v1680_v23 = vadd.f32 %v1654_v30, %v1644_v42  ;;  %v1739_v42 = vstv %s3997_s16  ;;  %v1759_v35 = vstv %s3999_s17 }
 0x27f   : > { %v1403_v41 = vadd.f32 %v1401_v54, %v1399_v18  ;;  %v1402_v37 = vadd.f32 %v1400_v56, %v1398_v12 }
 0x281   : > { %v1667_v62 = vpop.permute.xlu0 %1666  ;;  %v1792_v31 = vadd.f32 %v1498_v17, %v1402_v37 }
 0x282   : > { %v1657_v9 = vpop.permute.xlu1 %1656  ;;  %v1723_v32 = vpop.permute.xlu2 %1722 }
 0x283   : > { %v1660_v38 = vsel %vm484_vm6, %v1657_v9, %v1659_v0  ;;  %v1661_v53 = vsel %vm484_vm6, %v1659_v0, %v1657_v9  ;;  %v1681_v9 = vadd.f32 %v1655_v55, %v1645_v10  ;;  %v1709_v55 = vstv %s3995_s15 }
 0x284   : > { %v1664_v48 = vmul.f32 %v1663_v49, %v1660_v38  ;;  %v1665_v0 = vmul.f32 %v1663_v49, %v1661_v53 }
 0x289   : > { %v3966_v60 = vpop.permute.xlu0 %1694 }
 0x28a   : > { %v1669_v26 = vpop.permute.xlu1 %1668  ;;  %v1735_v43 = vpop.permute.xlu2 %1734  ;;  %v1696_v30 = vsel %vm499_vm7, %v3923_v11, %v3966_v60  ;;  %v1697_v10 = vsel %vm499_vm7, %v3966_v60, %v3923_v11 }
 0x28b   : > { %v1670_v3 = vsel %vm484_vm6, %v1667_v62, %v1669_v26  ;;  %v1671_v59 = vsel %vm484_vm6, %v1669_v26, %v1667_v62  ;;  %v1499_v62 = vmul.f32 %v3829_v63, %v4226_v29 }
 0x28c   : > { %v1674_v25 = vmul.f32 %v1673_v20, %v1670_v3  ;;  %v1675_v57 = vmul.f32 %v1673_v20, %v1671_v59  ;;  %v1699_v20 = vstv %s3993_s12 }
 0x28d   : > { %v1793_v29 = vadd.f32 %v1499_v62, %v1403_v41 }
 0x28e   : > { %v1682_v2 = vadd.f32 %v1674_v25, %v1664_v48  ;;  %v1683_v28 = vadd.f32 %v1675_v57, %v1665_v0  ;;  %v1700_v57 = vmul.f32 %v1699_v20, %v1696_v30 }
 0x290   : > { %v1686_v40 = vadd.f32 %v1682_v2, %v1680_v23  ;;  %v1687_v27 = vadd.f32 %v1683_v28, %v1681_v9  ;;  %v1749_v23 = vstv %s4001_s18  ;;  %v1701_v9 = vmul.f32 %v1699_v20, %v1697_v10  ;;  %v2310_v20 = vld [vmem:[%s4251_s1 + $0x8] sm:$0xff] }
 0x291   : > { %v1713_v52 = vpop.permute.xlu0 %1712  ;;  %v1769_v28 = vstv %s4003_s19 }
 0x292   : > { %v1688_v13 = vadd.f32 %v1686_v40, %v3907_v24  ;;  %v1689_v7 = vadd.f32 %v1687_v27, %v3909_v45  ;;  %v1703_v61 = vpop.permute.xlu1 %1702 }
 0x293   : > { %v1706_v26 = vsel %vm499_vm7, %v1703_v61, %v3969_v39  ;;  %v1707_v33 = vsel %vm499_vm7, %v3969_v39, %v1703_v61 }
 0x294   : > { %v1690_v46 = vmul.f32 %v1688_v13, %v3046_v22  ;;  %v1691_v6 = vmul.f32 %v1689_v7, %v3048_v15  ;;  %v1710_v18 = vmul.f32 %v1709_v55, %v1706_v26  ;;  %v1711_v56 = vmul.f32 %v1709_v55, %v1707_v33 }
 0x296   : > { %v1794_v63 = vadd.f32 %v1690_v46, %v1594_v47  ;;  %v1795_v24 = vadd.f32 %v1691_v6, %v1595_v5  ;;  %v1772_v6 = vadd.f32 %v1710_v18, %v1700_v57 }
 0x298   : > { %v1798_v36 = vadd.f32 %v1794_v63, %v1792_v31  ;;  %v1799_v45 = vadd.f32 %v1795_v24, %v1793_v29  ;;  %v1773_v31 = vadd.f32 %v1711_v56, %v1701_v9 }
 0x299   : > { %v1725_v4 = vpop.permute.xlu0 %1724 }
 0x29a   : > { %v1715_v44 = vpop.permute.xlu1 %1714  ;;  %v3988_v1 = vadd.f32 %v1799_v45, %v3765_v16  ;;  %v3991_v34 = vadd.f32 %v1798_v36, %v3762_v51  ;;  %v1753_v51 = vpop.permute.xlu2 %1752  ;;  %v1729_v16 = vstv %s2225_s13  ;;  %v1726_v58 = vsel %vm499_vm7, %v1723_v32, %v1725_v4 }
 0x29b   : > { %v1727_v49 = vsel %vm499_vm7, %v1725_v4, %v1723_v32  ;;  %v1716_v38 = vsel %vm499_vm7, %v1713_v52, %v1715_v44  ;;  %v1717_v53 = vsel %vm499_vm7, %v1715_v44, %v1713_v52  ;;  %v1730_v3 = vmul.f32 %v1729_v16, %v1726_v58 }
 0x29c   : > { %v1731_v59 = vmul.f32 %v1729_v16, %v1727_v49  ;;  %v1720_v48 = vmul.f32 %v1719_v19, %v1716_v38  ;;  %v1721_v0 = vmul.f32 %v1719_v19, %v1717_v53  ;;  %v1805_v16 = vstv %s1804_s20  ;;  %v2309_v38 = vld [vmem:[%s4251_s1] sm:$0xff]  ;;  %s4273_s1 = sld [smem:[#allocation11_spill]] }
 0x29e   : > { %v1774_v27 = vadd.f32 %v1730_v3, %v1720_v48  ;;  %v1775_v52 = vadd.f32 %v1731_v59, %v1721_v0 }
 0x2a0   : > { %v1780_v45 = vadd.f32 %v1774_v27, %v1772_v6  ;;  %v1781_v4 = vadd.f32 %v1775_v52, %v1773_v31 }
 0x2a1   : > { %v1743_v15 = vpop.permute.xlu0 %1742 }
 0x2a2   : > { %v1733_v22 = vpop.permute.xlu1 %1732  ;;  %v1765_v40 = vpop.permute.xlu2 %1764  ;;  %s2077_s3 = sshll.u32 %s4273_s1, 3 }
 0x2a3   : > { %v1736_v2 = vsel %vm499_vm7, %v1733_v22, %v1735_v43  ;;  %v1737_v39 = vsel %vm499_vm7, %v1735_v43, %v1733_v22  ;;  %s368_s4 = scalar_lea.vmem %s4274_s8, %s2077_s3 }
 0x2a4   : > { %v1740_v7 = vmul.f32 %v1739_v42, %v1736_v2  ;;  %v1741_v61 = vmul.f32 %v1739_v42, %v1737_v39 }
 0x2a9   : > { %v1755_v25 = vpop.permute.xlu0 %1754 }
 0x2aa   : > { %v1745_v50 = vpop.permute.xlu1 %1744  ;;  %v1756_v54 = vsel %vm499_vm7, %v1753_v51, %v1755_v25  ;;  %v1757_v12 = vsel %vm499_vm7, %v1755_v25, %v1753_v51 }
 0x2ab   : > { %v1746_v11 = vsel %vm499_vm7, %v1743_v15, %v1745_v50  ;;  %v1747_v60 = vsel %vm499_vm7, %v1745_v50, %v1743_v15  ;;  %v1760_v47 = vmul.f32 %v1759_v35, %v1756_v54  ;;  %v1761_v5 = vmul.f32 %v1759_v35, %v1757_v12 }
 0x2ac   : > { %v1750_v17 = vmul.f32 %v1749_v23, %v1746_v11  ;;  %v1751_v62 = vmul.f32 %v1749_v23, %v1747_v60 }
 0x2ae   : > { %v1776_v29 = vadd.f32 %v1750_v17, %v1740_v7  ;;  %v1777_v63 = vadd.f32 %v1751_v62, %v1741_v61 }
 0x2b2   : > { %v1763_v13 = vpop.permute.xlu1 %1762 }
 0x2b3   : > { %v1766_v41 = vsel %vm499_vm7, %v1763_v13, %v1765_v40  ;;  %v1767_v37 = vsel %vm499_vm7, %v1765_v40, %v1763_v13 }
 0x2b4   : > { %v1770_v32 = vmul.f32 %v1769_v28, %v1766_v41  ;;  %v1771_v46 = vmul.f32 %v1769_v28, %v1767_v37 }
 0x2b6   : > { %v1778_v24 = vadd.f32 %v1770_v32, %v1760_v47  ;;  %v1779_v36 = vadd.f32 %v1771_v46, %v1761_v5 }
 0x2b8   : > { %v1782_v44 = vadd.f32 %v1778_v24, %v1776_v29  ;;  %v1783_v43 = vadd.f32 %v1779_v36, %v1777_v63 }
 0x2ba   : > { %v1784_v8 = vadd.f32 %v1782_v44, %v1780_v45  ;;  %v1785_v22 = vadd.f32 %v1783_v43, %v1781_v4 }
 0x2bc   : > { %v1786_v15 = vmul.f32 %v1784_v8, %v3113_v14  ;;  %v1787_v51 = vmul.f32 %v1785_v22, %v3115_v21 }
 0x2be   : > { %v1802_v19 = vadd.f32 %v3991_v34, %v1786_v15  ;;  %v1803_v50 = vadd.f32 %v3988_v1, %v1787_v51 }
 0x2c0   : > { %v1806_v58 = vadd.f32 %v1805_v16, %v1802_v19  ;;  %v1807_v49 = vadd.f32 %v1805_v16, %v1803_v50 }
 0x2c2   : > { %v1808_v53 = vadd.f32 %v2309_v38, %v1806_v58  ;;  %v1809_v30 = vadd.f32 %v2310_v20, %v1807_v49 }
 0x2c4   : > { %1810 = vst [vmem:[%s359_s2] sm:$0xff] %v1808_v53  ;;  %v1812_v55 = vmul.f32 %v1808_v53, %v1808_v53  ;;  %v1813_v14 = vmul.f32 %v1809_v30, %v1809_v30 }
 0x2c5   : > { %1811 = vst [vmem:[%s359_s2 + $0x8] sm:$0xff] %v1809_v30 }
 0x2c6   : > { %v1814_v21 = vadd.f32 1e-10, %v1812_v55  ;;  %v1815_v42 = vadd.f32 1e-10, %v1813_v14 }
 0x2c8   : > { %2288 = vlog2.f32 %v1814_v21 }
 0x2c9   : > { %2290 = vlog2.f32 %v1815_v42 }
 0x2ce   : > { %v2289_v34 = vpop.eup %2288 }
 0x2cf   : > { %v2291_v1 = vpop.eup %2290  ;;  %v1817_v10 = vmul.f32 0.6931472, %v2289_v34  ;;  %v2230_v26 = vmul.f32 -0.6931472, %v2289_v34 }
 0x2d0   : > { %v1819_v33 = vmul.f32 0.6931472, %v2291_v1  ;;  %v2231_v35 = vmul.f32 -0.6931472, %v2291_v1 }
 0x2d1   : > { %v1822_v3 = vmul.f32 1.442695, %v2230_v26  ;;  %v2232_v59 = vadd.f32 1.5586319, %v1817_v10 }
 0x2d2   : > { %v1824_v48 = vmul.f32 1.442695, %v2231_v35  ;;  %v2233_v0 = vadd.f32 1.5586319, %v1819_v33 }
 0x2d3   : > { %2292 = vpow2.f32 %v1822_v3  ;;  %v2234_v25 = vmul.f32 -1.442695, %v2232_v59 }
 0x2d4   : > { %2294 = vpow2.f32 %v1824_v48  ;;  %v2235_v57 = vmul.f32 -1.442695, %v2233_v0 }
 0x2d5   : > { %2296 = vpow2.f32 %v2234_v25 }
 0x2d6   : > { %2298 = vpow2.f32 %v2235_v57 }
 0x2d9   : > { %v2293_v23 = vpop.eup %2292 }
 0x2da   : > { %v2295_v11 = vpop.eup %2294  ;;  %v1826_v60 = vadd.f32 1.0, %v2293_v23 }
 0x2db   : > { %v2297_v9 = vpop.eup %2296  ;;  %v1827_v2 = vadd.f32 1.0, %v2295_v11 }
 0x2dc   : > { %v2299_v39 = vpop.eup %2298  ;;  %2300 = vrcp.f32 %v1826_v60  ;;  %v1876_v28 = vadd.f32 1.0, %v2297_v9  ;;  %v1837_v54 = vand.u32 2147483647, %v1826_v60  ;;  %v1839_v27 = vand.u32 2147483648, %v1826_v60 }
 0x2dd   : > { %2302 = vrcp.f32 %v1827_v2  ;;  %v4059_v18 = vadd.f32 1.0, %v2299_v39  ;;  %v1852_v17 = vand.u32 2147483647, %v1827_v2  ;;  %v1854_v13 = vand.u32 2147483648, %v1827_v2 }
 0x2de   : > { %2304 = vrcp.f32 %v1876_v28  ;;  %vm1833_vm8 = vweird.f32 %v1826_v60  ;;  %vm4062_vm9 = vcmp.eq.f32.partialorder %v1837_v54, 8.507059e+37  ;;  %vm1848_vm10 = vweird.f32 %v1827_v2 }
 0x2df   : > { %2306 = vrcp.f32 %v4059_v18  ;;  %v1840_v5 = vor.u32 1.1754944e-38, %v1839_v27  ;;  %vm4066_vm13 = vcmp.eq.f32.partialorder %v1852_v17, 8.507059e+37  ;;  %v1855_v63 = vor.u32 1.1754944e-38, %v1854_v13 }
 0x2e0   : > { %v1887_v36 = vand.u32 2147483647, %v1876_v28  ;;  %v1889_v4 = vand.u32 2147483648, %v1876_v28  ;;  %v1902_v43 = vand.u32 2147483647, %v4059_v18  ;;  %v1904_v15 = vand.u32 2147483648, %v4059_v18 }
 0x2e1   : > { %vm1883_vm2 = vweird.f32 %v1876_v28  ;;  %vm1898_vm4 = vweird.f32 %v4059_v18 }
 0x2e2   : > { %v2301_v56 = vpop.eup %2300  ;;  %v1890_v53 = vor.u32 1.1754944e-38, %v1889_v4  ;;  %vm1888_vm5 = vcmp.eq.f32.partialorder %v1887_v36, 8.507059e+37  ;;  %v1905_v14 = vor.u32 1.1754944e-38, %v1904_v15  ;;  %vm1903_vm7 = vcmp.eq.f32.partialorder %v1902_v43, 8.507059e+37 }
 0x2e3   : > { %v2303_v12 = vpop.eup %2302  ;;  %v1829_v40 = vmul.f32 %v2301_v56, %v1826_v60  ;;  %vm1834_vm11 = vweird.f32 %v2301_v56 }
 0x2e4   : > { %v1844_v52 = vmul.f32 %v2303_v12, %v1827_v2  ;;  %v2305_v7 = vpop.eup %2304  ;;  %vm1849_vm12 = vweird.f32 %v2303_v12  ;;  %vm1835_vm14 = vmor %vm1833_vm8, %vm1834_vm11 }
 0x2e5   : > { %v1830_v62 = vsub.f32 1.0, %v1829_v40  ;;  %v2307_v37 = vpop.eup %2306  ;;  %v1879_v32 = vmul.f32 %v2305_v7, %v1876_v28  ;;  %vm1850_vm15 = vmor %vm1848_vm10, %vm1849_vm12  ;;  %vm1884_vm0 = vweird.f32 %v2305_v7 }
 0x2e6   : > { %v1845_v41 = vsub.f32 1.0, %v1844_v52  ;;  %v1894_v31 = vmul.f32 %v2307_v37, %v4059_v18  ;;  %vm1899_vm1 = vweird.f32 %v2307_v37  ;;  %vm1885_vm3 = vmor %vm1883_vm2, %vm1884_vm0 }
 0x2e7   : > { %v1831_v47 = vmul.f32 %v2301_v56, %v1830_v62  ;;  %v1880_v24 = vsub.f32 1.0, %v1879_v32  ;;  %vm1900_vm6 = vmor %vm1898_vm4, %vm1899_vm1 }
 0x2e8   : > { %v1846_v46 = vmul.f32 %v2303_v12, %v1845_v41  ;;  %v1895_v44 = vsub.f32 1.0, %v1894_v31 }
 0x2e9   : > { %v1832_v29 = vadd.f32 %v2301_v56, %v1831_v47  ;;  %v1881_v22 = vmul.f32 %v2305_v7, %v1880_v24 }
 0x2ea   : > { %v1847_v45 = vadd.f32 %v2303_v12, %v1846_v46  ;;  %v1896_v19 = vmul.f32 %v2307_v37, %v1895_v44 }
 0x2eb   : > { %v1836_v8 = vsel %vm1835_vm14, %v2301_v56, %v1832_v29  ;;  %v1882_v49 = vadd.f32 %v2305_v7, %v1881_v22 }
 0x2ec   : > { %v1841_v51 = vsel %vm4062_vm9, %v1840_v5, %v1836_v8  ;;  %v1851_v16 = vsel %vm1850_vm15, %v2303_v12, %v1847_v45  ;;  %v1897_v20 = vadd.f32 %v2307_v37, %v1896_v19 }
 0x2ed   : > { %v1856_v50 = vsel %vm4066_vm13, %v1855_v63, %v1851_v16  ;;  %v1858_v58 = vmul.f32 1.2, %v1841_v51  ;;  %v1886_v55 = vsel %vm1885_vm3, %v2305_v7, %v1882_v49 }
 0x2ee   : > { %v1859_v38 = vmul.f32 1.2, %v1856_v50  ;;  %v1891_v42 = vsel %vm1888_vm5, %v1890_v53, %v1886_v55  ;;  %v1901_v34 = vsel %vm1900_vm6, %v2307_v37, %v1897_v20 }
 0x2ef   : > { %v1860_v30 = vadd.f32 -0.1, %v1858_v58  ;;  %v1906_v10 = vsel %vm1903_vm7, %v1905_v14, %v1901_v34 }
 0x2f0   : > { %v1861_v21 = vadd.f32 -0.1, %v1859_v38  ;;  %v1908_v33 = vadd.f32 %v1906_v10, %v1891_v42 }
 0x2f1   : > { %v1862_v1 = vmax.f32 %v1860_v30, 0.0 }
 0x2f2   : > { %v1863_v26 = vmax.f32 %v1861_v21, 0.0  ;;  %1909 = vst [vmem:[%s368_s4] sm:$0xff] %v1908_v33 }
 0x2f3   : > { %v1864_v35 = vmin.f32 %v1862_v1, 1.0 }
 0x2f4   : > { %v1865_v3 = vmin.f32 %v1863_v26, 1.0 }
 0x2f5   : > { %1866 = vst [vmem:[%s364_s30] sm:$0xff] %v1864_v35 }
 0x2f6   : > { %1867 = vst [vmem:[%s364_s30 + $0x8] sm:$0xff] %v1865_v3 }
 0x2f7 PF: > { %s4276_s21 = sld [smem:[#allocation10_spill]] }
 0x2fd   : > { %s22_s29 = sadd.s32 1, %s4276_s21  }
 0x2fe   : > { %p19_p7 = scmp.ge.s32.totalorder %s22_s29, 4  }
 0x300   :  { %21 = sbr.rel (!%p19_p7) target bundleno = 12 (0xc), region = 111 }
 0x305   :  { %1961 = vsyncpa [#allocation4], 1 }
 0x306   :  { %1963 = vsyncpa [#allocation4 + $0x1], 1 }
 0x307   :  { %1964 = vsyncpa [#allocation6], 1 }

</bundles_post_ra>
